<compile_context>
chip_gen: v7x
topology: tpu7x:2x2x1
jax: 0.10.0
libtpu: 0.0.40
codegen_flags: <defaults>
</compile_context>

<pallas_src>
import functools
import math

import jax
import jax.numpy as jnp
from jax import lax
from jax.experimental import pallas as pl
from jax.experimental.pallas import tpu as pltpu

jax.config.update("jax_default_matmul_precision", "highest")

_EPS = 1e-5
_HIGH = jax.lax.Precision.HIGHEST


# ----------------------------- Pallas kernel --------------------------------
def _mlstm_layer_kernel(x_ref,
                        ln_g_ref, ln_b_ref,
                        w_upl_ref, b_upl_ref, w_upr_ref, b_upr_ref,
                        w_cv_ref, b_cv_ref,
                        w_sk_ref, b_sk_ref,
                        w_q_ref, b_q_ref, w_k_ref, b_k_ref, w_v_ref, b_v_ref,
                        w_i_ref, b_i_ref, w_f_ref, b_f_ref, w_o_ref, b_o_ref,
                        gn_g_ref, gn_b_ref,
                        w_dn_ref, b_dn_ref,
                        gmat_ref,
                        out_ref, state_ref,
                        h_buf):
    """One mLSTM block per grid step (grid = layers).

    Weights are pre-transposed on the host so every projection is `x @ W` on
    the MXU.  The layer-to-layer activation is carried in out_ref (constant
    output block index => stays resident in VMEM across grid steps).
    state_ref (per layer): (4, B, H) = (h, c, n, m) at the last timestep.
    """
    T, B, D = out_ref.shape
    H = w_q_ref.shape[1]

    # Layer 0 reads the kernel input; later layers read the previous layer's
    # output which is still resident in VMEM.
    @pl.when(pl.program_id(0) == 0)
    def _():
        out_ref[...] = x_ref[...]

    x_in = out_ref[...]                                          # (T, B, D)

    def proj(x, w_ref, b_ref):                                   # x @ W + b
        y = lax.dot_general(x, w_ref[...], (((x.ndim - 1,), (0,)), ((), ())),
                            precision=_HIGH, preferred_element_type=jnp.float32)
        return y + b_ref[...]

    # ---- time-parallel projections (hoisted out of the recurrence) ----
    mu = jnp.mean(x_in, axis=-1, keepdims=True)
    var = jnp.mean(jnp.square(x_in - mu), axis=-1, keepdims=True)
    x_n = (x_in - mu) * lax.rsqrt(var + _EPS) * ln_g_ref[...] + ln_b_ref[...]

    x_upl = proj(x_n, w_upl_ref, b_upl_ref)                      # (T, B, P)
    x_upr = proj(x_n, w_upr_ref, b_upr_ref)                      # (T, B, H)

    # causal conv along the feature axis == banded (P, P) matmul, then SiLU
    x_cv = proj(x_upl, w_cv_ref, b_cv_ref)
    x_cv = x_cv * jax.nn.sigmoid(x_cv)

    x_sk = proj(x_cv,  w_sk_ref, b_sk_ref)                       # (T, B, H)
    q_a  = proj(x_cv,  w_q_ref,  b_q_ref)
    k_a  = proj(x_cv,  w_k_ref,  b_k_ref)                        # pre-scaled 1/sqrt(hs)
    v_a  = proj(x_upl, w_v_ref,  b_v_ref)
    it_a = proj(x_cv,  w_i_ref,  b_i_ref)
    ft_a = proj(x_cv,  w_f_ref,  b_f_ref)
    o_a  = jax.nn.sigmoid(proj(x_upl, w_o_ref, b_o_ref))

    # ---- sequential exponential-gating recurrence (small critical path) ----
    c = jnp.zeros((B, H), jnp.float32)
    n = jnp.zeros((B, H), jnp.float32)
    m = jnp.zeros((B, H), jnp.float32)
    h = jnp.zeros((B, H), jnp.float32)
    for t in range(T):                       # static unroll: T is small & fixed
        i_t, f_t = it_a[t], ft_a[t]
        q_t, k_t = q_a[t], k_a[t]
        m_new = jnp.maximum(f_t + m, i_t)
        i_g = jnp.exp(i_t - m_new)
        f_g = jnp.exp(f_t + m - m_new)
        c = f_g * c + i_g * (v_a[t] * k_t)
        n = f_g * n + i_g * k_t
        m = m_new
        # denom[h] = max_j | sum_b n[b,h] * q[b,j] |  (row-max of |n^T q|)
        qn = lax.dot_general(q_t, n, (((0,), (0,)), ((), ())),
                             precision=_HIGH,
                             preferred_element_type=jnp.float32)   # (H, H)
        denom = jnp.max(jnp.abs(qn), axis=0, keepdims=True)        # (1, H)
        h = o_a[t] * (c * q_t) / denom
        h_buf[t] = h

    # ---- time-parallel epilogue: GroupNorm + gating + down-proj + residual ----
    gmat = gmat_ref[...]                                         # (H, H) group avg
    h_all = h_buf[...]                                           # (T, B, H)
    gmean = lax.dot_general(h_all, gmat, (((2,), (0,)), ((), ())),
                            precision=_HIGH, preferred_element_type=jnp.float32)
    dev = h_all - gmean
    gvar = lax.dot_general(dev * dev, gmat, (((2,), (0,)), ((), ())),
                           precision=_HIGH, preferred_element_type=jnp.float32)
    h_n = dev * lax.rsqrt(gvar + _EPS) * gn_g_ref[...] + gn_b_ref[...]
    y = (h_n + x_sk) * (x_upr * jax.nn.sigmoid(x_upr))
    out_ref[...] = proj(y, w_dn_ref, b_dn_ref) + x_in            # residual

    # final state for this layer (last timestep): (h, c, n, m)
    state_ref[0] = h
    state_ref[1] = c
    state_ref[2] = n
    state_ref[3] = m


# ------------------------------ host helpers ---------------------------------
def _conv_matrix(w, P):
    """(P, P) banded matrix so x @ W == causal conv1d(kernel=4, pad=3) along features."""
    i = jnp.arange(P)[:, None]
    j = jnp.arange(P)[None, :]
    k = i - j + 3
    valid = (k >= 0) & (k <= 3)
    return jnp.where(valid, w[jnp.clip(k, 0, 3)], 0.0).astype(jnp.float32)


def _group_mean_matrix(H, nh):
    hs = H // nh
    g = jnp.arange(H) // hs
    return jnp.where(g[:, None] == g[None, :], 1.0 / hs, 0.0).astype(jnp.float32)


# ------------------------------ host wrapper ----------------------------------
def mlstm_forward(x, params, *, hidden_size, num_heads, batch_first=False):
    """x: (B,T,D) if batch_first else (T,B,D). Returns (output, (h,c,n,m))."""
    if batch_first:
        x = jnp.swapaxes(x, 0, 1)
    x = x.astype(jnp.float32)
    T, B, D = x.shape
    H, nh = hidden_size, num_heads
    hs = H // nh
    layers = params["layers"]
    L = len(layers)
    P = layers[0]["w_upl"].shape[0]
    ps = P // nh

    def stack(fn):
        return jnp.stack([fn(p).astype(jnp.float32) for p in layers], axis=0)

    def bd(p, wname, bname, scale=1.0):
        W = jnp.zeros((P, H), jnp.float32)
        for g in range(nh):
            blk = p[wname][g]                                  # (hs, ps) torch (out,in)
            W = W.at[g * ps:(g + 1) * ps, g * hs:(g + 1) * hs].set(blk.T)
        b = p[bname].reshape(1, H)
        return W * scale, b * scale

    args = [
        x,
        stack(lambda p: p["ln_g"][None, :]),
        stack(lambda p: p["ln_b"][None, :]),
        stack(lambda p: p["w_upl"].T), stack(lambda p: p["b_upl"][None, :]),
        stack(lambda p: p["w_upr"].T), stack(lambda p: p["b_upr"][None, :]),
        stack(lambda p: _conv_matrix(p["conv_w"], P)),
        stack(lambda p: jnp.broadcast_to(p["conv_b"].astype(jnp.float32), (1, P))),
        stack(lambda p: p["w_sk"].T), stack(lambda p: p["b_sk"][None, :]),
    ]
    for wname, bname, scale in (("wq_blk", "bq_blk", 1.0),
                                ("wk_blk", "bk_blk", 1.0 / math.sqrt(hs)),
                                ("wv_blk", "bv_blk", 1.0)):
        Ws, bs = zip(*[bd(p, wname, bname, scale) for p in layers])
        args += [jnp.stack(Ws), jnp.stack(bs)]
    args += [
        stack(lambda p: p["w_i"].T), stack(lambda p: p["b_i"][None, :]),
        stack(lambda p: p["w_f"].T), stack(lambda p: p["b_f"][None, :]),
        stack(lambda p: p["w_o"].T), stack(lambda p: p["b_o"][None, :]),
        stack(lambda p: p["gn_g"][None, :]), stack(lambda p: p["gn_b"][None, :]),
        stack(lambda p: p["w_dn"].T), stack(lambda p: p["b_dn"][None, :]),
        _group_mean_matrix(H, nh),
    ]

    def per_layer_spec(a):
        nrest = a.ndim - 1

        def imap(l, _n=nrest):
            return (l,) + (0,) * _n

        # leading layer dim squeezed; weight slice DMA'd (double-buffered) per layer
        return pl.BlockSpec((None,) + tuple(a.shape[1:]), imap)

    full_act = pl.BlockSpec((T, B, D), lambda l: (0, 0, 0))
    in_specs = ([full_act]
                + [per_layer_spec(a) for a in args[1:-1]]
                + [pl.BlockSpec((H, H), lambda l: (0, 0))])

    out, state = pl.pallas_call(
        _mlstm_layer_kernel,
        out_shape=(jax.ShapeDtypeStruct((T, B, D), jnp.float32),
                   jax.ShapeDtypeStruct((L, 4, B, H), jnp.float32)),
        grid=(L,),
        in_specs=in_specs,
        out_specs=(full_act,                                       # VMEM-resident carrier
                   pl.BlockSpec((None, 4, B, H), lambda l: (l, 0, 0, 0))),
        scratch_shapes=[pltpu.VMEM((T, B, H), jnp.float32)],
        compiler_params=pltpu.CompilerParams(
            dimension_semantics=("arbitrary",)),                    # layers are sequential
    )(*args)

    if batch_first:
        out = jnp.swapaxes(out, 0, 1)
    final_state = tuple(state[:, g] for g in range(4))             # (h, c, n, m), each (L,B,H)
    return out, final_state


# ----------------------- pure-JAX reference (for check) -----------------------
def mlstm_reference(x, params, *, hidden_size, num_heads, batch_first=False):
    if batch_first:
        x = jnp.swapaxes(x, 0, 1)
    x = x.astype(jnp.float32)
    T, B, D = x.shape
    H, nh = hidden_size, num_heads
    hs = H // nh
    layers = params["layers"]
    L = len(layers)

    def block_diag_apply(z, w_blk, b_blk):
        nh_, hs_, ps_ = w_blk.shape
        zr = z.reshape(B, nh_, ps_)
        return (jnp.einsum("bgp,ghp->bgh", zr, w_blk) + b_blk).reshape(B, nh_ * hs_)

    state = [[jnp.zeros((B, H), jnp.float32) for _ in range(4)] for _ in range(L)]
    outs = []
    for t in range(T):
        x_t = x[t]
        for l in range(L):
            p = layers[l]
            h_prev, c_prev, n_prev, m_prev = state[l]
            xi = x_t
            mu = jnp.mean(xi, -1, keepdims=True)
            var = jnp.mean((xi - mu) ** 2, -1, keepdims=True)
            x_norm = (xi - mu) / jnp.sqrt(var + _EPS) * p["ln_g"] + p["ln_b"]
            x_upl = x_norm @ p["w_upl"].T + p["b_upl"]
            x_upr = x_norm @ p["w_upr"].T + p["b_upr"]
            Pdim = x_upl.shape[-1]
            xp = jnp.pad(x_upl, ((0, 0), (3, 0)))
            x_cv = p["conv_b"] + sum(p["conv_w"][k] * xp[:, k:k + Pdim] for k in range(4))
            x_conv = jax.nn.silu(x_cv)
            x_skip = x_conv @ p["w_sk"].T + p["b_sk"]
            q = block_diag_apply(x_conv, p["wq_blk"], p["bq_blk"])
            k_ = block_diag_apply(x_conv, p["wk_blk"], p["bk_blk"]) / math.sqrt(hs)
            v = block_diag_apply(x_upl, p["wv_blk"], p["bv_blk"])
            i_til = x_conv @ p["w_i"].T + p["b_i"]
            f_til = x_conv @ p["w_f"].T + p["b_f"]
            o = jax.nn.sigmoid(x_upl @ p["w_o"].T + p["b_o"])
            m_t = jnp.maximum(f_til + m_prev, i_til)
            i_g = jnp.exp(i_til - m_t)
            f_g = jnp.exp(f_til + m_prev - m_t)
            c_t = f_g * c_prev + i_g * (v * k_)
            n_t = f_g * n_prev + i_g * k_
            denom = jnp.max(jnp.abs(n_t.T @ q), axis=1)          # (H,)
            h_t = o * (c_t * q) / denom
            hr = h_t.reshape(B, nh, hs)
            gmu = jnp.mean(hr, -1, keepdims=True)
            gvar = jnp.mean((hr - gmu) ** 2, -1, keepdims=True)
            hn = ((hr - gmu) / jnp.sqrt(gvar + _EPS)).reshape(B, H) * p["gn_g"] + p["gn_b"]
            out = (hn + x_skip) * jax.nn.silu(x_upr)
            out = out @ p["w_dn"].T + p["b_dn"]
            x_t = out + xi
            state[l] = [h_t, c_t, n_t, m_t]
        outs.append(x_t)
    y = jnp.stack(outs)
    if batch_first:
        y = jnp.swapaxes(y, 0, 1)
    final_state = tuple(jnp.stack([state[l][g] for l in range(L)]) for g in range(4))
    return y, final_state


# ------------------------------ param init ------------------------------------
def init_params(key, input_size, hidden_size, num_heads, num_layers, proj_factor=2):
    D, H, nh = input_size, hidden_size, num_heads
    P = int(D * proj_factor)
    hs, ps = H // nh, P // nh

    def uni(k, shape, bound):
        return jax.random.uniform(k, shape, jnp.float32, -bound, bound)

    layers = []
    for _ in range(num_layers):
        key, *ks = jax.random.split(key, 27)
        ks = iter(ks)
        bD, bP, bH, bps = (1 / math.sqrt(D), 1 / math.sqrt(P),
                           1 / math.sqrt(H), 1 / math.sqrt(ps))
        layers.append({
            "ln_g": 1.0 + 0.1 * uni(next(ks), (D,), 1.0),
            "ln_b": 0.1 * uni(next(ks), (D,), 1.0),
            "w_upl": uni(next(ks), (P, D), bD), "b_upl": uni(next(ks), (P,), bD),
            "w_upr": uni(next(ks), (H, D), bD), "b_upr": uni(next(ks), (H,), bD),
            "conv_w": uni(next(ks), (4,), 0.5), "conv_b": uni(next(ks), (), 0.5),
            "w_sk": uni(next(ks), (H, P), bP), "b_sk": uni(next(ks), (H,), bP),
            "wq_blk": uni(next(ks), (nh, hs, ps), bps), "bq_blk": uni(next(ks), (nh, hs), bps),
            "wk_blk": uni(next(ks), (nh, hs, ps), bps), "bk_blk": uni(next(ks), (nh, hs), bps),
            "wv_blk": uni(next(ks), (nh, hs, ps), bps), "bv_blk": uni(next(ks), (nh, hs), bps),
            "w_i": uni(next(ks), (H, P), bP), "b_i": uni(next(ks), (H,), bP),
            "w_f": uni(next(ks), (H, P), bP), "b_f": uni(next(ks), (H,), bP),
            "w_o": uni(next(ks), (H, P), bP), "b_o": uni(next(ks), (H,), bP),
            "gn_g": 1.0 + 0.1 * uni(next(ks), (H,), 1.0),
            "gn_b": 0.1 * uni(next(ks), (H,), 1.0),
            "w_dn": uni(next(ks), (D, H), bH), "b_dn": uni(next(ks), (D,), bH),
        })
    return {"layers": layers}


# ---------------------------------- main ---------------------------------------
if __name__ == "__main__":
    B, T = 2, 8
    INPUT_SIZE = 16
    HIDDEN_SIZE = 32
    NUM_HEADS = 4
    NUM_LAYERS = 2
    PROJ_FACTOR = 2

    key = jax.random.PRNGKey(0)
    key, kx, kp = jax.random.split(key, 3)
    x = jax.random.normal(kx, (B, T, INPUT_SIZE), jnp.float32)      # batch_first input
    params = init_params(kp, INPUT_SIZE, HIDDEN_SIZE, NUM_HEADS, NUM_LAYERS, PROJ_FACTOR)

    fwd = functools.partial(mlstm_forward, hidden_size=HIDDEN_SIZE,
                            num_heads=NUM_HEADS, batch_first=True)
    out, (h, c, n, m) = jax.block_until_ready(jax.jit(fwd)(x, params))

    ref = functools.partial(mlstm_reference, hidden_size=HIDDEN_SIZE,
                            num_heads=NUM_HEADS, batch_first=True)
    ref_out, (rh, rc, rn, rm) = jax.jit(ref)(x, params)

    assert out.shape == (B, T, INPUT_SIZE)
    assert h.shape == (NUM_LAYERS, B, HIDDEN_SIZE)
    assert jnp.allclose(out, ref_out, atol=2e-3, rtol=2e-3), float(jnp.max(jnp.abs(out - ref_out)))
    assert jnp.allclose(h, rh, atol=2e-3, rtol=2e-3)
    assert jnp.allclose(c, rc, atol=2e-3, rtol=2e-3)
    assert jnp.allclose(n, rn, atol=2e-3, rtol=2e-3)
    assert jnp.allclose(m, rm, atol=2e-3, rtol=2e-3)

    print("KERNEL_OK")
</pallas_src>

<mosaic_0001>
module attributes {stable_mosaic.version = 11 : i64} {
  func.func @_mlstm_layer_kernel(%arg0: i32, %arg1: memref<8x2x16xf32, #tpu.memory_space<vmem>>, %arg2: memref<1x1x16xf32, #tpu.memory_space<vmem>>, %arg3: memref<1x1x16xf32, #tpu.memory_space<vmem>>, %arg4: memref<1x16x32xf32, #tpu.memory_space<vmem>>, %arg5: memref<1x1x32xf32, #tpu.memory_space<vmem>>, %arg6: memref<1x16x32xf32, #tpu.memory_space<vmem>>, %arg7: memref<1x1x32xf32, #tpu.memory_space<vmem>>, %arg8: memref<1x32x32xf32, #tpu.memory_space<vmem>>, %arg9: memref<1x1x32xf32, #tpu.memory_space<vmem>>, %arg10: memref<1x32x32xf32, #tpu.memory_space<vmem>>, %arg11: memref<1x1x32xf32, #tpu.memory_space<vmem>>, %arg12: memref<1x32x32xf32, #tpu.memory_space<vmem>>, %arg13: memref<1x1x32xf32, #tpu.memory_space<vmem>>, %arg14: memref<1x32x32xf32, #tpu.memory_space<vmem>>, %arg15: memref<1x1x32xf32, #tpu.memory_space<vmem>>, %arg16: memref<1x32x32xf32, #tpu.memory_space<vmem>>, %arg17: memref<1x1x32xf32, #tpu.memory_space<vmem>>, %arg18: memref<1x32x32xf32, #tpu.memory_space<vmem>>, %arg19: memref<1x1x32xf32, #tpu.memory_space<vmem>>, %arg20: memref<1x32x32xf32, #tpu.memory_space<vmem>>, %arg21: memref<1x1x32xf32, #tpu.memory_space<vmem>>, %arg22: memref<1x32x32xf32, #tpu.memory_space<vmem>>, %arg23: memref<1x1x32xf32, #tpu.memory_space<vmem>>, %arg24: memref<1x1x32xf32, #tpu.memory_space<vmem>>, %arg25: memref<1x1x32xf32, #tpu.memory_space<vmem>>, %arg26: memref<1x32x16xf32, #tpu.memory_space<vmem>>, %arg27: memref<1x1x16xf32, #tpu.memory_space<vmem>>, %arg28: memref<32x32xf32, #tpu.memory_space<vmem>>, %arg29: memref<8x2x16xf32, #tpu.memory_space<vmem>>, %arg30: memref<1x4x2x32xf32, #tpu.memory_space<vmem>>, %arg31: memref<8x2x32xf32, #tpu.memory_space<vmem>>) attributes {dimension_semantics = [#tpu.dimension_semantics<arbitrary>], iteration_bounds = array<i64: 2>, scalar_prefetch = 0 : i64, scratch_operands = 1 : i64, tpu.core_type = #tpu.core_type<tc>, window_params = [{pipeline_mode = #tpu.pipeline_mode<synchronous>, transform_indices = @transform_0, window_bounds = array<i64: 8, 2, 16>}, {transform_indices = @transform_1, window_bounds = array<i64: 1, 1, 16>}, {transform_indices = @transform_2, window_bounds = array<i64: 1, 1, 16>}, {transform_indices = @transform_3, window_bounds = array<i64: 1, 16, 32>}, {transform_indices = @transform_4, window_bounds = array<i64: 1, 1, 32>}, {transform_indices = @transform_5, window_bounds = array<i64: 1, 16, 32>}, {transform_indices = @transform_6, window_bounds = array<i64: 1, 1, 32>}, {transform_indices = @transform_7, window_bounds = array<i64: 1, 32, 32>}, {transform_indices = @transform_8, window_bounds = array<i64: 1, 1, 32>}, {transform_indices = @transform_9, window_bounds = array<i64: 1, 32, 32>}, {transform_indices = @transform_10, window_bounds = array<i64: 1, 1, 32>}, {transform_indices = @transform_11, window_bounds = array<i64: 1, 32, 32>}, {transform_indices = @transform_12, window_bounds = array<i64: 1, 1, 32>}, {transform_indices = @transform_13, window_bounds = array<i64: 1, 32, 32>}, {transform_indices = @transform_14, window_bounds = array<i64: 1, 1, 32>}, {transform_indices = @transform_15, window_bounds = array<i64: 1, 32, 32>}, {transform_indices = @transform_16, window_bounds = array<i64: 1, 1, 32>}, {transform_indices = @transform_17, window_bounds = array<i64: 1, 32, 32>}, {transform_indices = @transform_18, window_bounds = array<i64: 1, 1, 32>}, {transform_indices = @transform_19, window_bounds = array<i64: 1, 32, 32>}, {transform_indices = @transform_20, window_bounds = array<i64: 1, 1, 32>}, {transform_indices = @transform_21, window_bounds = array<i64: 1, 32, 32>}, {transform_indices = @transform_22, window_bounds = array<i64: 1, 1, 32>}, {transform_indices = @transform_23, window_bounds = array<i64: 1, 1, 32>}, {transform_indices = @transform_24, window_bounds = array<i64: 1, 1, 32>}, {transform_indices = @transform_25, window_bounds = array<i64: 1, 32, 16>}, {transform_indices = @transform_26, window_bounds = array<i64: 1, 1, 16>}, {pipeline_mode = #tpu.pipeline_mode<synchronous>, transform_indices = @transform_27, window_bounds = array<i64: 32, 32>}, {pipeline_mode = #tpu.pipeline_mode<synchronous>, transform_indices = @transform_28, window_bounds = array<i64: 8, 2, 16>}, {transform_indices = @transform_29, window_bounds = array<i64: 1, 4, 2, 32>}]} {
    %c0_i32 = arith.constant 0 : i32
    %0 = arith.cmpi eq, %arg0, %c0_i32 : i32
    %1 = arith.extui %0 : i1 to i32
    %c0_i32_0 = arith.constant 0 : i32
    %2 = arith.cmpi ne, %1, %c0_i32_0 : i32
    scf.if %2 {
      %c0_162 = arith.constant 0 : index
      %c0_163 = arith.constant 0 : index
      %c0_164 = arith.constant 0 : index
      %472 = vector.load %arg1[%c0_162, %c0_163, %c0_164] : memref<8x2x16xf32, #tpu.memory_space<vmem>>, vector<8x2x16xf32>
      %c0_165 = arith.constant 0 : index
      %c0_166 = arith.constant 0 : index
      %c0_167 = arith.constant 0 : index
      %473 = vector.load %arg29[%c0_165, %c0_166, %c0_167] : memref<8x2x16xf32, #tpu.memory_space<vmem>>, vector<8x2x16xf32>
      tpu.vector_store %arg29[%c0_165, %c0_166, %c0_167], %472 {strides = array<i32>} : memref<8x2x16xf32, #tpu.memory_space<vmem>>, vector<8x2x16xf32>,
    } else {
    }
    %c0 = arith.constant 0 : index
    %c0_1 = arith.constant 0 : index
    %c0_2 = arith.constant 0 : index
    %3 = vector.load %arg29[%c0, %c0_1, %c0_2] : memref<8x2x16xf32, #tpu.memory_space<vmem>>, vector<8x2x16xf32>
    %cst = arith.constant dense<0.000000e+00> : vector<8x2xf32>
    %4 = vector.multi_reduction <add>, %3, %cst [2] : vector<8x2x16xf32> to vector<8x2xf32>
    %5 = vector.shape_cast %4 : vector<8x2xf32> to vector<8x2x1xf32>
    %cst_3 = arith.constant 1.600000e+01 : f32
    %6 = vector.broadcast %cst_3 : f32 to vector<8x2x1xf32>
    %7 = arith.divf %5, %6 : vector<8x2x1xf32>
    %8 = vector.broadcast %7 : vector<8x2x1xf32> to vector<8x2x16xf32>
    %9 = arith.subf %3, %8 : vector<8x2x16xf32>
    %10 = arith.mulf %9, %9 : vector<8x2x16xf32>
    %cst_4 = arith.constant dense<0.000000e+00> : vector<8x2xf32>
    %11 = vector.multi_reduction <add>, %10, %cst_4 [2] : vector<8x2x16xf32> to vector<8x2xf32>
    %12 = vector.shape_cast %11 : vector<8x2xf32> to vector<8x2x1xf32>
    %cst_5 = arith.constant 1.600000e+01 : f32
    %13 = vector.broadcast %cst_5 : f32 to vector<8x2x1xf32>
    %14 = arith.divf %12, %13 : vector<8x2x1xf32>
    %15 = vector.broadcast %7 : vector<8x2x1xf32> to vector<8x2x16xf32>
    %16 = arith.subf %3, %15 : vector<8x2x16xf32>
    %cst_6 = arith.constant 9.99999974E-6 : f32
    %17 = vector.broadcast %cst_6 : f32 to vector<8x2x1xf32>
    %18 = arith.addf %14, %17 : vector<8x2x1xf32>
    %19 = math.rsqrt %18 : vector<8x2x1xf32>
    %20 = vector.broadcast %19 : vector<8x2x1xf32> to vector<8x2x16xf32>
    %21 = arith.mulf %16, %20 : vector<8x2x16xf32>
    %c0_7 = arith.constant 0 : index
    %c0_8 = arith.constant 0 : index
    %c0_9 = arith.constant 0 : index
    %22 = vector.load %arg2[%c0_7, %c0_8, %c0_9] : memref<1x1x16xf32, #tpu.memory_space<vmem>>, vector<1x1x16xf32>
    %23 = vector.shape_cast %22 : vector<1x1x16xf32> to vector<1x16xf32>
    %24 = vector.shape_cast %23 : vector<1x16xf32> to vector<1x1x16xf32>
    %25 = vector.broadcast %24 : vector<1x1x16xf32> to vector<8x2x16xf32>
    %26 = arith.mulf %21, %25 : vector<8x2x16xf32>
    %c0_10 = arith.constant 0 : index
    %c0_11 = arith.constant 0 : index
    %c0_12 = arith.constant 0 : index
    %27 = vector.load %arg3[%c0_10, %c0_11, %c0_12] : memref<1x1x16xf32, #tpu.memory_space<vmem>>, vector<1x1x16xf32>
    %28 = vector.shape_cast %27 : vector<1x1x16xf32> to vector<1x16xf32>
    %29 = vector.shape_cast %28 : vector<1x16xf32> to vector<1x1x16xf32>
    %30 = vector.broadcast %29 : vector<1x1x16xf32> to vector<8x2x16xf32>
    %31 = arith.addf %26, %30 : vector<8x2x16xf32>
    %c0_13 = arith.constant 0 : index
    %c0_14 = arith.constant 0 : index
    %c0_15 = arith.constant 0 : index
    %32 = vector.load %arg4[%c0_13, %c0_14, %c0_15] : memref<1x16x32xf32, #tpu.memory_space<vmem>>, vector<1x16x32xf32>
    %33 = vector.shape_cast %32 : vector<1x16x32xf32> to vector<16x32xf32>
    %cst_16 = arith.constant dense<0.000000e+00> : vector<8x2x32xf32>
    %34 = tpu.matmul %31, %33, %cst_16 {dimension_numbers = #tpu.dot_dimension_numbers<[2], [0], [0, 1], [1], [0, 0, 0, 1, 1, 1], [], []>, precision = #tpu.contract_precision<fp32>} : vector<8x2x16xf32>, vector<16x32xf32>, vector<8x2x32xf32> -> vector<8x2x32xf32>
    %c0_17 = arith.constant 0 : index
    %c0_18 = arith.constant 0 : index
    %c0_19 = arith.constant 0 : index
    %35 = vector.load %arg5[%c0_17, %c0_18, %c0_19] : memref<1x1x32xf32, #tpu.memory_space<vmem>>, vector<1x1x32xf32>
    %36 = vector.shape_cast %35 : vector<1x1x32xf32> to vector<1x32xf32>
    %37 = vector.shape_cast %36 : vector<1x32xf32> to vector<1x1x32xf32>
    %38 = vector.broadcast %37 : vector<1x1x32xf32> to vector<8x2x32xf32>
    %39 = arith.addf %34, %38 : vector<8x2x32xf32>
    %c0_20 = arith.constant 0 : index
    %c0_21 = arith.constant 0 : index
    %c0_22 = arith.constant 0 : index
    %40 = vector.load %arg6[%c0_20, %c0_21, %c0_22] : memref<1x16x32xf32, #tpu.memory_space<vmem>>, vector<1x16x32xf32>
    %41 = vector.shape_cast %40 : vector<1x16x32xf32> to vector<16x32xf32>
    %cst_23 = arith.constant dense<0.000000e+00> : vector<8x2x32xf32>
    %42 = tpu.matmul %31, %41, %cst_23 {dimension_numbers = #tpu.dot_dimension_numbers<[2], [0], [0, 1], [1], [0, 0, 0, 1, 1, 1], [], []>, precision = #tpu.contract_precision<fp32>} : vector<8x2x16xf32>, vector<16x32xf32>, vector<8x2x32xf32> -> vector<8x2x32xf32>
    %c0_24 = arith.constant 0 : index
    %c0_25 = arith.constant 0 : index
    %c0_26 = arith.constant 0 : index
    %43 = vector.load %arg7[%c0_24, %c0_25, %c0_26] : memref<1x1x32xf32, #tpu.memory_space<vmem>>, vector<1x1x32xf32>
    %44 = vector.shape_cast %43 : vector<1x1x32xf32> to vector<1x32xf32>
    %45 = vector.shape_cast %44 : vector<1x32xf32> to vector<1x1x32xf32>
    %46 = vector.broadcast %45 : vector<1x1x32xf32> to vector<8x2x32xf32>
    %47 = arith.addf %42, %46 : vector<8x2x32xf32>
    %c0_27 = arith.constant 0 : index
    %c0_28 = arith.constant 0 : index
    %c0_29 = arith.constant 0 : index
    %48 = vector.load %arg8[%c0_27, %c0_28, %c0_29] : memref<1x32x32xf32, #tpu.memory_space<vmem>>, vector<1x32x32xf32>
    %49 = vector.shape_cast %48 : vector<1x32x32xf32> to vector<32x32xf32>
    %cst_30 = arith.constant dense<0.000000e+00> : vector<8x2x32xf32>
    %50 = tpu.matmul %39, %49, %cst_30 {dimension_numbers = #tpu.dot_dimension_numbers<[2], [0], [0, 1], [1], [0, 0, 0, 1, 1, 1], [], []>, precision = #tpu.contract_precision<fp32>} : vector<8x2x32xf32>, vector<32x32xf32>, vector<8x2x32xf32> -> vector<8x2x32xf32>
    %c0_31 = arith.constant 0 : index
    %c0_32 = arith.constant 0 : index
    %c0_33 = arith.constant 0 : index
    %51 = vector.load %arg9[%c0_31, %c0_32, %c0_33] : memref<1x1x32xf32, #tpu.memory_space<vmem>>, vector<1x1x32xf32>
    %52 = vector.shape_cast %51 : vector<1x1x32xf32> to vector<1x32xf32>
    %53 = vector.shape_cast %52 : vector<1x32xf32> to vector<1x1x32xf32>
    %54 = vector.broadcast %53 : vector<1x1x32xf32> to vector<8x2x32xf32>
    %55 = arith.addf %50, %54 : vector<8x2x32xf32>
    %56 = arith.negf %55 : vector<8x2x32xf32>
    %57 = math.exp %56 : vector<8x2x32xf32>
    %cst_34 = arith.constant 1.000000e+00 : f32
    %58 = vector.broadcast %cst_34 : f32 to vector<8x2x32xf32>
    %59 = arith.addf %58, %57 : vector<8x2x32xf32>
    %60 = arith.divf %58, %59 : vector<8x2x32xf32>
    %61 = arith.mulf %55, %60 : vector<8x2x32xf32>
    %c0_35 = arith.constant 0 : index
    %c0_36 = arith.constant 0 : index
    %c0_37 = arith.constant 0 : index
    %62 = vector.load %arg10[%c0_35, %c0_36, %c0_37] : memref<1x32x32xf32, #tpu.memory_space<vmem>>, vector<1x32x32xf32>
    %63 = vector.shape_cast %62 : vector<1x32x32xf32> to vector<32x32xf32>
    %cst_38 = arith.constant dense<0.000000e+00> : vector<8x2x32xf32>
    %64 = tpu.matmul %61, %63, %cst_38 {dimension_numbers = #tpu.dot_dimension_numbers<[2], [0], [0, 1], [1], [0, 0, 0, 1, 1, 1], [], []>, precision = #tpu.contract_precision<fp32>} : vector<8x2x32xf32>, vector<32x32xf32>, vector<8x2x32xf32> -> vector<8x2x32xf32>
    %c0_39 = arith.constant 0 : index
    %c0_40 = arith.constant 0 : index
    %c0_41 = arith.constant 0 : index
    %65 = vector.load %arg11[%c0_39, %c0_40, %c0_41] : memref<1x1x32xf32, #tpu.memory_space<vmem>>, vector<1x1x32xf32>
    %66 = vector.shape_cast %65 : vector<1x1x32xf32> to vector<1x32xf32>
    %67 = vector.shape_cast %66 : vector<1x32xf32> to vector<1x1x32xf32>
    %68 = vector.broadcast %67 : vector<1x1x32xf32> to vector<8x2x32xf32>
    %69 = arith.addf %64, %68 : vector<8x2x32xf32>
    %c0_42 = arith.constant 0 : index
    %c0_43 = arith.constant 0 : index
    %c0_44 = arith.constant 0 : index
    %70 = vector.load %arg12[%c0_42, %c0_43, %c0_44] : memref<1x32x32xf32, #tpu.memory_space<vmem>>, vector<1x32x32xf32>
    %71 = vector.shape_cast %70 : vector<1x32x32xf32> to vector<32x32xf32>
    %cst_45 = arith.constant dense<0.000000e+00> : vector<8x2x32xf32>
    %72 = tpu.matmul %61, %71, %cst_45 {dimension_numbers = #tpu.dot_dimension_numbers<[2], [0], [0, 1], [1], [0, 0, 0, 1, 1, 1], [], []>, precision = #tpu.contract_precision<fp32>} : vector<8x2x32xf32>, vector<32x32xf32>, vector<8x2x32xf32> -> vector<8x2x32xf32>
    %c0_46 = arith.constant 0 : index
    %c0_47 = arith.constant 0 : index
    %c0_48 = arith.constant 0 : index
    %73 = vector.load %arg13[%c0_46, %c0_47, %c0_48] : memref<1x1x32xf32, #tpu.memory_space<vmem>>, vector<1x1x32xf32>
    %74 = vector.shape_cast %73 : vector<1x1x32xf32> to vector<1x32xf32>
    %75 = vector.shape_cast %74 : vector<1x32xf32> to vector<1x1x32xf32>
    %76 = vector.broadcast %75 : vector<1x1x32xf32> to vector<8x2x32xf32>
    %77 = arith.addf %72, %76 : vector<8x2x32xf32>
    %c0_49 = arith.constant 0 : index
    %c0_50 = arith.constant 0 : index
    %c0_51 = arith.constant 0 : index
    %78 = vector.load %arg14[%c0_49, %c0_50, %c0_51] : memref<1x32x32xf32, #tpu.memory_space<vmem>>, vector<1x32x32xf32>
    %79 = vector.shape_cast %78 : vector<1x32x32xf32> to vector<32x32xf32>
    %cst_52 = arith.constant dense<0.000000e+00> : vector<8x2x32xf32>
    %80 = tpu.matmul %61, %79, %cst_52 {dimension_numbers = #tpu.dot_dimension_numbers<[2], [0], [0, 1], [1], [0, 0, 0, 1, 1, 1], [], []>, precision = #tpu.contract_precision<fp32>} : vector<8x2x32xf32>, vector<32x32xf32>, vector<8x2x32xf32> -> vector<8x2x32xf32>
    %c0_53 = arith.constant 0 : index
    %c0_54 = arith.constant 0 : index
    %c0_55 = arith.constant 0 : index
    %81 = vector.load %arg15[%c0_53, %c0_54, %c0_55] : memref<1x1x32xf32, #tpu.memory_space<vmem>>, vector<1x1x32xf32>
    %82 = vector.shape_cast %81 : vector<1x1x32xf32> to vector<1x32xf32>
    %83 = vector.shape_cast %82 : vector<1x32xf32> to vector<1x1x32xf32>
    %84 = vector.broadcast %83 : vector<1x1x32xf32> to vector<8x2x32xf32>
    %85 = arith.addf %80, %84 : vector<8x2x32xf32>
    %c0_56 = arith.constant 0 : index
    %c0_57 = arith.constant 0 : index
    %c0_58 = arith.constant 0 : index
    %86 = vector.load %arg16[%c0_56, %c0_57, %c0_58] : memref<1x32x32xf32, #tpu.memory_space<vmem>>, vector<1x32x32xf32>
    %87 = vector.shape_cast %86 : vector<1x32x32xf32> to vector<32x32xf32>
    %cst_59 = arith.constant dense<0.000000e+00> : vector<8x2x32xf32>
    %88 = tpu.matmul %39, %87, %cst_59 {dimension_numbers = #tpu.dot_dimension_numbers<[2], [0], [0, 1], [1], [0, 0, 0, 1, 1, 1], [], []>, precision = #tpu.contract_precision<fp32>} : vector<8x2x32xf32>, vector<32x32xf32>, vector<8x2x32xf32> -> vector<8x2x32xf32>
    %c0_60 = arith.constant 0 : index
    %c0_61 = arith.constant 0 : index
    %c0_62 = arith.constant 0 : index
    %89 = vector.load %arg17[%c0_60, %c0_61, %c0_62] : memref<1x1x32xf32, #tpu.memory_space<vmem>>, vector<1x1x32xf32>
    %90 = vector.shape_cast %89 : vector<1x1x32xf32> to vector<1x32xf32>
    %91 = vector.shape_cast %90 : vector<1x32xf32> to vector<1x1x32xf32>
    %92 = vector.broadcast %91 : vector<1x1x32xf32> to vector<8x2x32xf32>
    %93 = arith.addf %88, %92 : vector<8x2x32xf32>
    %c0_63 = arith.constant 0 : index
    %c0_64 = arith.constant 0 : index
    %c0_65 = arith.constant 0 : index
    %94 = vector.load %arg18[%c0_63, %c0_64, %c0_65] : memref<1x32x32xf32, #tpu.memory_space<vmem>>, vector<1x32x32xf32>
    %95 = vector.shape_cast %94 : vector<1x32x32xf32> to vector<32x32xf32>
    %cst_66 = arith.constant dense<0.000000e+00> : vector<8x2x32xf32>
    %96 = tpu.matmul %61, %95, %cst_66 {dimension_numbers = #tpu.dot_dimension_numbers<[2], [0], [0, 1], [1], [0, 0, 0, 1, 1, 1], [], []>, precision = #tpu.contract_precision<fp32>} : vector<8x2x32xf32>, vector<32x32xf32>, vector<8x2x32xf32> -> vector<8x2x32xf32>
    %c0_67 = arith.constant 0 : index
    %c0_68 = arith.constant 0 : index
    %c0_69 = arith.constant 0 : index
    %97 = vector.load %arg19[%c0_67, %c0_68, %c0_69] : memref<1x1x32xf32, #tpu.memory_space<vmem>>, vector<1x1x32xf32>
    %98 = vector.shape_cast %97 : vector<1x1x32xf32> to vector<1x32xf32>
    %99 = vector.shape_cast %98 : vector<1x32xf32> to vector<1x1x32xf32>
    %100 = vector.broadcast %99 : vector<1x1x32xf32> to vector<8x2x32xf32>
    %101 = arith.addf %96, %100 : vector<8x2x32xf32>
    %c0_70 = arith.constant 0 : index
    %c0_71 = arith.constant 0 : index
    %c0_72 = arith.constant 0 : index
    %102 = vector.load %arg20[%c0_70, %c0_71, %c0_72] : memref<1x32x32xf32, #tpu.memory_space<vmem>>, vector<1x32x32xf32>
    %103 = vector.shape_cast %102 : vector<1x32x32xf32> to vector<32x32xf32>
    %cst_73 = arith.constant dense<0.000000e+00> : vector<8x2x32xf32>
    %104 = tpu.matmul %61, %103, %cst_73 {dimension_numbers = #tpu.dot_dimension_numbers<[2], [0], [0, 1], [1], [0, 0, 0, 1, 1, 1], [], []>, precision = #tpu.contract_precision<fp32>} : vector<8x2x32xf32>, vector<32x32xf32>, vector<8x2x32xf32> -> vector<8x2x32xf32>
    %c0_74 = arith.constant 0 : index
    %c0_75 = arith.constant 0 : index
    %c0_76 = arith.constant 0 : index
    %105 = vector.load %arg21[%c0_74, %c0_75, %c0_76] : memref<1x1x32xf32, #tpu.memory_space<vmem>>, vector<1x1x32xf32>
    %106 = vector.shape_cast %105 : vector<1x1x32xf32> to vector<1x32xf32>
    %107 = vector.shape_cast %106 : vector<1x32xf32> to vector<1x1x32xf32>
    %108 = vector.broadcast %107 : vector<1x1x32xf32> to vector<8x2x32xf32>
    %109 = arith.addf %104, %108 : vector<8x2x32xf32>
    %c0_77 = arith.constant 0 : index
    %c0_78 = arith.constant 0 : index
    %c0_79 = arith.constant 0 : index
    %110 = vector.load %arg22[%c0_77, %c0_78, %c0_79] : memref<1x32x32xf32, #tpu.memory_space<vmem>>, vector<1x32x32xf32>
    %111 = vector.shape_cast %110 : vector<1x32x32xf32> to vector<32x32xf32>
    %cst_80 = arith.constant dense<0.000000e+00> : vector<8x2x32xf32>
    %112 = tpu.matmul %39, %111, %cst_80 {dimension_numbers = #tpu.dot_dimension_numbers<[2], [0], [0, 1], [1], [0, 0, 0, 1, 1, 1], [], []>, precision = #tpu.contract_precision<fp32>} : vector<8x2x32xf32>, vector<32x32xf32>, vector<8x2x32xf32> -> vector<8x2x32xf32>
    %c0_81 = arith.constant 0 : index
    %c0_82 = arith.constant 0 : index
    %c0_83 = arith.constant 0 : index
    %113 = vector.load %arg23[%c0_81, %c0_82, %c0_83] : memref<1x1x32xf32, #tpu.memory_space<vmem>>, vector<1x1x32xf32>
    %114 = vector.shape_cast %113 : vector<1x1x32xf32> to vector<1x32xf32>
    %115 = vector.shape_cast %114 : vector<1x32xf32> to vector<1x1x32xf32>
    %116 = vector.broadcast %115 : vector<1x1x32xf32> to vector<8x2x32xf32>
    %117 = arith.addf %112, %116 : vector<8x2x32xf32>
    %118 = arith.negf %117 : vector<8x2x32xf32>
    %119 = math.exp %118 : vector<8x2x32xf32>
    %cst_84 = arith.constant 1.000000e+00 : f32
    %120 = vector.broadcast %cst_84 : f32 to vector<8x2x32xf32>
    %121 = arith.addf %120, %119 : vector<8x2x32xf32>
    %122 = arith.divf %120, %121 : vector<8x2x32xf32>
    %cst_85 = arith.constant 0.000000e+00 : f32
    %123 = vector.broadcast %cst_85 : f32 to vector<2x32xf32>
    %cst_86 = arith.constant 0.000000e+00 : f32
    %124 = vector.broadcast %cst_86 : f32 to vector<2x32xf32>
    %cst_87 = arith.constant 0.000000e+00 : f32
    %125 = vector.broadcast %cst_87 : f32 to vector<2x32xf32>
    %126 = vector.extract_strided_slice %101 {offsets = [0, 0, 0], sizes = [1, 2, 32], strides = [1, 1, 1]} : vector<8x2x32xf32> to vector<1x2x32xf32>
    %127 = vector.shape_cast %126 : vector<1x2x32xf32> to vector<2x32xf32>
    %128 = vector.extract_strided_slice %109 {offsets = [0, 0, 0], sizes = [1, 2, 32], strides = [1, 1, 1]} : vector<8x2x32xf32> to vector<1x2x32xf32>
    %129 = vector.shape_cast %128 : vector<1x2x32xf32> to vector<2x32xf32>
    %130 = vector.extract_strided_slice %77 {offsets = [0, 0, 0], sizes = [1, 2, 32], strides = [1, 1, 1]} : vector<8x2x32xf32> to vector<1x2x32xf32>
    %131 = vector.shape_cast %130 : vector<1x2x32xf32> to vector<2x32xf32>
    %132 = vector.extract_strided_slice %85 {offsets = [0, 0, 0], sizes = [1, 2, 32], strides = [1, 1, 1]} : vector<8x2x32xf32> to vector<1x2x32xf32>
    %133 = vector.shape_cast %132 : vector<1x2x32xf32> to vector<2x32xf32>
    %134 = arith.addf %129, %125 : vector<2x32xf32>
    %135 = arith.maximumf %134, %127 : vector<2x32xf32>
    %136 = arith.subf %127, %135 : vector<2x32xf32>
    %137 = math.exp %136 : vector<2x32xf32>
    %138 = arith.addf %129, %125 : vector<2x32xf32>
    %139 = arith.subf %138, %135 : vector<2x32xf32>
    %140 = math.exp %139 : vector<2x32xf32>
    %141 = arith.mulf %140, %123 : vector<2x32xf32>
    %142 = vector.extract_strided_slice %93 {offsets = [0, 0, 0], sizes = [1, 2, 32], strides = [1, 1, 1]} : vector<8x2x32xf32> to vector<1x2x32xf32>
    %143 = vector.shape_cast %142 : vector<1x2x32xf32> to vector<2x32xf32>
    %144 = arith.mulf %143, %133 : vector<2x32xf32>
    %145 = arith.mulf %137, %144 : vector<2x32xf32>
    %146 = arith.addf %141, %145 : vector<2x32xf32>
    %147 = arith.mulf %140, %124 : vector<2x32xf32>
    %148 = arith.mulf %137, %133 : vector<2x32xf32>
    %149 = arith.addf %147, %148 : vector<2x32xf32>
    %cst_88 = arith.constant dense<0.000000e+00> : vector<32x32xf32>
    %150 = tpu.matmul %131, %149, %cst_88 {dimension_numbers = #tpu.dot_dimension_numbers<[0], [0], [1], [1], [0, 1, 1, 1], [], []>, precision = #tpu.contract_precision<fp32>} : vector<2x32xf32>, vector<2x32xf32>, vector<32x32xf32> -> vector<32x32xf32>
    %151 = math.absf %150 : vector<32x32xf32>
    %cst_89 = arith.constant dense<0xFF800000> : vector<32xf32>
    %152 = vector.multi_reduction <maximumf>, %151, %cst_89 [0] : vector<32x32xf32> to vector<32xf32>
    %153 = vector.shape_cast %152 : vector<32xf32> to vector<1x32xf32>
    %154 = vector.extract_strided_slice %122 {offsets = [0, 0, 0], sizes = [1, 2, 32], strides = [1, 1, 1]} : vector<8x2x32xf32> to vector<1x2x32xf32>
    %155 = vector.shape_cast %154 : vector<1x2x32xf32> to vector<2x32xf32>
    %156 = arith.mulf %146, %131 : vector<2x32xf32>
    %157 = arith.mulf %155, %156 : vector<2x32xf32>
    %158 = vector.broadcast %153 : vector<1x32xf32> to vector<2x32xf32>
    %159 = arith.divf %157, %158 : vector<2x32xf32>
    %c0_90 = arith.constant 0 : index
    %c0_91 = arith.constant 0 : index
    %c0_92 = arith.constant 0 : index
    %160 = vector.load %arg31[%c0_90, %c0_91, %c0_92] : memref<8x2x32xf32, #tpu.memory_space<vmem>>, vector<1x2x32xf32>
    %161 = vector.shape_cast %160 : vector<1x2x32xf32> to vector<2x32xf32>
    %162 = vector.shape_cast %159 : vector<2x32xf32> to vector<1x2x32xf32>
    tpu.vector_store %arg31[%c0_90, %c0_91, %c0_92], %162 {strides = array<i32>} : memref<8x2x32xf32, #tpu.memory_space<vmem>>, vector<1x2x32xf32>,
    %163 = vector.extract_strided_slice %101 {offsets = [1, 0, 0], sizes = [1, 2, 32], strides = [1, 1, 1]} : vector<8x2x32xf32> to vector<1x2x32xf32>
    %164 = vector.shape_cast %163 : vector<1x2x32xf32> to vector<2x32xf32>
    %165 = vector.extract_strided_slice %109 {offsets = [1, 0, 0], sizes = [1, 2, 32], strides = [1, 1, 1]} : vector<8x2x32xf32> to vector<1x2x32xf32>
    %166 = vector.shape_cast %165 : vector<1x2x32xf32> to vector<2x32xf32>
    %167 = vector.extract_strided_slice %77 {offsets = [1, 0, 0], sizes = [1, 2, 32], strides = [1, 1, 1]} : vector<8x2x32xf32> to vector<1x2x32xf32>
    %168 = vector.shape_cast %167 : vector<1x2x32xf32> to vector<2x32xf32>
    %169 = vector.extract_strided_slice %85 {offsets = [1, 0, 0], sizes = [1, 2, 32], strides = [1, 1, 1]} : vector<8x2x32xf32> to vector<1x2x32xf32>
    %170 = vector.shape_cast %169 : vector<1x2x32xf32> to vector<2x32xf32>
    %171 = arith.addf %166, %135 : vector<2x32xf32>
    %172 = arith.maximumf %171, %164 : vector<2x32xf32>
    %173 = arith.subf %164, %172 : vector<2x32xf32>
    %174 = math.exp %173 : vector<2x32xf32>
    %175 = arith.addf %166, %135 : vector<2x32xf32>
    %176 = arith.subf %175, %172 : vector<2x32xf32>
    %177 = math.exp %176 : vector<2x32xf32>
    %178 = arith.mulf %177, %146 : vector<2x32xf32>
    %179 = vector.extract_strided_slice %93 {offsets = [1, 0, 0], sizes = [1, 2, 32], strides = [1, 1, 1]} : vector<8x2x32xf32> to vector<1x2x32xf32>
    %180 = vector.shape_cast %179 : vector<1x2x32xf32> to vector<2x32xf32>
    %181 = arith.mulf %180, %170 : vector<2x32xf32>
    %182 = arith.mulf %174, %181 : vector<2x32xf32>
    %183 = arith.addf %178, %182 : vector<2x32xf32>
    %184 = arith.mulf %177, %149 : vector<2x32xf32>
    %185 = arith.mulf %174, %170 : vector<2x32xf32>
    %186 = arith.addf %184, %185 : vector<2x32xf32>
    %cst_93 = arith.constant dense<0.000000e+00> : vector<32x32xf32>
    %187 = tpu.matmul %168, %186, %cst_93 {dimension_numbers = #tpu.dot_dimension_numbers<[0], [0], [1], [1], [0, 1, 1, 1], [], []>, precision = #tpu.contract_precision<fp32>} : vector<2x32xf32>, vector<2x32xf32>, vector<32x32xf32> -> vector<32x32xf32>
    %188 = math.absf %187 : vector<32x32xf32>
    %cst_94 = arith.constant dense<0xFF800000> : vector<32xf32>
    %189 = vector.multi_reduction <maximumf>, %188, %cst_94 [0] : vector<32x32xf32> to vector<32xf32>
    %190 = vector.shape_cast %189 : vector<32xf32> to vector<1x32xf32>
    %191 = vector.extract_strided_slice %122 {offsets = [1, 0, 0], sizes = [1, 2, 32], strides = [1, 1, 1]} : vector<8x2x32xf32> to vector<1x2x32xf32>
    %192 = vector.shape_cast %191 : vector<1x2x32xf32> to vector<2x32xf32>
    %193 = arith.mulf %183, %168 : vector<2x32xf32>
    %194 = arith.mulf %192, %193 : vector<2x32xf32>
    %195 = vector.broadcast %190 : vector<1x32xf32> to vector<2x32xf32>
    %196 = arith.divf %194, %195 : vector<2x32xf32>
    %c1 = arith.constant 1 : index
    %c0_95 = arith.constant 0 : index
    %c0_96 = arith.constant 0 : index
    %197 = vector.load %arg31[%c1, %c0_95, %c0_96] : memref<8x2x32xf32, #tpu.memory_space<vmem>>, vector<1x2x32xf32>
    %198 = vector.shape_cast %197 : vector<1x2x32xf32> to vector<2x32xf32>
    %199 = vector.shape_cast %196 : vector<2x32xf32> to vector<1x2x32xf32>
    tpu.vector_store %arg31[%c1, %c0_95, %c0_96], %199 {strides = array<i32>} : memref<8x2x32xf32, #tpu.memory_space<vmem>>, vector<1x2x32xf32>,
    %200 = vector.extract_strided_slice %101 {offsets = [2, 0, 0], sizes = [1, 2, 32], strides = [1, 1, 1]} : vector<8x2x32xf32> to vector<1x2x32xf32>
    %201 = vector.shape_cast %200 : vector<1x2x32xf32> to vector<2x32xf32>
    %202 = vector.extract_strided_slice %109 {offsets = [2, 0, 0], sizes = [1, 2, 32], strides = [1, 1, 1]} : vector<8x2x32xf32> to vector<1x2x32xf32>
    %203 = vector.shape_cast %202 : vector<1x2x32xf32> to vector<2x32xf32>
    %204 = vector.extract_strided_slice %77 {offsets = [2, 0, 0], sizes = [1, 2, 32], strides = [1, 1, 1]} : vector<8x2x32xf32> to vector<1x2x32xf32>
    %205 = vector.shape_cast %204 : vector<1x2x32xf32> to vector<2x32xf32>
    %206 = vector.extract_strided_slice %85 {offsets = [2, 0, 0], sizes = [1, 2, 32], strides = [1, 1, 1]} : vector<8x2x32xf32> to vector<1x2x32xf32>
    %207 = vector.shape_cast %206 : vector<1x2x32xf32> to vector<2x32xf32>
    %208 = arith.addf %203, %172 : vector<2x32xf32>
    %209 = arith.maximumf %208, %201 : vector<2x32xf32>
    %210 = arith.subf %201, %209 : vector<2x32xf32>
    %211 = math.exp %210 : vector<2x32xf32>
    %212 = arith.addf %203, %172 : vector<2x32xf32>
    %213 = arith.subf %212, %209 : vector<2x32xf32>
    %214 = math.exp %213 : vector<2x32xf32>
    %215 = arith.mulf %214, %183 : vector<2x32xf32>
    %216 = vector.extract_strided_slice %93 {offsets = [2, 0, 0], sizes = [1, 2, 32], strides = [1, 1, 1]} : vector<8x2x32xf32> to vector<1x2x32xf32>
    %217 = vector.shape_cast %216 : vector<1x2x32xf32> to vector<2x32xf32>
    %218 = arith.mulf %217, %207 : vector<2x32xf32>
    %219 = arith.mulf %211, %218 : vector<2x32xf32>
    %220 = arith.addf %215, %219 : vector<2x32xf32>
    %221 = arith.mulf %214, %186 : vector<2x32xf32>
    %222 = arith.mulf %211, %207 : vector<2x32xf32>
    %223 = arith.addf %221, %222 : vector<2x32xf32>
    %cst_97 = arith.constant dense<0.000000e+00> : vector<32x32xf32>
    %224 = tpu.matmul %205, %223, %cst_97 {dimension_numbers = #tpu.dot_dimension_numbers<[0], [0], [1], [1], [0, 1, 1, 1], [], []>, precision = #tpu.contract_precision<fp32>} : vector<2x32xf32>, vector<2x32xf32>, vector<32x32xf32> -> vector<32x32xf32>
    %225 = math.absf %224 : vector<32x32xf32>
    %cst_98 = arith.constant dense<0xFF800000> : vector<32xf32>
    %226 = vector.multi_reduction <maximumf>, %225, %cst_98 [0] : vector<32x32xf32> to vector<32xf32>
    %227 = vector.shape_cast %226 : vector<32xf32> to vector<1x32xf32>
    %228 = vector.extract_strided_slice %122 {offsets = [2, 0, 0], sizes = [1, 2, 32], strides = [1, 1, 1]} : vector<8x2x32xf32> to vector<1x2x32xf32>
    %229 = vector.shape_cast %228 : vector<1x2x32xf32> to vector<2x32xf32>
    %230 = arith.mulf %220, %205 : vector<2x32xf32>
    %231 = arith.mulf %229, %230 : vector<2x32xf32>
    %232 = vector.broadcast %227 : vector<1x32xf32> to vector<2x32xf32>
    %233 = arith.divf %231, %232 : vector<2x32xf32>
    %c2 = arith.constant 2 : index
    %c0_99 = arith.constant 0 : index
    %c0_100 = arith.constant 0 : index
    %234 = vector.load %arg31[%c2, %c0_99, %c0_100] : memref<8x2x32xf32, #tpu.memory_space<vmem>>, vector<1x2x32xf32>
    %235 = vector.shape_cast %234 : vector<1x2x32xf32> to vector<2x32xf32>
    %236 = vector.shape_cast %233 : vector<2x32xf32> to vector<1x2x32xf32>
    tpu.vector_store %arg31[%c2, %c0_99, %c0_100], %236 {strides = array<i32>} : memref<8x2x32xf32, #tpu.memory_space<vmem>>, vector<1x2x32xf32>,
    %237 = vector.extract_strided_slice %101 {offsets = [3, 0, 0], sizes = [1, 2, 32], strides = [1, 1, 1]} : vector<8x2x32xf32> to vector<1x2x32xf32>
    %238 = vector.shape_cast %237 : vector<1x2x32xf32> to vector<2x32xf32>
    %239 = vector.extract_strided_slice %109 {offsets = [3, 0, 0], sizes = [1, 2, 32], strides = [1, 1, 1]} : vector<8x2x32xf32> to vector<1x2x32xf32>
    %240 = vector.shape_cast %239 : vector<1x2x32xf32> to vector<2x32xf32>
    %241 = vector.extract_strided_slice %77 {offsets = [3, 0, 0], sizes = [1, 2, 32], strides = [1, 1, 1]} : vector<8x2x32xf32> to vector<1x2x32xf32>
    %242 = vector.shape_cast %241 : vector<1x2x32xf32> to vector<2x32xf32>
    %243 = vector.extract_strided_slice %85 {offsets = [3, 0, 0], sizes = [1, 2, 32], strides = [1, 1, 1]} : vector<8x2x32xf32> to vector<1x2x32xf32>
    %244 = vector.shape_cast %243 : vector<1x2x32xf32> to vector<2x32xf32>
    %245 = arith.addf %240, %209 : vector<2x32xf32>
    %246 = arith.maximumf %245, %238 : vector<2x32xf32>
    %247 = arith.subf %238, %246 : vector<2x32xf32>
    %248 = math.exp %247 : vector<2x32xf32>
    %249 = arith.addf %240, %209 : vector<2x32xf32>
    %250 = arith.subf %249, %246 : vector<2x32xf32>
    %251 = math.exp %250 : vector<2x32xf32>
    %252 = arith.mulf %251, %220 : vector<2x32xf32>
    %253 = vector.extract_strided_slice %93 {offsets = [3, 0, 0], sizes = [1, 2, 32], strides = [1, 1, 1]} : vector<8x2x32xf32> to vector<1x2x32xf32>
    %254 = vector.shape_cast %253 : vector<1x2x32xf32> to vector<2x32xf32>
    %255 = arith.mulf %254, %244 : vector<2x32xf32>
    %256 = arith.mulf %248, %255 : vector<2x32xf32>
    %257 = arith.addf %252, %256 : vector<2x32xf32>
    %258 = arith.mulf %251, %223 : vector<2x32xf32>
    %259 = arith.mulf %248, %244 : vector<2x32xf32>
    %260 = arith.addf %258, %259 : vector<2x32xf32>
    %cst_101 = arith.constant dense<0.000000e+00> : vector<32x32xf32>
    %261 = tpu.matmul %242, %260, %cst_101 {dimension_numbers = #tpu.dot_dimension_numbers<[0], [0], [1], [1], [0, 1, 1, 1], [], []>, precision = #tpu.contract_precision<fp32>} : vector<2x32xf32>, vector<2x32xf32>, vector<32x32xf32> -> vector<32x32xf32>
    %262 = math.absf %261 : vector<32x32xf32>
    %cst_102 = arith.constant dense<0xFF800000> : vector<32xf32>
    %263 = vector.multi_reduction <maximumf>, %262, %cst_102 [0] : vector<32x32xf32> to vector<32xf32>
    %264 = vector.shape_cast %263 : vector<32xf32> to vector<1x32xf32>
    %265 = vector.extract_strided_slice %122 {offsets = [3, 0, 0], sizes = [1, 2, 32], strides = [1, 1, 1]} : vector<8x2x32xf32> to vector<1x2x32xf32>
    %266 = vector.shape_cast %265 : vector<1x2x32xf32> to vector<2x32xf32>
    %267 = arith.mulf %257, %242 : vector<2x32xf32>
    %268 = arith.mulf %266, %267 : vector<2x32xf32>
    %269 = vector.broadcast %264 : vector<1x32xf32> to vector<2x32xf32>
    %270 = arith.divf %268, %269 : vector<2x32xf32>
    %c3 = arith.constant 3 : index
    %c0_103 = arith.constant 0 : index
    %c0_104 = arith.constant 0 : index
    %271 = vector.load %arg31[%c3, %c0_103, %c0_104] : memref<8x2x32xf32, #tpu.memory_space<vmem>>, vector<1x2x32xf32>
    %272 = vector.shape_cast %271 : vector<1x2x32xf32> to vector<2x32xf32>
    %273 = vector.shape_cast %270 : vector<2x32xf32> to vector<1x2x32xf32>
    tpu.vector_store %arg31[%c3, %c0_103, %c0_104], %273 {strides = array<i32>} : memref<8x2x32xf32, #tpu.memory_space<vmem>>, vector<1x2x32xf32>,
    %274 = vector.extract_strided_slice %101 {offsets = [4, 0, 0], sizes = [1, 2, 32], strides = [1, 1, 1]} : vector<8x2x32xf32> to vector<1x2x32xf32>
    %275 = vector.shape_cast %274 : vector<1x2x32xf32> to vector<2x32xf32>
    %276 = vector.extract_strided_slice %109 {offsets = [4, 0, 0], sizes = [1, 2, 32], strides = [1, 1, 1]} : vector<8x2x32xf32> to vector<1x2x32xf32>
    %277 = vector.shape_cast %276 : vector<1x2x32xf32> to vector<2x32xf32>
    %278 = vector.extract_strided_slice %77 {offsets = [4, 0, 0], sizes = [1, 2, 32], strides = [1, 1, 1]} : vector<8x2x32xf32> to vector<1x2x32xf32>
    %279 = vector.shape_cast %278 : vector<1x2x32xf32> to vector<2x32xf32>
    %280 = vector.extract_strided_slice %85 {offsets = [4, 0, 0], sizes = [1, 2, 32], strides = [1, 1, 1]} : vector<8x2x32xf32> to vector<1x2x32xf32>
    %281 = vector.shape_cast %280 : vector<1x2x32xf32> to vector<2x32xf32>
    %282 = arith.addf %277, %246 : vector<2x32xf32>
    %283 = arith.maximumf %282, %275 : vector<2x32xf32>
    %284 = arith.subf %275, %283 : vector<2x32xf32>
    %285 = math.exp %284 : vector<2x32xf32>
    %286 = arith.addf %277, %246 : vector<2x32xf32>
    %287 = arith.subf %286, %283 : vector<2x32xf32>
    %288 = math.exp %287 : vector<2x32xf32>
    %289 = arith.mulf %288, %257 : vector<2x32xf32>
    %290 = vector.extract_strided_slice %93 {offsets = [4, 0, 0], sizes = [1, 2, 32], strides = [1, 1, 1]} : vector<8x2x32xf32> to vector<1x2x32xf32>
    %291 = vector.shape_cast %290 : vector<1x2x32xf32> to vector<2x32xf32>
    %292 = arith.mulf %291, %281 : vector<2x32xf32>
    %293 = arith.mulf %285, %292 : vector<2x32xf32>
    %294 = arith.addf %289, %293 : vector<2x32xf32>
    %295 = arith.mulf %288, %260 : vector<2x32xf32>
    %296 = arith.mulf %285, %281 : vector<2x32xf32>
    %297 = arith.addf %295, %296 : vector<2x32xf32>
    %cst_105 = arith.constant dense<0.000000e+00> : vector<32x32xf32>
    %298 = tpu.matmul %279, %297, %cst_105 {dimension_numbers = #tpu.dot_dimension_numbers<[0], [0], [1], [1], [0, 1, 1, 1], [], []>, precision = #tpu.contract_precision<fp32>} : vector<2x32xf32>, vector<2x32xf32>, vector<32x32xf32> -> vector<32x32xf32>
    %299 = math.absf %298 : vector<32x32xf32>
    %cst_106 = arith.constant dense<0xFF800000> : vector<32xf32>
    %300 = vector.multi_reduction <maximumf>, %299, %cst_106 [0] : vector<32x32xf32> to vector<32xf32>
    %301 = vector.shape_cast %300 : vector<32xf32> to vector<1x32xf32>
    %302 = vector.extract_strided_slice %122 {offsets = [4, 0, 0], sizes = [1, 2, 32], strides = [1, 1, 1]} : vector<8x2x32xf32> to vector<1x2x32xf32>
    %303 = vector.shape_cast %302 : vector<1x2x32xf32> to vector<2x32xf32>
    %304 = arith.mulf %294, %279 : vector<2x32xf32>
    %305 = arith.mulf %303, %304 : vector<2x32xf32>
    %306 = vector.broadcast %301 : vector<1x32xf32> to vector<2x32xf32>
    %307 = arith.divf %305, %306 : vector<2x32xf32>
    %c4 = arith.constant 4 : index
    %c0_107 = arith.constant 0 : index
    %c0_108 = arith.constant 0 : index
    %308 = vector.load %arg31[%c4, %c0_107, %c0_108] : memref<8x2x32xf32, #tpu.memory_space<vmem>>, vector<1x2x32xf32>
    %309 = vector.shape_cast %308 : vector<1x2x32xf32> to vector<2x32xf32>
    %310 = vector.shape_cast %307 : vector<2x32xf32> to vector<1x2x32xf32>
    tpu.vector_store %arg31[%c4, %c0_107, %c0_108], %310 {strides = array<i32>} : memref<8x2x32xf32, #tpu.memory_space<vmem>>, vector<1x2x32xf32>,
    %311 = vector.extract_strided_slice %101 {offsets = [5, 0, 0], sizes = [1, 2, 32], strides = [1, 1, 1]} : vector<8x2x32xf32> to vector<1x2x32xf32>
    %312 = vector.shape_cast %311 : vector<1x2x32xf32> to vector<2x32xf32>
    %313 = vector.extract_strided_slice %109 {offsets = [5, 0, 0], sizes = [1, 2, 32], strides = [1, 1, 1]} : vector<8x2x32xf32> to vector<1x2x32xf32>
    %314 = vector.shape_cast %313 : vector<1x2x32xf32> to vector<2x32xf32>
    %315 = vector.extract_strided_slice %77 {offsets = [5, 0, 0], sizes = [1, 2, 32], strides = [1, 1, 1]} : vector<8x2x32xf32> to vector<1x2x32xf32>
    %316 = vector.shape_cast %315 : vector<1x2x32xf32> to vector<2x32xf32>
    %317 = vector.extract_strided_slice %85 {offsets = [5, 0, 0], sizes = [1, 2, 32], strides = [1, 1, 1]} : vector<8x2x32xf32> to vector<1x2x32xf32>
    %318 = vector.shape_cast %317 : vector<1x2x32xf32> to vector<2x32xf32>
    %319 = arith.addf %314, %283 : vector<2x32xf32>
    %320 = arith.maximumf %319, %312 : vector<2x32xf32>
    %321 = arith.subf %312, %320 : vector<2x32xf32>
    %322 = math.exp %321 : vector<2x32xf32>
    %323 = arith.addf %314, %283 : vector<2x32xf32>
    %324 = arith.subf %323, %320 : vector<2x32xf32>
    %325 = math.exp %324 : vector<2x32xf32>
    %326 = arith.mulf %325, %294 : vector<2x32xf32>
    %327 = vector.extract_strided_slice %93 {offsets = [5, 0, 0], sizes = [1, 2, 32], strides = [1, 1, 1]} : vector<8x2x32xf32> to vector<1x2x32xf32>
    %328 = vector.shape_cast %327 : vector<1x2x32xf32> to vector<2x32xf32>
    %329 = arith.mulf %328, %318 : vector<2x32xf32>
    %330 = arith.mulf %322, %329 : vector<2x32xf32>
    %331 = arith.addf %326, %330 : vector<2x32xf32>
    %332 = arith.mulf %325, %297 : vector<2x32xf32>
    %333 = arith.mulf %322, %318 : vector<2x32xf32>
    %334 = arith.addf %332, %333 : vector<2x32xf32>
    %cst_109 = arith.constant dense<0.000000e+00> : vector<32x32xf32>
    %335 = tpu.matmul %316, %334, %cst_109 {dimension_numbers = #tpu.dot_dimension_numbers<[0], [0], [1], [1], [0, 1, 1, 1], [], []>, precision = #tpu.contract_precision<fp32>} : vector<2x32xf32>, vector<2x32xf32>, vector<32x32xf32> -> vector<32x32xf32>
    %336 = math.absf %335 : vector<32x32xf32>
    %cst_110 = arith.constant dense<0xFF800000> : vector<32xf32>
    %337 = vector.multi_reduction <maximumf>, %336, %cst_110 [0] : vector<32x32xf32> to vector<32xf32>
    %338 = vector.shape_cast %337 : vector<32xf32> to vector<1x32xf32>
    %339 = vector.extract_strided_slice %122 {offsets = [5, 0, 0], sizes = [1, 2, 32], strides = [1, 1, 1]} : vector<8x2x32xf32> to vector<1x2x32xf32>
    %340 = vector.shape_cast %339 : vector<1x2x32xf32> to vector<2x32xf32>
    %341 = arith.mulf %331, %316 : vector<2x32xf32>
    %342 = arith.mulf %340, %341 : vector<2x32xf32>
    %343 = vector.broadcast %338 : vector<1x32xf32> to vector<2x32xf32>
    %344 = arith.divf %342, %343 : vector<2x32xf32>
    %c5 = arith.constant 5 : index
    %c0_111 = arith.constant 0 : index
    %c0_112 = arith.constant 0 : index
    %345 = vector.load %arg31[%c5, %c0_111, %c0_112] : memref<8x2x32xf32, #tpu.memory_space<vmem>>, vector<1x2x32xf32>
    %346 = vector.shape_cast %345 : vector<1x2x32xf32> to vector<2x32xf32>
    %347 = vector.shape_cast %344 : vector<2x32xf32> to vector<1x2x32xf32>
    tpu.vector_store %arg31[%c5, %c0_111, %c0_112], %347 {strides = array<i32>} : memref<8x2x32xf32, #tpu.memory_space<vmem>>, vector<1x2x32xf32>,
    %348 = vector.extract_strided_slice %101 {offsets = [6, 0, 0], sizes = [1, 2, 32], strides = [1, 1, 1]} : vector<8x2x32xf32> to vector<1x2x32xf32>
    %349 = vector.shape_cast %348 : vector<1x2x32xf32> to vector<2x32xf32>
    %350 = vector.extract_strided_slice %109 {offsets = [6, 0, 0], sizes = [1, 2, 32], strides = [1, 1, 1]} : vector<8x2x32xf32> to vector<1x2x32xf32>
    %351 = vector.shape_cast %350 : vector<1x2x32xf32> to vector<2x32xf32>
    %352 = vector.extract_strided_slice %77 {offsets = [6, 0, 0], sizes = [1, 2, 32], strides = [1, 1, 1]} : vector<8x2x32xf32> to vector<1x2x32xf32>
    %353 = vector.shape_cast %352 : vector<1x2x32xf32> to vector<2x32xf32>
    %354 = vector.extract_strided_slice %85 {offsets = [6, 0, 0], sizes = [1, 2, 32], strides = [1, 1, 1]} : vector<8x2x32xf32> to vector<1x2x32xf32>
    %355 = vector.shape_cast %354 : vector<1x2x32xf32> to vector<2x32xf32>
    %356 = arith.addf %351, %320 : vector<2x32xf32>
    %357 = arith.maximumf %356, %349 : vector<2x32xf32>
    %358 = arith.subf %349, %357 : vector<2x32xf32>
    %359 = math.exp %358 : vector<2x32xf32>
    %360 = arith.addf %351, %320 : vector<2x32xf32>
    %361 = arith.subf %360, %357 : vector<2x32xf32>
    %362 = math.exp %361 : vector<2x32xf32>
    %363 = arith.mulf %362, %331 : vector<2x32xf32>
    %364 = vector.extract_strided_slice %93 {offsets = [6, 0, 0], sizes = [1, 2, 32], strides = [1, 1, 1]} : vector<8x2x32xf32> to vector<1x2x32xf32>
    %365 = vector.shape_cast %364 : vector<1x2x32xf32> to vector<2x32xf32>
    %366 = arith.mulf %365, %355 : vector<2x32xf32>
    %367 = arith.mulf %359, %366 : vector<2x32xf32>
    %368 = arith.addf %363, %367 : vector<2x32xf32>
    %369 = arith.mulf %362, %334 : vector<2x32xf32>
    %370 = arith.mulf %359, %355 : vector<2x32xf32>
    %371 = arith.addf %369, %370 : vector<2x32xf32>
    %cst_113 = arith.constant dense<0.000000e+00> : vector<32x32xf32>
    %372 = tpu.matmul %353, %371, %cst_113 {dimension_numbers = #tpu.dot_dimension_numbers<[0], [0], [1], [1], [0, 1, 1, 1], [], []>, precision = #tpu.contract_precision<fp32>} : vector<2x32xf32>, vector<2x32xf32>, vector<32x32xf32> -> vector<32x32xf32>
    %373 = math.absf %372 : vector<32x32xf32>
    %cst_114 = arith.constant dense<0xFF800000> : vector<32xf32>
    %374 = vector.multi_reduction <maximumf>, %373, %cst_114 [0] : vector<32x32xf32> to vector<32xf32>
    %375 = vector.shape_cast %374 : vector<32xf32> to vector<1x32xf32>
    %376 = vector.extract_strided_slice %122 {offsets = [6, 0, 0], sizes = [1, 2, 32], strides = [1, 1, 1]} : vector<8x2x32xf32> to vector<1x2x32xf32>
    %377 = vector.shape_cast %376 : vector<1x2x32xf32> to vector<2x32xf32>
    %378 = arith.mulf %368, %353 : vector<2x32xf32>
    %379 = arith.mulf %377, %378 : vector<2x32xf32>
    %380 = vector.broadcast %375 : vector<1x32xf32> to vector<2x32xf32>
    %381 = arith.divf %379, %380 : vector<2x32xf32>
    %c6 = arith.constant 6 : index
    %c0_115 = arith.constant 0 : index
    %c0_116 = arith.constant 0 : index
    %382 = vector.load %arg31[%c6, %c0_115, %c0_116] : memref<8x2x32xf32, #tpu.memory_space<vmem>>, vector<1x2x32xf32>
    %383 = vector.shape_cast %382 : vector<1x2x32xf32> to vector<2x32xf32>
    %384 = vector.shape_cast %381 : vector<2x32xf32> to vector<1x2x32xf32>
    tpu.vector_store %arg31[%c6, %c0_115, %c0_116], %384 {strides = array<i32>} : memref<8x2x32xf32, #tpu.memory_space<vmem>>, vector<1x2x32xf32>,
    %385 = vector.extract_strided_slice %101 {offsets = [7, 0, 0], sizes = [1, 2, 32], strides = [1, 1, 1]} : vector<8x2x32xf32> to vector<1x2x32xf32>
    %386 = vector.shape_cast %385 : vector<1x2x32xf32> to vector<2x32xf32>
    %387 = vector.extract_strided_slice %109 {offsets = [7, 0, 0], sizes = [1, 2, 32], strides = [1, 1, 1]} : vector<8x2x32xf32> to vector<1x2x32xf32>
    %388 = vector.shape_cast %387 : vector<1x2x32xf32> to vector<2x32xf32>
    %389 = vector.extract_strided_slice %77 {offsets = [7, 0, 0], sizes = [1, 2, 32], strides = [1, 1, 1]} : vector<8x2x32xf32> to vector<1x2x32xf32>
    %390 = vector.shape_cast %389 : vector<1x2x32xf32> to vector<2x32xf32>
    %391 = vector.extract_strided_slice %85 {offsets = [7, 0, 0], sizes = [1, 2, 32], strides = [1, 1, 1]} : vector<8x2x32xf32> to vector<1x2x32xf32>
    %392 = vector.shape_cast %391 : vector<1x2x32xf32> to vector<2x32xf32>
    %393 = arith.addf %388, %357 : vector<2x32xf32>
    %394 = arith.maximumf %393, %386 : vector<2x32xf32>
    %395 = arith.subf %386, %394 : vector<2x32xf32>
    %396 = math.exp %395 : vector<2x32xf32>
    %397 = arith.addf %388, %357 : vector<2x32xf32>
    %398 = arith.subf %397, %394 : vector<2x32xf32>
    %399 = math.exp %398 : vector<2x32xf32>
    %400 = arith.mulf %399, %368 : vector<2x32xf32>
    %401 = vector.extract_strided_slice %93 {offsets = [7, 0, 0], sizes = [1, 2, 32], strides = [1, 1, 1]} : vector<8x2x32xf32> to vector<1x2x32xf32>
    %402 = vector.shape_cast %401 : vector<1x2x32xf32> to vector<2x32xf32>
    %403 = arith.mulf %402, %392 : vector<2x32xf32>
    %404 = arith.mulf %396, %403 : vector<2x32xf32>
    %405 = arith.addf %400, %404 : vector<2x32xf32>
    %406 = arith.mulf %399, %371 : vector<2x32xf32>
    %407 = arith.mulf %396, %392 : vector<2x32xf32>
    %408 = arith.addf %406, %407 : vector<2x32xf32>
    %cst_117 = arith.constant dense<0.000000e+00> : vector<32x32xf32>
    %409 = tpu.matmul %390, %408, %cst_117 {dimension_numbers = #tpu.dot_dimension_numbers<[0], [0], [1], [1], [0, 1, 1, 1], [], []>, precision = #tpu.contract_precision<fp32>} : vector<2x32xf32>, vector<2x32xf32>, vector<32x32xf32> -> vector<32x32xf32>
    %410 = math.absf %409 : vector<32x32xf32>
    %cst_118 = arith.constant dense<0xFF800000> : vector<32xf32>
    %411 = vector.multi_reduction <maximumf>, %410, %cst_118 [0] : vector<32x32xf32> to vector<32xf32>
    %412 = vector.shape_cast %411 : vector<32xf32> to vector<1x32xf32>
    %413 = vector.extract_strided_slice %122 {offsets = [7, 0, 0], sizes = [1, 2, 32], strides = [1, 1, 1]} : vector<8x2x32xf32> to vector<1x2x32xf32>
    %414 = vector.shape_cast %413 : vector<1x2x32xf32> to vector<2x32xf32>
    %415 = arith.mulf %405, %390 : vector<2x32xf32>
    %416 = arith.mulf %414, %415 : vector<2x32xf32>
    %417 = vector.broadcast %412 : vector<1x32xf32> to vector<2x32xf32>
    %418 = arith.divf %416, %417 : vector<2x32xf32>
    %c7 = arith.constant 7 : index
    %c0_119 = arith.constant 0 : index
    %c0_120 = arith.constant 0 : index
    %419 = vector.load %arg31[%c7, %c0_119, %c0_120] : memref<8x2x32xf32, #tpu.memory_space<vmem>>, vector<1x2x32xf32>
    %420 = vector.shape_cast %419 : vector<1x2x32xf32> to vector<2x32xf32>
    %421 = vector.shape_cast %418 : vector<2x32xf32> to vector<1x2x32xf32>
    tpu.vector_store %arg31[%c7, %c0_119, %c0_120], %421 {strides = array<i32>} : memref<8x2x32xf32, #tpu.memory_space<vmem>>, vector<1x2x32xf32>,
    %c0_121 = arith.constant 0 : index
    %c0_122 = arith.constant 0 : index
    %422 = vector.load %arg28[%c0_121, %c0_122] : memref<32x32xf32, #tpu.memory_space<vmem>>, vector<32x32xf32>
    %c0_123 = arith.constant 0 : index
    %c0_124 = arith.constant 0 : index
    %c0_125 = arith.constant 0 : index
    %423 = vector.load %arg31[%c0_123, %c0_124, %c0_125] : memref<8x2x32xf32, #tpu.memory_space<vmem>>, vector<8x2x32xf32>
    %cst_126 = arith.constant dense<0.000000e+00> : vector<8x2x32xf32>
    %424 = tpu.matmul %423, %422, %cst_126 {dimension_numbers = #tpu.dot_dimension_numbers<[2], [0], [0, 1], [1], [0, 0, 0, 1, 1, 1], [], []>, precision = #tpu.contract_precision<fp32>} : vector<8x2x32xf32>, vector<32x32xf32>, vector<8x2x32xf32> -> vector<8x2x32xf32>
    %425 = arith.subf %423, %424 : vector<8x2x32xf32>
    %426 = arith.mulf %425, %425 : vector<8x2x32xf32>
    %cst_127 = arith.constant dense<0.000000e+00> : vector<8x2x32xf32>
    %427 = tpu.matmul %426, %422, %cst_127 {dimension_numbers = #tpu.dot_dimension_numbers<[2], [0], [0, 1], [1], [0, 0, 0, 1, 1, 1], [], []>, precision = #tpu.contract_precision<fp32>} : vector<8x2x32xf32>, vector<32x32xf32>, vector<8x2x32xf32> -> vector<8x2x32xf32>
    %cst_128 = arith.constant 9.99999974E-6 : f32
    %428 = vector.broadcast %cst_128 : f32 to vector<8x2x32xf32>
    %429 = arith.addf %427, %428 : vector<8x2x32xf32>
    %430 = math.rsqrt %429 : vector<8x2x32xf32>
    %431 = arith.mulf %425, %430 : vector<8x2x32xf32>
    %c0_129 = arith.constant 0 : index
    %c0_130 = arith.constant 0 : index
    %c0_131 = arith.constant 0 : index
    %432 = vector.load %arg24[%c0_129, %c0_130, %c0_131] : memref<1x1x32xf32, #tpu.memory_space<vmem>>, vector<1x1x32xf32>
    %433 = vector.shape_cast %432 : vector<1x1x32xf32> to vector<1x32xf32>
    %434 = vector.shape_cast %433 : vector<1x32xf32> to vector<1x1x32xf32>
    %435 = vector.broadcast %434 : vector<1x1x32xf32> to vector<8x2x32xf32>
    %436 = arith.mulf %431, %435 : vector<8x2x32xf32>
    %c0_132 = arith.constant 0 : index
    %c0_133 = arith.constant 0 : index
    %c0_134 = arith.constant 0 : index
    %437 = vector.load %arg25[%c0_132, %c0_133, %c0_134] : memref<1x1x32xf32, #tpu.memory_space<vmem>>, vector<1x1x32xf32>
    %438 = vector.shape_cast %437 : vector<1x1x32xf32> to vector<1x32xf32>
    %439 = vector.shape_cast %438 : vector<1x32xf32> to vector<1x1x32xf32>
    %440 = vector.broadcast %439 : vector<1x1x32xf32> to vector<8x2x32xf32>
    %441 = arith.addf %436, %440 : vector<8x2x32xf32>
    %442 = arith.addf %441, %69 : vector<8x2x32xf32>
    %443 = arith.negf %47 : vector<8x2x32xf32>
    %444 = math.exp %443 : vector<8x2x32xf32>
    %cst_135 = arith.constant 1.000000e+00 : f32
    %445 = vector.broadcast %cst_135 : f32 to vector<8x2x32xf32>
    %446 = arith.addf %445, %444 : vector<8x2x32xf32>
    %447 = arith.divf %445, %446 : vector<8x2x32xf32>
    %448 = arith.mulf %47, %447 : vector<8x2x32xf32>
    %449 = arith.mulf %442, %448 : vector<8x2x32xf32>
    %c0_136 = arith.constant 0 : index
    %c0_137 = arith.constant 0 : index
    %c0_138 = arith.constant 0 : index
    %450 = vector.load %arg26[%c0_136, %c0_137, %c0_138] : memref<1x32x16xf32, #tpu.memory_space<vmem>>, vector<1x32x16xf32>
    %451 = vector.shape_cast %450 : vector<1x32x16xf32> to vector<32x16xf32>
    %cst_139 = arith.constant dense<0.000000e+00> : vector<8x2x16xf32>
    %452 = tpu.matmul %449, %451, %cst_139 {dimension_numbers = #tpu.dot_dimension_numbers<[2], [0], [0, 1], [1], [0, 0, 0, 1, 1, 1], [], []>, precision = #tpu.contract_precision<fp32>} : vector<8x2x32xf32>, vector<32x16xf32>, vector<8x2x16xf32> -> vector<8x2x16xf32>
    %c0_140 = arith.constant 0 : index
    %c0_141 = arith.constant 0 : index
    %c0_142 = arith.constant 0 : index
    %453 = vector.load %arg27[%c0_140, %c0_141, %c0_142] : memref<1x1x16xf32, #tpu.memory_space<vmem>>, vector<1x1x16xf32>
    %454 = vector.shape_cast %453 : vector<1x1x16xf32> to vector<1x16xf32>
    %455 = vector.shape_cast %454 : vector<1x16xf32> to vector<1x1x16xf32>
    %456 = vector.broadcast %455 : vector<1x1x16xf32> to vector<8x2x16xf32>
    %457 = arith.addf %452, %456 : vector<8x2x16xf32>
    %458 = arith.addf %457, %3 : vector<8x2x16xf32>
    %c0_143 = arith.constant 0 : index
    %c0_144 = arith.constant 0 : index
    %c0_145 = arith.constant 0 : index
    %459 = vector.load %arg29[%c0_143, %c0_144, %c0_145] : memref<8x2x16xf32, #tpu.memory_space<vmem>>, vector<8x2x16xf32>
    tpu.vector_store %arg29[%c0_143, %c0_144, %c0_145], %458 {strides = array<i32>} : memref<8x2x16xf32, #tpu.memory_space<vmem>>, vector<8x2x16xf32>,
    %c0_146 = arith.constant 0 : index
    %c0_147 = arith.constant 0 : index
    %c0_148 = arith.constant 0 : index
    %c0_149 = arith.constant 0 : index
    %460 = vector.load %arg30[%c0_146, %c0_147, %c0_148, %c0_149] : memref<1x4x2x32xf32, #tpu.memory_space<vmem>>, vector<1x1x2x32xf32>
    %461 = vector.shape_cast %460 : vector<1x1x2x32xf32> to vector<2x32xf32>
    %462 = vector.shape_cast %418 : vector<2x32xf32> to vector<1x1x2x32xf32>
    tpu.vector_store %arg30[%c0_146, %c0_147, %c0_148, %c0_149], %462 {strides = array<i32>} : memref<1x4x2x32xf32, #tpu.memory_space<vmem>>, vector<1x1x2x32xf32>,
    %c0_150 = arith.constant 0 : index
    %c1_151 = arith.constant 1 : index
    %c0_152 = arith.constant 0 : index
    %c0_153 = arith.constant 0 : index
    %463 = vector.load %arg30[%c0_150, %c1_151, %c0_152, %c0_153] : memref<1x4x2x32xf32, #tpu.memory_space<vmem>>, vector<1x1x2x32xf32>
    %464 = vector.shape_cast %463 : vector<1x1x2x32xf32> to vector<2x32xf32>
    %465 = vector.shape_cast %405 : vector<2x32xf32> to vector<1x1x2x32xf32>
    tpu.vector_store %arg30[%c0_150, %c1_151, %c0_152, %c0_153], %465 {strides = array<i32>} : memref<1x4x2x32xf32, #tpu.memory_space<vmem>>, vector<1x1x2x32xf32>,
    %c0_154 = arith.constant 0 : index
    %c2_155 = arith.constant 2 : index
    %c0_156 = arith.constant 0 : index
    %c0_157 = arith.constant 0 : index
    %466 = vector.load %arg30[%c0_154, %c2_155, %c0_156, %c0_157] : memref<1x4x2x32xf32, #tpu.memory_space<vmem>>, vector<1x1x2x32xf32>
    %467 = vector.shape_cast %466 : vector<1x1x2x32xf32> to vector<2x32xf32>
    %468 = vector.shape_cast %408 : vector<2x32xf32> to vector<1x1x2x32xf32>
    tpu.vector_store %arg30[%c0_154, %c2_155, %c0_156, %c0_157], %468 {strides = array<i32>} : memref<1x4x2x32xf32, #tpu.memory_space<vmem>>, vector<1x1x2x32xf32>,
    %c0_158 = arith.constant 0 : index
    %c3_159 = arith.constant 3 : index
    %c0_160 = arith.constant 0 : index
    %c0_161 = arith.constant 0 : index
    %469 = vector.load %arg30[%c0_158, %c3_159, %c0_160, %c0_161] : memref<1x4x2x32xf32, #tpu.memory_space<vmem>>, vector<1x1x2x32xf32>
    %470 = vector.shape_cast %469 : vector<1x1x2x32xf32> to vector<2x32xf32>
    %471 = vector.shape_cast %394 : vector<2x32xf32> to vector<1x1x2x32xf32>
    tpu.vector_store %arg30[%c0_158, %c3_159, %c0_160, %c0_161], %471 {strides = array<i32>} : memref<1x4x2x32xf32, #tpu.memory_space<vmem>>, vector<1x1x2x32xf32>,
    return
  }
  func.func @transform_0(%arg0: i32) -> (i32, i32, i32) {
    %c0_i32 = arith.constant 0 : i32
    %c0_i32_0 = arith.constant 0 : i32
    %c0_i32_1 = arith.constant 0 : i32
    %c0_i32_2 = arith.constant 0 : i32
    return %c0_i32, %c0_i32_0, %c0_i32_1 : i32, i32, i32
  }
  func.func @transform_1(%arg0: i32) -> (i32, i32, i32) {
    %c0_i32 = arith.constant 0 : i32
    %c0_i32_0 = arith.constant 0 : i32
    %c0_i32_1 = arith.constant 0 : i32
    return %arg0, %c0_i32, %c0_i32_0 : i32, i32, i32
  }
  func.func @transform_2(%arg0: i32) -> (i32, i32, i32) {
    %c0_i32 = arith.constant 0 : i32
    %c0_i32_0 = arith.constant 0 : i32
    %c0_i32_1 = arith.constant 0 : i32
    return %arg0, %c0_i32, %c0_i32_0 : i32, i32, i32
  }
  func.func @transform_3(%arg0: i32) -> (i32, i32, i32) {
    %c0_i32 = arith.constant 0 : i32
    %c0_i32_0 = arith.constant 0 : i32
    %c0_i32_1 = arith.constant 0 : i32
    return %arg0, %c0_i32, %c0_i32_0 : i32, i32, i32
  }
  func.func @transform_4(%arg0: i32) -> (i32, i32, i32) {
    %c0_i32 = arith.constant 0 : i32
    %c0_i32_0 = arith.constant 0 : i32
    %c0_i32_1 = arith.constant 0 : i32
    return %arg0, %c0_i32, %c0_i32_0 : i32, i32, i32
  }
  func.func @transform_5(%arg0: i32) -> (i32, i32, i32) {
    %c0_i32 = arith.constant 0 : i32
    %c0_i32_0 = arith.constant 0 : i32
    %c0_i32_1 = arith.constant 0 : i32
    return %arg0, %c0_i32, %c0_i32_0 : i32, i32, i32
  }
  func.func @transform_6(%arg0: i32) -> (i32, i32, i32) {
    %c0_i32 = arith.constant 0 : i32
    %c0_i32_0 = arith.constant 0 : i32
    %c0_i32_1 = arith.constant 0 : i32
    return %arg0, %c0_i32, %c0_i32_0 : i32, i32, i32
  }
  func.func @transform_7(%arg0: i32) -> (i32, i32, i32) {
    %c0_i32 = arith.constant 0 : i32
    %c0_i32_0 = arith.constant 0 : i32
    %c0_i32_1 = arith.constant 0 : i32
    return %arg0, %c0_i32, %c0_i32_0 : i32, i32, i32
  }
  func.func @transform_8(%arg0: i32) -> (i32, i32, i32) {
    %c0_i32 = arith.constant 0 : i32
    %c0_i32_0 = arith.constant 0 : i32
    %c0_i32_1 = arith.constant 0 : i32
    return %arg0, %c0_i32, %c0_i32_0 : i32, i32, i32
  }
  func.func @transform_9(%arg0: i32) -> (i32, i32, i32) {
    %c0_i32 = arith.constant 0 : i32
    %c0_i32_0 = arith.constant 0 : i32
    %c0_i32_1 = arith.constant 0 : i32
    return %arg0, %c0_i32, %c0_i32_0 : i32, i32, i32
  }
  func.func @transform_10(%arg0: i32) -> (i32, i32, i32) {
    %c0_i32 = arith.constant 0 : i32
    %c0_i32_0 = arith.constant 0 : i32
    %c0_i32_1 = arith.constant 0 : i32
    return %arg0, %c0_i32, %c0_i32_0 : i32, i32, i32
  }
  func.func @transform_11(%arg0: i32) -> (i32, i32, i32) {
    %c0_i32 = arith.constant 0 : i32
    %c0_i32_0 = arith.constant 0 : i32
    %c0_i32_1 = arith.constant 0 : i32
    return %arg0, %c0_i32, %c0_i32_0 : i32, i32, i32
  }
  func.func @transform_12(%arg0: i32) -> (i32, i32, i32) {
    %c0_i32 = arith.constant 0 : i32
    %c0_i32_0 = arith.constant 0 : i32
    %c0_i32_1 = arith.constant 0 : i32
    return %arg0, %c0_i32, %c0_i32_0 : i32, i32, i32
  }
  func.func @transform_13(%arg0: i32) -> (i32, i32, i32) {
    %c0_i32 = arith.constant 0 : i32
    %c0_i32_0 = arith.constant 0 : i32
    %c0_i32_1 = arith.constant 0 : i32
    return %arg0, %c0_i32, %c0_i32_0 : i32, i32, i32
  }
  func.func @transform_14(%arg0: i32) -> (i32, i32, i32) {
    %c0_i32 = arith.constant 0 : i32
    %c0_i32_0 = arith.constant 0 : i32
    %c0_i32_1 = arith.constant 0 : i32
    return %arg0, %c0_i32, %c0_i32_0 : i32, i32, i32
  }
  func.func @transform_15(%arg0: i32) -> (i32, i32, i32) {
    %c0_i32 = arith.constant 0 : i32
    %c0_i32_0 = arith.constant 0 : i32
    %c0_i32_1 = arith.constant 0 : i32
    return %arg0, %c0_i32, %c0_i32_0 : i32, i32, i32
  }
  func.func @transform_16(%arg0: i32) -> (i32, i32, i32) {
    %c0_i32 = arith.constant 0 : i32
    %c0_i32_0 = arith.constant 0 : i32
    %c0_i32_1 = arith.constant 0 : i32
    return %arg0, %c0_i32, %c0_i32_0 : i32, i32, i32
  }
  func.func @transform_17(%arg0: i32) -> (i32, i32, i32) {
    %c0_i32 = arith.constant 0 : i32
    %c0_i32_0 = arith.constant 0 : i32
    %c0_i32_1 = arith.constant 0 : i32
    return %arg0, %c0_i32, %c0_i32_0 : i32, i32, i32
  }
  func.func @transform_18(%arg0: i32) -> (i32, i32, i32) {
    %c0_i32 = arith.constant 0 : i32
    %c0_i32_0 = arith.constant 0 : i32
    %c0_i32_1 = arith.constant 0 : i32
    return %arg0, %c0_i32, %c0_i32_0 : i32, i32, i32
  }
  func.func @transform_19(%arg0: i32) -> (i32, i32, i32) {
    %c0_i32 = arith.constant 0 : i32
    %c0_i32_0 = arith.constant 0 : i32
    %c0_i32_1 = arith.constant 0 : i32
    return %arg0, %c0_i32, %c0_i32_0 : i32, i32, i32
  }
  func.func @transform_20(%arg0: i32) -> (i32, i32, i32) {
    %c0_i32 = arith.constant 0 : i32
    %c0_i32_0 = arith.constant 0 : i32
    %c0_i32_1 = arith.constant 0 : i32
    return %arg0, %c0_i32, %c0_i32_0 : i32, i32, i32
  }
  func.func @transform_21(%arg0: i32) -> (i32, i32, i32) {
    %c0_i32 = arith.constant 0 : i32
    %c0_i32_0 = arith.constant 0 : i32
    %c0_i32_1 = arith.constant 0 : i32
    return %arg0, %c0_i32, %c0_i32_0 : i32, i32, i32
  }
  func.func @transform_22(%arg0: i32) -> (i32, i32, i32) {
    %c0_i32 = arith.constant 0 : i32
    %c0_i32_0 = arith.constant 0 : i32
    %c0_i32_1 = arith.constant 0 : i32
    return %arg0, %c0_i32, %c0_i32_0 : i32, i32, i32
  }
  func.func @transform_23(%arg0: i32) -> (i32, i32, i32) {
    %c0_i32 = arith.constant 0 : i32
    %c0_i32_0 = arith.constant 0 : i32
    %c0_i32_1 = arith.constant 0 : i32
    return %arg0, %c0_i32, %c0_i32_0 : i32, i32, i32
  }
  func.func @transform_24(%arg0: i32) -> (i32, i32, i32) {
    %c0_i32 = arith.constant 0 : i32
    %c0_i32_0 = arith.constant 0 : i32
    %c0_i32_1 = arith.constant 0 : i32
    return %arg0, %c0_i32, %c0_i32_0 : i32, i32, i32
  }
  func.func @transform_25(%arg0: i32) -> (i32, i32, i32) {
    %c0_i32 = arith.constant 0 : i32
    %c0_i32_0 = arith.constant 0 : i32
    %c0_i32_1 = arith.constant 0 : i32
    return %arg0, %c0_i32, %c0_i32_0 : i32, i32, i32
  }
  func.func @transform_26(%arg0: i32) -> (i32, i32, i32) {
    %c0_i32 = arith.constant 0 : i32
    %c0_i32_0 = arith.constant 0 : i32
    %c0_i32_1 = arith.constant 0 : i32
    return %arg0, %c0_i32, %c0_i32_0 : i32, i32, i32
  }
  func.func @transform_27(%arg0: i32) -> (i32, i32) {
    %c0_i32 = arith.constant 0 : i32
    %c0_i32_0 = arith.constant 0 : i32
    %c0_i32_1 = arith.constant 0 : i32
    return %c0_i32, %c0_i32_0 : i32, i32
  }
  func.func @transform_28(%arg0: i32) -> (i32, i32, i32) {
    %c0_i32 = arith.constant 0 : i32
    %c0_i32_0 = arith.constant 0 : i32
    %c0_i32_1 = arith.constant 0 : i32
    %c0_i32_2 = arith.constant 0 : i32
    return %c0_i32, %c0_i32_0, %c0_i32_1 : i32, i32, i32
  }
  func.func @transform_29(%arg0: i32) -> (i32, i32, i32, i32) {
    %c0_i32 = arith.constant 0 : i32
    %c0_i32_0 = arith.constant 0 : i32
    %c0_i32_1 = arith.constant 0 : i32
    %c0_i32_2 = arith.constant 0 : i32
    return %arg0, %c0_i32, %c0_i32_0, %c0_i32_1 : i32, i32, i32, i32
  }
}

</mosaic_0001>

<bundles_post_ra>
// kernel: mlstm_forward.1
= control target key start
LH: loop header
LB: loop body
LE: loop exit
PB: predicated region body
PF: predicated region fallthrough
CT: control target
= control target key end

     0   :  { %s18254_s6 = smov 1   ;;  %s18255_s10 = smov 2   ;;  %s20505_s0 = inlined_call_operand.smem [shape: u32[30], index: -1, kind: input, shape index: {}] }
   0x1   :  { %s18292_s5 = sld [smem:[%s20505_s0]]   ;;  %s18256_s14 = smov 3  }
   0x2   :  { %s18297_s9 = sld [smem:[%s20505_s0 + %s18254_s6]]   ;;  %s18257_s18 = smov 4  }
   0x3   :  { %s18302_s13 = sld [smem:[%s20505_s0 + %s18255_s10]]   ;;  %s18258_s22 = smov 5  }
   0x4   :  { %s18307_s17 = sld [smem:[%s20505_s0 + %s18256_s14]]   ;;  %s18259_s26 = smov 6  }
   0x5   :  { %s18312_s21 = sld [smem:[%s20505_s0 + %s18257_s18]]   ;;  %s18260_s30 = smov 7  }
   0x6   :  { %s18317_s25 = sld [smem:[%s20505_s0 + %s18258_s22]]   ;;  %s18261_s4 = smov 8  }
   0x7   :  { %20527 = sst [smem:[#allocation3_spill]] %s18292_s5  ;;  %s18262_s10 = smov 9  }
   0x8   :  { %20528 = sst [smem:[#allocation4_spill]] %s18297_s9  ;;  %s18263_s15 = smov 10  }
   0x9   :  { %20529 = sst [smem:[#allocation5_spill]] %s18302_s13  ;;  %s18264_s20 = smov 11  }
   0xa   :  { %20530 = sst [smem:[#allocation6_spill]] %s18307_s17  ;;  %s18266_s1 = smov 13  }
   0xb   :  { %20531 = sst [smem:[#allocation7_spill]] %s18312_s21  ;;  %s18267_s7 = smov 14  }
   0xc   :  { %20532 = sst [smem:[#allocation8_spill]] %s18317_s25  ;;  %s18269_s22 = smov 16  }
   0xd   :  { %s18322_s29 = sld [smem:[%s20505_s0 + %s18259_s26]]   ;;  %s18265_s26 = smov 12  }
   0xe   :  { %s18327_s3 = sld [smem:[%s20505_s0 + %s18260_s30]]   ;;  %s18270_s28 = smov 17  }
   0xf   :  { %s18332_s8 = sld [smem:[%s20505_s0 + %s18261_s4]]  }
  0x10   :  { %s18337_s14 = sld [smem:[%s20505_s0 + %s18262_s10]]  }
  0x11   :  { %s18342_s19 = sld [smem:[%s20505_s0 + %s18263_s15]]   ;;  %s18268_s15 = smov 15  }
  0x12   :  { %s18347_s24 = sld [smem:[%s20505_s0 + %s18264_s20]]  }
  0x13   :  { %20533 = sst [smem:[#allocation9_spill]] %s18322_s29 }
  0x14   :  { %20534 = sst [smem:[#allocation10_spill]] %s18327_s3 }
  0x15   :  { %20535 = sst [smem:[#allocation11_spill]] %s18332_s8 }
  0x16   :  { %20536 = sst [smem:[#allocation12_spill]] %s18337_s14 }
  0x17   :  { %20537 = sst [smem:[#allocation13_spill]] %s18342_s19 }
  0x18   :  { %20538 = sst [smem:[#allocation14_spill]] %s18347_s24 }
  0x19   :  { %s18352_s30 = sld [smem:[%s20505_s0 + %s18265_s26]]  }
  0x1a   :  { %s18357_s6 = sld [smem:[%s20505_s0 + %s18266_s1]]  }
  0x1b   :  { %s18362_s12 = sld [smem:[%s20505_s0 + %s18267_s7]]   ;;  %s18271_s7 = smov 18  }
  0x1c   :  { %s18367_s20 = sld [smem:[%s20505_s0 + %s18268_s15]]   ;;  %s18272_s15 = smov 19  }
  0x1d   :  { %s18372_s27 = sld [smem:[%s20505_s0 + %s18269_s22]]   ;;  %s18273_s22 = smov 20  }
  0x1e   :  { %s18377_s4 = sld [smem:[%s20505_s0 + %s18270_s28]]   ;;  %s18274_s28 = smov 21  }
  0x1f   :  { %20539 = sst [smem:[#allocation15_spill]] %s18352_s30 }
  0x20   :  { %20540 = sst [smem:[#allocation16_spill]] %s18357_s6 }
  0x21   :  { %s18382_s5 = sld [smem:[%s20505_s0 + %s18271_s7]]   ;;  %s18275_s7 = smov 22  }
  0x22   :  { %20541 = sst [smem:[#allocation17_spill]] %s18367_s20 }
  0x23   :  { %20542 = sst [smem:[#allocation18_spill]] %s18372_s27 }
  0x24   :  { %20543 = sst [smem:[#allocation19_spill]] %s18377_s4 }
  0x25   :  { %s18387_s20 = sld [smem:[%s20505_s0 + %s18272_s15]]   ;;  %s18276_s15 = smov 23  }
  0x26   :  { %s18392_s27 = sld [smem:[%s20505_s0 + %s18273_s22]]   ;;  %s18277_s22 = smov 24  }
  0x27   :  { %20544 = sst [smem:[#allocation20_spill]] %s18382_s5 }
  0x28   :  { %s18397_s4 = sld [smem:[%s20505_s0 + %s18274_s28]]   ;;  %s18278_s28 = smov 25  }
  0x29   :  { %s18402_s5 = sld [smem:[%s20505_s0 + %s18275_s7]]   ;;  %s18279_s7 = smov 26  }
  0x2b   :  { %20545 = sst [smem:[#allocation21_spill]] %s18387_s20 }
  0x2c   :  { %20546 = sst [smem:[#allocation22_spill]] %s18392_s27 }
  0x2d   :  { %s18407_s20 = sld [smem:[%s20505_s0 + %s18276_s15]]   ;;  %s18280_s15 = smov 27  }
  0x2e   :  { %20547 = sst [smem:[#allocation23_spill]] %s18397_s4 }
  0x2f   :  { %20548 = sst [smem:[#allocation24_spill]] %s18402_s5 }
  0x30   :  { %s18412_s27 = sld [smem:[%s20505_s0 + %s18277_s22]]   ;;  %s18281_s22 = smov 28  }
  0x31   :  { %s18417_s4 = sld [smem:[%s20505_s0 + %s18278_s28]]   ;;  %s18282_s28 = smov 29  }
  0x32   :  { %s18422_s5 = sld [smem:[%s20505_s0 + %s18279_s7]]   ;;  %s18439_s7 = smov 0  }
  0x33   :  { %20549 = sst [smem:[#allocation25_spill]] %s18407_s20 }
  0x34   :  { %s18427_s20 = sld [smem:[%s20505_s0 + %s18280_s15]]  }
  0x36   :  { %20550 = sst [smem:[#allocation26_spill]] %s18412_s27 }
  0x37   :  { %20551 = sst [smem:[#allocation27_spill]] %s18417_s4 }
  0x38   :  { %s18432_s27 = sld [smem:[%s20505_s0 + %s18281_s22]]  }
  0x39   :  { %s18437_s4 = sld [smem:[%s20505_s0 + %s18282_s28]]  }
  0x3a   :  { %20552 = sst [smem:[#allocation28_spill]] %s18427_s20 }
  0x3e   :  { %20553 = sst [smem:[#allocation29_spill]] %s18432_s27 }
  0x3f   :  { %20554 = sst [smem:[#allocation30_spill]] %s18437_s4 }
  0x40 LB: > { %20555 = sst [smem:[#allocation31_spill]] %s18252_s7  ;;  %s18445_s10 = sadd.s32 4294967295, %s18252_s7   ;;  %s18252_s7 = sphi %s18439_s7, %s70_s7  }
  0x41   : > { %20556 = sst [smem:[#allocation32_spill]] %s18445_s10  ;;  %p15173_p0 = scmp.ge.s32.totalorder %s18252_s7, 1 }
  0x42   : > { %p1035_p1 = scmp.lt.s32.totalorder %s18252_s7, 3 }
  0x44   : > { %p1036_p2 = pnand %p15173_p0, %p1035_p1 }
  0x46   : > { %1039 = sbr.rel (%p1036_p2) target bundleno = 2746 (0xaba), region = 132 }
  0x4d   : > { %s20560_s17 = sld [smem:[#allocation6_spill]]  ;;  %s20561_s25 = sld [smem:[#allocation8_spill]] }
  0x4e   : > { %s20563_s3 = sld [smem:[#allocation10_spill]]  ;;  %s20565_s14 = sld [smem:[#allocation12_spill]] }
  0x4f   : > { %s20567_s24 = sld [smem:[#allocation14_spill]]  ;;  %p1206_p3 = scmp.lt.s32.totalorder %s18445_s10, 1 }
  0x50   : > { %s20569_s6 = sld [smem:[#allocation16_spill]]  ;;  %s20570_s15 = sld [smem:[#allocation17_spill]] }
  0x51   : > { %s18451_s0 = scalar_select %p1206_p3, %s18445_s10, 1 }
  0x52   : > { %s20571_s18 = sld [smem:[#allocation18_spill]]  ;;  %s20572_s23 = sld [smem:[#allocation19_spill]] }
  0x53   : > { %s15243_s22 = sshll.u32 %s18451_s0, 4  ;;  %s20573_s28 = sld [smem:[#allocation20_spill]] }
  0x54   : > { %s18461_s1 = scalar_lea.vmem %s20560_s17, %s15243_s22  ;;  %s20575_s2 = sld [smem:[#allocation21_spill]] }
  0x55   : > { %20574 = sst [smem:[#allocation33_spill]] %s18461_s1  ;;  %s18464_s7 = scalar_lea.vmem %s20561_s25, %s15243_s22 }
  0x56   : > { %20576 = sst [smem:[#allocation34_spill]] %s18464_s7  ;;  %s20577_s20 = sld [smem:[#allocation22_spill]] }
  0x57   : > { %s20578_s10 = sld [smem:[#allocation23_spill]]  ;;  %s15245_s4 = sshll.u32 %s18451_s0, 5 }
  0x58   : > { %s20579_s11 = sld [smem:[#allocation24_spill]]  ;;  %s18470_s16 = scalar_lea.vmem %s20563_s3, %s15245_s4 }
  0x59   : > { %20580 = sst [smem:[#allocation35_spill]] %s18470_s16  ;;  %s20581_s13 = sld [smem:[#allocation25_spill]] }
  0x5a   : > { %s20582_s26 = sld [smem:[#allocation26_spill]]  ;;  %s18475_s21 = scalar_lea.vmem %s20565_s14, %s15245_s4 }
  0x5b   : > { %20583 = sst [smem:[#allocation36_spill]] %s18475_s21  ;;  %s20584_s17 = sld [smem:[#allocation27_spill]] }
  0x5c   : > { %s18480_s22 = scalar_lea.vmem %s20567_s24, %s15245_s4  ;;  %s20586_s25 = sld [smem:[#allocation30_spill]] }
  0x5d   : > { %20585 = sst [smem:[#allocation37_spill]] %s18480_s22  ;;  %s18485_s29 = scalar_lea.vmem %s20569_s6, %s15245_s4 }
  0x5e   : > { %20587 = sst [smem:[#allocation38_spill]] %s18485_s29  ;;  %s1259_s3 = scalar_lea.vmem %s18362_s12, %s18451_s0 }
  0x5f   : > { %s18490_s16 = scalar_lea.vmem %s20570_s15, %s15245_s4  ;;  %s1267_s7 = scalar_lea.vmem %s20571_s18, %s18451_s0 }
  0x60   : > { %s18495_s9 = scalar_lea.vmem %s20572_s23, %s15245_s4  ;;  %s1275_s8 = scalar_lea.vmem %s20573_s28, %s18451_s0 }
  0x61   : > { %s18500_s14 = scalar_lea.vmem %s20575_s2, %s15245_s4  ;;  %s1283_s21 = scalar_lea.vmem %s20577_s20, %s18451_s0 }
  0x62   : > { %s18505_s1 = scalar_lea.vmem %s20578_s10, %s15245_s4  ;;  %s1291_s19 = scalar_lea.vmem %s20579_s11, %s18451_s0 }
  0x63   : > { %s1294_s24 = scalar_lea.vmem %s20581_s13, %s18451_s0  ;;  %s1297_s22 = scalar_lea.vmem %s20582_s26, %s18451_s0 }
  0x64   : > { %s18514_s27 = scalar_lea.vmem %s20584_s17, %s15245_s4  ;;  %s1305_s30 = scalar_lea.vmem %s18422_s5, %s18451_s0 }
  0x65   : > { %s15254_s6 = sshll.u32 %s18451_s0, 3  ;;  %s20588_s15 = sld [smem:[#allocation32_spill]] }
  0x66   : > { %s18520_s29 = scalar_lea.vmem %s20586_s25, %s15254_s6 }
  0x6b   : > { %p15198_p4 = scmp.ne.s32.totalorder %s20588_s15, 0 }
  0x6c   : > { %s20589_s18 = sld [smem:[#allocation3_spill]] (!%p15198_p4)  ;;  %s20590_s23 = sld [smem:[#allocation29_spill]] (!%p15198_p4)  ;;  %vm1323_vm0 = vcmask (!%p15198_p4), 123904  }
  0x6d   : > { %1314 = sbr.rel (%p15198_p4) target bundleno = 120 (0x78), region = 136 }
  0x72   : > { %v1315_v0 = vld [vmem:[%s20589_s18] sm:$0x3] (!%p15198_p4)  ;;  %v1316_v1 = vld [vmem:[%s20589_s18 + $0x2] sm:$0x3] (!%p15198_p4)  ;;  %v1317_v2 = vld [vmem:[%s20589_s18 + $0x4] sm:$0x3] (!%p15198_p4) }
  0x73   : > { %1324 = vst.msk [vmem:[%s20590_s23] sm:$0x3] (!%p15198_p4), %vm1323_vm0, %v1315_v0  ;;  %1325 = vst.msk [vmem:[%s20590_s23 + $0x2] sm:$0x3] (!%p15198_p4), %vm1323_vm0, %v1316_v1  ;;  %v1318_v3 = vld [vmem:[%s20589_s18 + $0x6] sm:$0x3] (!%p15198_p4) }
  0x74   : > { %v1319_v4 = vld [vmem:[%s20589_s18 + $0x8] sm:$0x3]  ;;  %1326 = vst.msk [vmem:[%s20590_s23 + $0x4] sm:$0x3] %vm1323_vm0, %v1317_v2  ;;  %1327 = vst.msk [vmem:[%s20590_s23 + $0x6] sm:$0x3] %vm1323_vm0, %v1318_v3 }
  0x75   : > { %1328 = vst.msk [vmem:[%s20590_s23 + $0x8] sm:$0x3] %vm1323_vm0, %v1319_v4  ;;  %v1320_v5 = vld [vmem:[%s20589_s18 + $0xa] sm:$0x3]  ;;  %v1321_v6 = vld [vmem:[%s20589_s18 + $0xc] sm:$0x3] }
  0x76   : > { %v1322_v7 = vld [vmem:[%s20589_s18 + $0xe] sm:$0x3]  ;;  %1329 = vst.msk [vmem:[%s20590_s23 + $0xa] sm:$0x3] %vm1323_vm0, %v1320_v5  ;;  %1330 = vst.msk [vmem:[%s20590_s23 + $0xc] sm:$0x3] %vm1323_vm0, %v1321_v6 }
  0x77   : > { %1331 = vst.msk [vmem:[%s20590_s23 + $0xe] sm:$0x3] %vm1323_vm0, %v1322_v7 }
  0x78 PF: > { %s20591_s13 = sld [smem:[#allocation29_spill]]  ;;  %vm1340_vm1 = vcmask 123904   ;;  %s20592_s17 = sld [smem:[#allocation33_spill]]  ;;  %vm1536_vm2 = vcmask 130048   ;;  %vm2627_vm3 = vcmask 261120   ;;  %vm7559_vm4 = vcmask 1041408  }
  0x79   : > { %s20593_s25 = sld [smem:[#allocation34_spill]]  ;;  %s20594_s6 = sld [smem:[#allocation4_spill]]  ;;  %vm7546_vm5 = vcmask 15360   ;;  %vm8159_vm6 = vcmask 254976  }
  0x7a   : > { %s20595_s20 = sld [smem:[#allocation5_spill]]  ;;  %s20598_s11 = sld [smem:[#allocation35_spill]] }
  0x7b   : > { %s20599_s26 = sld [smem:[#allocation7_spill]]  ;;  %s20603_s2 = sld [smem:[#allocation36_spill]] }
  0x7c   : > { %s20604_s15 = sld [smem:[#allocation37_spill]]  ;;  %s20605_s23 = sld [smem:[#allocation11_spill]] }
  0x7e   : > { %v1332_v8 = vld [vmem:[%s20591_s13] sm:$0x3]  ;;  %v1334_v9 = vld [vmem:[%s20591_s13 + $0x4] sm:$0x3]  ;;  %v1333_v12 = vld [vmem:[%s20591_s13 + $0x2] sm:$0x3] }
  0x7f   : > { %v1341_v10 = vsel %vm1340_vm1, %v1332_v8, 0.0  ;;  %v1347_v11 = vsel %vm1340_vm1, %v1334_v9, 0.0  ;;  %v1335_v13 = vld [vmem:[%s20591_s13 + $0x6] sm:$0x3]  ;;  %v1344_v14 = vsel %vm1340_vm1, %v1333_v12, 0.0  ;;  %v1477_v1 = vld [vmem:[%s20592_s17 + $0x8] sm:$0xff]  ;;  %s20596_s4 = scalar_lea.vmem %s20594_s6, %s18451_s0 }
  0x80   : > { %1342 = vadd.xlane.f32.xlu0 %v1341_v10  ;;  %1348 = vadd.xlane.f32.xlu1 %v1347_v11  ;;  %v1350_v15 = vsel %vm1340_vm1, %v1335_v13, 0.0  ;;  %v1336_v16 = vld [vmem:[%s20591_s13 + $0x8] sm:$0x3]  ;;  %v1337_v17 = vld [vmem:[%s20591_s13 + $0xa] sm:$0x3]  ;;  %v1476_v0 = vld [vmem:[%s20592_s17] sm:$0xff]  ;;  %s20597_s10 = scalar_lea.vmem %s20595_s20, %s18451_s0 }
  0x81   : > { %v1353_v18 = vsel %vm1340_vm1, %v1336_v16, 0.0  ;;  %v1356_v19 = vsel %vm1340_vm1, %v1337_v17, 0.0  ;;  %v1338_v20 = vld [vmem:[%s20591_s13 + $0xc] sm:$0x3]  ;;  %v1339_v21 = vld [vmem:[%s20591_s13 + $0xe] sm:$0x3]  ;;  %s20600_s28 = scalar_lea.vmem %s20599_s26, %s18451_s0 }
  0x82   : > { %v1359_v22 = vsel %vm1340_vm1, %v1338_v20, 0.0  ;;  %v1362_v23 = vsel %vm1340_vm1, %v1339_v21, 0.0  ;;  %v2043_v2 = vld [vmem:[%s20593_s25] sm:$0xff]  ;;  %v1542_v3 = vand.u32 4294901760, %v1476_v0  ;;  %v1545_v4 = vand.u32 4294901760, %v1477_v1  ;;  %v2044_v5 = vld [vmem:[%s20593_s25 + $0x8] sm:$0xff]  ;;  %s20606_s17 = scalar_lea.vmem %s20605_s23, %s18451_s0 }
  0x83   : > { %v2062_v6 = vand.u32 4294901760, %v2043_v2  ;;  %v2065_v7 = vand.u32 4294901760, %v2044_v5  ;;  %s20607_s25 = sld [smem:[#allocation38_spill]] }
  0x84   : > { %1345 = vadd.xlane.f32.xlu0 %v1344_v14  ;;  %1351 = vadd.xlane.f32.xlu1 %v1350_v15  ;;  %v1637_v10 = vsub.f32 %v1477_v1, %v1545_v4  ;;  %v15199_v1 = vld [vmem:[%s20596_s4] ss:$0 sm:$0xff] }
  0x85   : > { %v2150_v11 = vsub.f32 %v2043_v2, %v2062_v6 }
  0x86   : > { %v1638_v15 = vand.u32 4294901760, %v1637_v10 }
  0x88   : > { %1354 = vadd.xlane.f32.xlu0 %v1353_v18  ;;  %1357 = vadd.xlane.f32.xlu1 %v1356_v19  ;;  %v1639_v19 = vsub.f32 %v1637_v10, %v1638_v15 }
  0x8c   : > { %1360 = vadd.xlane.f32.xlu0 %v1359_v22  ;;  %1363 = vadd.xlane.f32.xlu1 %v1362_v23  ;;  %v1640_v23 = vand.u32 4294901760, %v1639_v19 }
 0x10d   : > { %v1343_v24 = vpop.xlane.xlu0 %1342  ;;  %v1349_v25 = vpop.xlane.xlu1 %1348 }
 0x10e   : > { %v1366_v26 = vmul.f32 0.0625, %v1343_v24  ;;  %v1368_v27 = vmul.f32 0.0625, %v1349_v25 }
 0x110   : > { %v18555_v28 = vsub.f32 %v1332_v8, %v1366_v26  ;;  %v18557_v29 = vsub.f32 %v1334_v9, %v1368_v27  ;;  %v18599_v8 = vpack.c.bf16 %v1545_v4, %v1542_v3  ;;  %v1630_v9 = vsub.f32 %v1476_v0, %v1542_v3 }
 0x111   : > { %v1346_v30 = vpop.xlane.xlu0 %1345  ;;  %v1352_v31 = vpop.xlane.xlu1 %1351  ;;  %v18283_v4 = vmov 1983009808  }
 0x112   : > { %v1367_v32 = vmul.f32 0.0625, %v1346_v30  ;;  %v1369_v33 = vmul.f32 0.0625, %v1352_v31  ;;  %v1382_v34 = vmul.f32 %v18555_v28, %v18555_v28  ;;  %v1384_v35 = vmul.f32 %v18557_v29, %v18557_v29  ;;  %17134 = vmatprep.subr.bf16.mxu0 %v18599_v8 }
 0x113   : > { %v1631_v14 = vand.u32 4294901760, %v1630_v9  ;;  %17136 = vmatpush3.bf16.msra.mxu0 %v18599_v8  ;;  %v18607_v26 = vpack.c.bf16 %v1637_v10, %v1630_v9 }
 0x114   : > { %v18563_v36 = vsub.f32 %v1333_v12, %v1367_v32  ;;  %v18565_v37 = vsub.f32 %v1335_v13, %v1369_v33  ;;  %v1390_v38 = vsel %vm1340_vm1, %v1382_v34, 0.0  ;;  %v1396_v41 = vsel %vm1340_vm1, %v1384_v35, 0.0 }
 0x115   : > { %1391 = vadd.xlane.f32.xlu0 %v1390_v38  ;;  %v1355_v39 = vpop.xlane.xlu0 %1354  ;;  %v1358_v40 = vpop.xlane.xlu1 %1357  ;;  %v18601_v12 = vpack.c.bf16 %v2065_v7, %v2062_v6  ;;  %v2157_v13 = vsub.f32 %v2044_v5, %v2065_v7  ;;  %v1632_v18 = vsub.f32 %v1630_v9, %v1631_v14  ;;  %v18617_v32 = vpack.c.bf16 %v1638_v15, %v1631_v14 }
 0x116   : > { %v1370_v42 = vmul.f32 0.0625, %v1355_v39  ;;  %v1371_v43 = vmul.f32 0.0625, %v1358_v40  ;;  %v1383_v44 = vmul.f32 %v18563_v36, %v18563_v36  ;;  %v1385_v45 = vmul.f32 %v18565_v37, %v18565_v37 }
 0x117   : > { %17158 = vmatprep.subr.bf16.mxu1 %v18601_v12  ;;  %v1633_v22 = vand.u32 4294901760, %v1632_v18  ;;  %v18615_v31 = vpack.c.bf16 %v2157_v13, %v2150_v11  ;;  %v1495_v5 = vunpack.c.l.s4 %v18283_v4  ;;  %v1497_v6 = vlaneseq }
 0x118   : > { %v18573_v46 = vsub.f32 %v1336_v16, %v1370_v42  ;;  %v18575_v47 = vsub.f32 %v1337_v17, %v1371_v43  ;;  %v1393_v48 = vsel %vm1340_vm1, %v1383_v44, 0.0  ;;  %v1399_v51 = vsel %vm1340_vm1, %v1385_v45, 0.0  ;;  %17160 = vmatpush3.bf16.msra.mxu1 %v18601_v12 }
 0x119   : > { %1397 = vadd.xlane.f32.xlu0 %v1396_v41  ;;  %1394 = vadd.xlane.f32.xlu1 %v1393_v48  ;;  %v1361_v49 = vpop.xlane.xlu0 %1360  ;;  %v1364_v50 = vpop.xlane.xlu1 %1363  ;;  %v2151_v16 = vand.u32 4294901760, %v2150_v11  ;;  %v2158_v17 = vand.u32 4294901760, %v2157_v13  ;;  %v18609_v27 = vpack.c.bf16 %v1640_v23, %v1633_v22  ;;  %v1496_v15 = vunpack.c.0.s8 %v1495_v5 }
 0x11a   : > { %v1372_v52 = vmul.f32 0.0625, %v1361_v49  ;;  %v1373_v53 = vmul.f32 0.0625, %v1364_v50  ;;  %v1386_v54 = vmul.f32 %v18573_v46, %v18573_v46  ;;  %v1387_v55 = vmul.f32 %v18575_v47, %v18575_v47 }
 0x11b   : > { %17138 = vmatprep.subr.bf16.mxu0 %v18609_v27  ;;  %v18619_v33 = vpack.c.bf16 %v2158_v17, %v2151_v16 }
 0x11c   : > { %v18583_v56 = vsub.f32 %v1338_v20, %v1372_v52  ;;  %v18585_v57 = vsub.f32 %v1339_v21, %v1373_v53  ;;  %v1402_v58 = vsel %vm1340_vm1, %v1386_v54, 0.0  ;;  %v1405_v59 = vsel %vm1340_vm1, %v1387_v55, 0.0 }
 0x11d   : > { %1400 = vadd.xlane.f32.xlu1 %v1399_v51  ;;  %1403 = vadd.xlane.f32.xlu0 %v1402_v58  ;;  %v2152_v20 = vsub.f32 %v2150_v11, %v2151_v16  ;;  %v2159_v21 = vsub.f32 %v2157_v13, %v2158_v17  ;;  %v15200_v13 = vld [vmem:[%s20597_s10] ss:$0 sm:$0xff]  ;;  %v1498_v16 = vshrl.u32 %v1497_v6, 7  ;;  %v2610_v6 = vld [vmem:[%s20598_s11 + $0x18] sm:$0xff] }
 0x11e   : > { %v1388_v60 = vmul.f32 %v18583_v56, %v18583_v56  ;;  %v1389_v61 = vmul.f32 %v18585_v57, %v18585_v57 }
 0x11f   : > { %v2153_v24 = vand.u32 4294901760, %v2152_v20  ;;  %v2160_v25 = vand.u32 4294901760, %v2159_v21 }
 0x120   : > { %v1408_v62 = vsel %vm1340_vm1, %v1388_v60, 0.0  ;;  %v1411_v63 = vsel %vm1340_vm1, %v1389_v61, 0.0 }
 0x121   : > { %1406 = vadd.xlane.f32.xlu1 %v1405_v59  ;;  %1409 = vadd.xlane.f32.xlu0 %v1408_v62  ;;  %v18611_v30 = vpack.c.bf16 %v2160_v25, %v2153_v24  ;;  %v18632_v25 = vsub.s32 %v1496_v15, %v1498_v16 }
 0x123   : > { %17162 = vmatprep.subr.bf16.mxu1 %v18611_v30 }
 0x125   : > { %1412 = vadd.xlane.f32.xlu1 %v1411_v63 }
 0x1a2   : > { %v1392_v34 = vpop.xlane.xlu0 %1391 }
 0x1a3   : > { %v1414_v35 = vmul.f32 0.0625, %v1392_v34 }
 0x1a5   : > { %v1422_v38 = vadd.f32 1e-05, %v1414_v35 }
 0x1a6   : > { %v1395_v39 = vpop.xlane.xlu1 %1394  ;;  %v1398_v40 = vpop.xlane.xlu0 %1397 }
 0x1a7   : > { %18062 = vrsqrt.f32 %v1422_v38  ;;  %v1415_v41 = vmul.f32 0.0625, %v1395_v39  ;;  %v1416_v42 = vmul.f32 0.0625, %v1398_v40 }
 0x1a9   : > { %v1423_v43 = vadd.f32 1e-05, %v1415_v41  ;;  %v1424_v44 = vadd.f32 1e-05, %v1416_v42 }
 0x1aa   : > { %v1401_v45 = vpop.xlane.xlu1 %1400  ;;  %v1404_v48 = vpop.xlane.xlu0 %1403 }
 0x1ab   : > { %18064 = vrsqrt.f32 %v1423_v43  ;;  %v1417_v49 = vmul.f32 0.0625, %v1401_v45  ;;  %v1418_v50 = vmul.f32 0.0625, %v1404_v48 }
 0x1ac   : > { %18066 = vrsqrt.f32 %v1424_v44 }
 0x1ad   : > { %v1425_v51 = vadd.f32 1e-05, %v1417_v49  ;;  %v1426_v52 = vadd.f32 1e-05, %v1418_v50 }
 0x1ae   : > { %v1407_v53 = vpop.xlane.xlu1 %1406  ;;  %v1410_v54 = vpop.xlane.xlu0 %1409 }
 0x1af   : > { %18068 = vrsqrt.f32 %v1425_v51  ;;  %v1419_v55 = vmul.f32 0.0625, %v1407_v53  ;;  %v1420_v58 = vmul.f32 0.0625, %v1410_v54 }
 0x1b0   : > { %18070 = vrsqrt.f32 %v1426_v52 }
 0x1b1   : > { %v18063_v59 = vpop.eup %18062  ;;  %v1427_v60 = vadd.f32 1e-05, %v1419_v55  ;;  %v1428_v61 = vadd.f32 1e-05, %v1420_v58 }
 0x1b2   : > { %v1413_v62 = vpop.xlane.xlu1 %1412  ;;  %v1438_v63 = vmul.f32 %v18063_v59, %v18555_v28 }
 0x1b3   : > { %18072 = vrsqrt.f32 %v1427_v60  ;;  %v1421_v0 = vmul.f32 0.0625, %v1413_v62 }
 0x1b4   : > { %18074 = vrsqrt.f32 %v1428_v61  ;;  %v1453_v10 = vmul.f32 %v15199_v1, %v1438_v63 }
 0x1b5   : > { %v18065_v2 = vpop.eup %18064  ;;  %v1429_v3 = vadd.f32 1e-05, %v1421_v0 }
 0x1b6   : > { %v18067_v7 = vpop.eup %18066  ;;  %v1439_v9 = vmul.f32 %v18065_v2, %v18563_v36  ;;  %v1468_v21 = vadd.f32 %v15200_v13, %v1453_v10 }
 0x1b7   : > { %v1440_v11 = vmul.f32 %v18067_v7, %v18557_v29  ;;  %18076 = vrsqrt.f32 %v1429_v3 }
 0x1b8   : > { %v1454_v28 = vmul.f32 %v15199_v1, %v1439_v9 }
 0x1b9   : > { %v18069_v14 = vpop.eup %18068  ;;  %v1455_v19 = vmul.f32 %v15199_v1, %v1440_v11 }
 0x1ba   : > { %v18071_v17 = vpop.eup %18070  ;;  %v1469_v18 = vadd.f32 %v15200_v13, %v1454_v28  ;;  %v1441_v20 = vmul.f32 %v18069_v14, %v18565_v37 }
 0x1bb   : > { %v1442_v23 = vmul.f32 %v18071_v17, %v18573_v46  ;;  %v1470_v34 = vadd.f32 %v15200_v13, %v1455_v19 }
 0x1bc   : > { %v1456_v22 = vmul.f32 %v15199_v1, %v1441_v20  ;;  %v1492_v24 = vcombine.low %v1468_v21, %v1469_v18 }
 0x1bd   : > { %v18073_v36 = vpop.eup %18072  ;;  %v1457_v40 = vmul.f32 %v15199_v1, %v1442_v23 }
 0x1be   : > { %v18075_v29 = vpop.eup %18074  ;;  %v1471_v35 = vadd.f32 %v15200_v13, %v1456_v22  ;;  %v1443_v38 = vmul.f32 %v18073_v36, %v18575_v47  ;;  %v1500_v37 = vrot.slane %v1492_v24, %v18632_v25 }
 0x1bf   : > { %v1444_v39 = vmul.f32 %v18075_v29, %v18583_v56  ;;  %v1472_v49 = vadd.f32 %v15200_v13, %v1457_v40  ;;  %v15201_v40 = vld [vmem:[%s20600_s28] ss:$0 sm:$0xff] }
 0x1c0   : > { %v1458_v41 = vmul.f32 %v15199_v1, %v1443_v38  ;;  %v1493_v42 = vcombine.low %v1470_v34, %v1471_v35 }
 0x1c1   : > { %v18077_v43 = vpop.eup %18076  ;;  %v1459_v45 = vmul.f32 %v15199_v1, %v1444_v39 }
 0x1c2   : > { %v1473_v44 = vadd.f32 %v15200_v13, %v1458_v41  ;;  %v1445_v46 = vmul.f32 %v18077_v43, %v18585_v57  ;;  %v1507_v48 = vrot.slane %v1493_v42, %v18632_v25  ;;  %v1526_v41 = vcombine.low %v15201_v40, %v15201_v40 }
 0x1c3   : > { %v1474_v47 = vadd.f32 %v15200_v13, %v1459_v45 }
 0x1c4   : > { %v1460_v50 = vmul.f32 %v15199_v1, %v1445_v46  ;;  %v1508_v51 = vcombine.low %v1500_v37, %v1507_v48  ;;  %v1509_v52 = vcombine.low %v1472_v49, %v1473_v44  ;;  %v1533_v42 = vrot.slane %v1526_v41, %v18632_v25 }
 0x1c6   : > { %v1475_v53 = vadd.f32 %v15200_v13, %v1460_v50  ;;  %v1537_v56 = vsel %vm1536_vm2, %v1508_v51, 0  ;;  %v1517_v59 = vrot.slane %v1509_v52, %v18632_v25  ;;  %v1534_v43 = vcombine.low %v1533_v42, %v1533_v42 }
 0x1c7   : > { %v1608_v54 = vand.u32 4294901760, %v1537_v56 }
 0x1c8   : > { %v1510_v55 = vcombine.low %v1474_v47, %v1475_v53 }
 0x1c9   : > { %v1609_v58 = vsub.f32 %v1537_v56, %v1608_v54 }
 0x1ca   : > { %v1524_v60 = vrot.slane %v1510_v55, %v18632_v25 }
 0x1cb   : > { %v1610_v61 = vand.u32 4294901760, %v1609_v58 }
 0x1cc   : > { %v1525_v57 = vcombine.low %v1517_v59, %v1524_v60 }
 0x1cd   : > { %v1611_v62 = vsub.f32 %v1609_v58, %v1610_v61 }
 0x1ce   : > { %v1539_v63 = vsel %vm1536_vm2, %v1525_v57, 0  ;;  %v3262_v57 = vld [vmem:[%s20603_s2] sm:$0xff] }
 0x1cf   : > { %v1612_v0 = vand.u32 4294901760, %v1611_v62  ;;  %v1618_v1 = vand.u32 4294901760, %v1539_v63  ;;  %v3263_v62 = vld [vmem:[%s20603_s2 + $0x8] sm:$0xff] }
 0x1d1   : > { %15943 = vmatprep.mubr.f32.mxu0 %v1612_v0  ;;  %15985 = vmatprep.mubr.f32.mxu1 %v1612_v0  ;;  %v1619_v2 = vsub.f32 %v1539_v63, %v1618_v1  ;;  %v3900_v63 = vld [vmem:[%s20604_s15] sm:$0xff]  ;;  %v3329_v0 = vand.u32 4294901760, %v3262_v57 }
 0x1d3   : > { %v1620_v3 = vand.u32 4294901760, %v1619_v2 }
 0x1d5   : > { %v1621_v4 = vsub.f32 %v1619_v2, %v1620_v3 }
 0x1d7   : > { %v1622_v5 = vand.u32 4294901760, %v1621_v4 }
 0x1d9   : > { %15944 = vmatmul.mubr.f32.vlgmr.msra.gmra.mrb[0].mxu0 %v1622_v5  ;;  %15986 = vmatmul.mubr.f32.vlgmr.msra.gmra.mrb[0].mxu1 %v1622_v5 }
 0x1da   : > { %17140 = vmatpush3.bf16.msra.mxu0 %v18609_v27  ;;  %15950 = vmatprep.mubr.f32.mxu0 %v1608_v54  ;;  %v2608_v27 = vld [vmem:[%s20598_s11 + $0x8] sm:$0xff] }
 0x1db   : > { %15992 = vmatprep.mubr.f32.mxu1 %v1608_v54  ;;  %17164 = vmatpush3.bf16.msra.mxu1 %v18611_v30 }
 0x1dc   : > { %17142 = vmatprep.subr.bf16.mxu0 %v18607_v26  ;;  %17166 = vmatprep.subr.bf16.mxu1 %v18615_v31 }
 0x1e1   : > { %15951 = vmatmul.mubr.f32.vlgmr.msra.gmra.mrb[0].mxu0 %v1618_v1  ;;  %15993 = vmatmul.mubr.f32.vlgmr.msra.gmra.mrb[0].mxu1 %v1618_v1 }
 0x1e2   : > { %17144 = vmatpush3.bf16.msra.mxu0 %v18607_v26  ;;  %15957 = vmatprep.mubr.f32.mxu0 %v1609_v58  ;;  %v2607_v26 = vld [vmem:[%s20598_s11] sm:$0xff] }
 0x1e3   : > { %15999 = vmatprep.mubr.f32.mxu1 %v1609_v58  ;;  %17168 = vmatpush3.bf16.msra.mxu1 %v18615_v31  ;;  %v2635_v30 = vand.u32 4294901760, %v2607_v26  ;;  %v2638_v31 = vand.u32 4294901760, %v2608_v27 }
 0x1e4   : > { %17146 = vmatprep.subr.bf16.mxu0 %v18599_v8  ;;  %17170 = vmatprep.subr.bf16.mxu1 %v18601_v12 }
 0x1e5   : > { %v2725_v9 = vsub.f32 %v2607_v26, %v2635_v30  ;;  %v2732_v10 = vsub.f32 %v2608_v27, %v2638_v31  ;;  %v3419_v26 = vsub.f32 %v3262_v57, %v3329_v0 }
 0x1e7   : > { %v2726_v11 = vand.u32 4294901760, %v2725_v9  ;;  %v2733_v13 = vand.u32 4294901760, %v2732_v10  ;;  %v17197_v38 = vpack.c.bf16 %v2732_v10, %v2725_v9 }
 0x1e9   : > { %15958 = vmatmul.mubr.f32.vlgmr.msra.gmra.mrb[0].mxu0 %v1619_v2  ;;  %16000 = vmatmul.mubr.f32.vlgmr.msra.gmra.mrb[0].mxu1 %v1619_v2  ;;  %v17213_v28 = vpack.c.bf16 %v2733_v13, %v2726_v11  ;;  %v2727_v14 = vsub.f32 %v2725_v9, %v2726_v11  ;;  %v2734_v15 = vsub.f32 %v2732_v10, %v2733_v13  ;;  %v3901_v2 = vld [vmem:[%s20604_s15 + $0x8] sm:$0xff]  ;;  %v3903_v9 = vld [vmem:[%s20604_s15 + $0x18] sm:$0xff]  ;;  %v3420_v11 = vand.u32 4294901760, %v3419_v26 }
 0x1ea   : > { %17148 = vmatpush3.bf16.msra.mxu0 %v18599_v8  ;;  %15964 = vmatprep.mubr.f32.mxu0 %v1610_v61  ;;  %v3924_v4 = vand.u32 4294901760, %v3901_v2  ;;  %v3930_v13 = vand.u32 4294901760, %v3903_v9 }
 0x1eb   : > { %16006 = vmatprep.mubr.f32.mxu1 %v1610_v61  ;;  %17172 = vmatpush3.bf16.msra.mxu1 %v18601_v12  ;;  %v2728_v18 = vand.u32 4294901760, %v2727_v14  ;;  %v2735_v19 = vand.u32 4294901760, %v2734_v15 }
 0x1ec   : > { %17150 = vmatprep.subr.bf16.mxu0 %v18617_v32  ;;  %17174 = vmatprep.subr.bf16.mxu1 %v18619_v33  ;;  %v4032_v40 = vsub.f32 %v3903_v9, %v3930_v13 }
 0x1ed   : > { %v17189_v22 = vpack.c.bf16 %v2735_v19, %v2728_v18 }
 0x1f1   : > { %15965 = vmatmul.mubr.f32.vlgmr.msra.gmra.mrb[0].mxu0 %v1620_v3  ;;  %16007 = vmatmul.mubr.f32.vlgmr.msra.gmra.mrb[0].mxu1 %v1620_v3  ;;  %v3921_v3 = vand.u32 4294901760, %v3900_v63 }
 0x1f2   : > { %17152 = vmatpush3.bf16.msra.mxu0 %v18617_v32  ;;  %15971 = vmatprep.mubr.f32.mxu0 %v1608_v54  ;;  %v18663_v32 = vpack.c.bf16 %v2638_v31, %v2635_v30 }
 0x1f3   : > { %16013 = vmatprep.mubr.f32.mxu1 %v1608_v54  ;;  %17176 = vmatpush3.bf16.msra.mxu1 %v18619_v33  ;;  %v2609_v33 = vld [vmem:[%s20598_s11 + $0x10] sm:$0xff]  ;;  %v4011_v30 = vsub.f32 %v3900_v63, %v3921_v3  ;;  %v18733_v31 = vpack.c.bf16 %v3924_v4, %v3921_v3 }
 0x1f4   : > { %17154 = vmatprep.subr.bf16.mxu0 %v18599_v8  ;;  %17178 = vmatprep.subr.bf16.mxu1 %v18601_v12  ;;  %v2641_v7 = vand.u32 4294901760, %v2609_v33 }
 0x1f5   : > { %v4012_v14 = vand.u32 4294901760, %v4011_v30 }
 0x1f6   : > { %v2739_v16 = vsub.f32 %v2609_v33, %v2641_v7  ;;  %v3265_v33 = vld [vmem:[%s20603_s2 + $0x18] sm:$0xff] }
 0x1f8   : > { %v2740_v20 = vand.u32 4294901760, %v2739_v16 }
 0x1f9   : > { %15972 = vmatmul.mubr.f32.vlgmr.msra.gmra.mrb[0].mxu0 %v1618_v1  ;;  %16014 = vmatmul.mubr.f32.vlgmr.msra.gmra.mrb[0].mxu1 %v1618_v1 }
 0x1fa   : > { %17156 = vmatpush3.bf16.msra.mxu0 %v18599_v8  ;;  %15978 = vmatprep.mubr.f32.mxu0 %v1608_v54  ;;  %v2644_v8 = vand.u32 4294901760, %v2610_v6  ;;  %v2741_v23 = vsub.f32 %v2739_v16, %v2740_v20 }
 0x1fb   : > { %16020 = vmatprep.mubr.f32.mxu1 %v1608_v54  ;;  %17180 = vmatpush3.bf16.msra.mxu1 %v18601_v12 }
 0x1fc   : > { %17206 = vmatprep.subr.bf16.mxu0 %v18663_v32  ;;  %17182 = vmatprep.subr.bf16.mxu1 %v18663_v32  ;;  %v18671_v12 = vpack.c.bf16 %v2644_v8, %v2641_v7  ;;  %v2746_v17 = vsub.f32 %v2610_v6, %v2644_v8  ;;  %v2742_v29 = vand.u32 4294901760, %v2741_v23  ;;  %v3902_v6 = vld [vmem:[%s20604_s15 + $0x10] sm:$0xff]  ;;  %v4018_v7 = vsub.f32 %v3901_v2, %v3924_v4 }
 0x1fd   : > { %v3927_v10 = vand.u32 4294901760, %v3902_v6 }
 0x1fe   : > { %v2747_v21 = vand.u32 4294901760, %v2746_v17  ;;  %v17201_v39 = vpack.c.bf16 %v2746_v17, %v2739_v16  ;;  %v4019_v15 = vand.u32 4294901760, %v4018_v7 }
 0x200   : > { %v17217_v36 = vpack.c.bf16 %v2747_v21, %v2740_v20  ;;  %v2748_v24 = vsub.f32 %v2746_v17, %v2747_v21  ;;  %v3421_v17 = vsub.f32 %v3419_v26, %v3420_v11  ;;  %v18745_v20 = vpack.c.bf16 %v3930_v13, %v3927_v10 }
 0x201   : > { %15979 = vmatmul.mubr.f32.vlgmr.msra.gmra.mrb[0].mxu0 %v1618_v1  ;;  %16021 = vmatmul.mubr.f32.vlgmr.msra.gmra.mrb[0].mxu1 %v1618_v1  ;;  %v3332_v1 = vand.u32 4294901760, %v3263_v62  ;;  %v4020_v23 = vsub.f32 %v4018_v7, %v4019_v15 }
 0x202   : > { %17208 = vmatpush3.bf16.msra.mxu0 %v18663_v32  ;;  %17184 = vmatpush3.bf16.msra.mxu1 %v18663_v32  ;;  %v2749_v34 = vand.u32 4294901760, %v2748_v24 }
 0x203   : > { %17210 = vmatprep.subr.bf16.mxu0 %v18671_v12  ;;  %17186 = vmatprep.subr.bf16.mxu1 %v18671_v12  ;;  %v18731_v5 = vpack.c.bf16 %v3332_v1, %v3329_v0  ;;  %v3426_v27 = vsub.f32 %v3263_v62, %v3332_v1  ;;  %v18763_v1 = vpack.c.bf16 %v4018_v7, %v4011_v30 }
 0x204   : > { %v17193_v35 = vpack.c.bf16 %v2749_v34, %v2742_v29  ;;  %v4025_v34 = vsub.f32 %v3902_v6, %v3927_v10 }
 0x205   : > { %v18761_v0 = vpack.c.bf16 %v3426_v27, %v3419_v26 }
 0x206   : > { %17212 = vmatpush3.bf16.msra.mxu0 %v18671_v12  ;;  %17188 = vmatpush3.bf16.msra.mxu1 %v18671_v12  ;;  %v18767_v3 = vpack.c.bf16 %v4032_v40, %v4025_v34 }
 0x207   : > { %17214 = vmatprep.subr.bf16.mxu0 %v17213_v28  ;;  %17190 = vmatprep.subr.bf16.mxu1 %v17189_v22 }
 0x2d4   : > { %v15980_v37 = vpop.f32.mrb[0].mxu0  ;;  %v18681_v44 = vpop.f32.mrb[0].mxu1 }
 0x2d5   : > { %20601 = vst [vmem:[#allocation39_spill] sm:$0xff] %v18681_v44  ;;  %v17709_v45 = vadd.f32 %v15980_v37, %v1534_v43  ;;  %v2033_v46 = vpop.f32.mrb[1].mxu0  ;;  %v18683_v48 = vpop.f32.mrb[1].mxu1 }
 0x2d6   : > { %20602 = vst [vmem:[#allocation40_spill] sm:$0xff] %v18683_v48  ;;  %v17710_v49 = vadd.f32 %v2033_v46, %v1534_v43  ;;  %v4026_v43 = vand.u32 4294901760, %v4025_v34  ;;  %v4033_v46 = vand.u32 4294901760, %v4032_v40 }
 0x2d7   : > { %v2632_v50 = vsel %vm2627_vm3, %v17709_v45, 0 }
 0x2d8   : > { %v18686_v51 = vand.u32 4294901760, %v2632_v50  ;;  %v2629_v52 = vsel %vm2627_vm3, %v17710_v49, 0  ;;  %v18775_v6 = vpack.c.bf16 %v4033_v46, %v4026_v43 }
 0x2d9   : > { %v18689_v47 = vand.u32 4294901760, %v2629_v52 }
 0x2da   : > { %v18692_v53 = vsub.f32 %v2632_v50, %v18686_v51 }
 0x2db   : > { %v18695_v56 = vsub.f32 %v2629_v52, %v18689_v47  ;;  %v4027_v52 = vsub.f32 %v4025_v34, %v4026_v43 }
 0x2dc   : > { %v18698_v54 = vand.u32 4294901760, %v18692_v53 }
 0x2dd   : > { %v18701_v55 = vand.u32 4294901760, %v18695_v56  ;;  %v4028_v57 = vand.u32 4294901760, %v4027_v52 }
 0x2de   : > { %v2716_v58 = vsub.f32 %v18692_v53, %v18698_v54 }
 0x2df   : > { %16064 = vmatprep.mubr.f32.mxu0 %v18701_v55  ;;  %v2706_v59 = vsub.f32 %v18695_v56, %v18701_v55 }
 0x2e0   : > { %16065 = vmatmul.mubr.f32.vlgmr.msra.gmra.mrb[2].mxu0 %v18698_v54  ;;  %v18712_v61 = vand.u32 4294901760, %v2716_v58  ;;  %v4034_v58 = vsub.f32 %v4032_v40, %v4033_v46 }
 0x2e1   : > { %17216 = vmatpush3.bf16.msra.mxu0 %v17213_v28  ;;  %16075 = vmatprep.mubr.f32.mxu0 %v18689_v47  ;;  %v18710_v60 = vand.u32 4294901760, %v2706_v59  ;;  %v3427_v28 = vand.u32 4294901760, %v3426_v27 }
 0x2e2   : > { %17218 = vmatprep.subr.bf16.mxu0 %v17217_v36  ;;  %v4035_v62 = vand.u32 4294901760, %v4034_v58 }
 0x2e3   : > { %16031 = vmatprep.mubr.f32.mxu1 %v18710_v60  ;;  %v3428_v21 = vsub.f32 %v3426_v27, %v3427_v28  ;;  %v18769_v4 = vpack.c.bf16 %v3427_v28, %v3420_v11 }
 0x2e4   : > { %16032 = vmatmul.mubr.f32.vlgmr.msra.gmra.mrb[2].mxu1 %v18712_v61  ;;  %v18759_v63 = vpack.c.bf16 %v4035_v62, %v4028_v57 }
 0x2e5   : > { %17192 = vmatpush3.bf16.msra.mxu1 %v17189_v22  ;;  %16042 = vmatprep.mubr.f32.mxu1 %v18689_v47  ;;  %v4013_v22 = vsub.f32 %v4011_v30, %v4012_v14 }
 0x2e6   : > { %17220 = vmatpush3.bf16.msra.mxu0 %v17217_v36  ;;  %17194 = vmatprep.subr.bf16.mxu1 %v17193_v35  ;;  %v3422_v36 = vand.u32 4294901760, %v3421_v17 }
 0x2e7   : > { %17222 = vmatprep.subr.bf16.mxu0 %v18663_v32 }
 0x2e9   : > { %17196 = vmatpush3.bf16.msra.mxu1 %v17193_v35  ;;  %16076 = vmatmul.mubr.f32.vlgmr.msra.gmra.mrb[2].mxu0 %v18686_v51  ;;  %v3429_v35 = vand.u32 4294901760, %v3428_v21 }
 0x2ea   : > { %17224 = vmatpush3.bf16.msra.mxu0 %v18663_v32  ;;  %16086 = vmatprep.mubr.f32.mxu0 %v18689_v47  ;;  %v3264_v32 = vld [vmem:[%s20603_s2 + $0x10] sm:$0xff] }
 0x2eb   : > { %17198 = vmatprep.subr.bf16.mxu1 %v17197_v38  ;;  %17226 = vmatprep.subr.bf16.mxu0 %v18671_v12  ;;  %v3335_v8 = vand.u32 4294901760, %v3264_v32  ;;  %v18751_v37 = vpack.c.bf16 %v3429_v35, %v3422_v36 }
 0x2ec   : > { %16043 = vmatmul.mubr.f32.vlgmr.msra.gmra.mrb[2].mxu1 %v18686_v51 }
 0x2ed   : > { %17200 = vmatpush3.bf16.msra.mxu1 %v17197_v38  ;;  %16053 = vmatprep.mubr.f32.mxu1 %v18695_v56  ;;  %v3433_v18 = vsub.f32 %v3264_v32, %v3335_v8  ;;  %v4014_v38 = vand.u32 4294901760, %v4013_v22  ;;  %v18771_v32 = vpack.c.bf16 %v4019_v15, %v4012_v14 }
 0x2ee   : > { %17228 = vmatpush3.bf16.msra.mxu0 %v18671_v12  ;;  %17202 = vmatprep.subr.bf16.mxu1 %v17201_v39  ;;  %v3338_v12 = vand.u32 4294901760, %v3265_v33 }
 0x2ef   : > { %17278 = vmatprep.subr.bf16.mxu0 %v18733_v31  ;;  %v3434_v24 = vand.u32 4294901760, %v3433_v18 }
 0x2f0   : > { %v18743_v16 = vpack.c.bf16 %v3338_v12, %v3335_v8  ;;  %v3440_v19 = vsub.f32 %v3265_v33, %v3338_v12  ;;  %v15203_v8 = vld [vmem:[%s20606_s17] ss:$0 sm:$0xff] }
 0x2f1   : > { %17204 = vmatpush3.bf16.msra.mxu1 %v17201_v39  ;;  %16087 = vmatmul.mubr.f32.vlgmr.msra.gmra.mrb[2].mxu0 %v18686_v51  ;;  %v4021_v39 = vand.u32 4294901760, %v4020_v23  ;;  %v3435_v41 = vsub.f32 %v3433_v18, %v3434_v24  ;;  %v2617_v12 = vcombine.low %v15203_v8, %v15203_v8 }
 0x2f2   : > { %17230 = vmatprep.subr.bf16.mxu1 %v18731_v5  ;;  %17280 = vmatpush3.bf16.msra.mxu0 %v18733_v31  ;;  %v3441_v29 = vand.u32 4294901760, %v3440_v19  ;;  %v18765_v2 = vpack.c.bf16 %v3440_v19, %v3433_v18 }
 0x2f3   : > { %17282 = vmatprep.subr.bf16.mxu0 %v18745_v20  ;;  %v18753_v45 = vpack.c.bf16 %v4021_v39, %v4014_v38  ;;  %v3436_v49 = vand.u32 4294901760, %v3435_v41  ;;  %v2624_v26 = vrot.slane %v2617_v12, %v18632_v25 }
 0x2f4   : > { %16054 = vmatmul.mubr.f32.vlgmr.msra.gmra.mrb[2].mxu1 %v18692_v53  ;;  %v3442_v42 = vsub.f32 %v3440_v19, %v3441_v29  ;;  %v18773_v33 = vpack.c.bf16 %v3441_v29, %v3434_v24 }
 0x2f5   : > { %17232 = vmatpush3.bf16.msra.mxu1 %v18731_v5  ;;  %v2625_v30 = vcombine.low %v2624_v26, %v2624_v26 }
 0x2f6   : > { %17234 = vmatprep.subr.bf16.mxu1 %v18743_v16  ;;  %17284 = vmatpush3.bf16.msra.mxu0 %v18745_v20  ;;  %v3443_v50 = vand.u32 4294901760, %v3442_v42 }
 0x2f7   : > { %17286 = vmatprep.subr.bf16.mxu0 %v18753_v45 }
 0x2f8   : > { %v18757_v59 = vpack.c.bf16 %v3443_v50, %v3436_v49 }
 0x2f9   : > { %17236 = vmatpush3.bf16.msra.mxu1 %v18743_v16 }
 0x2fa   : > { %17238 = vmatprep.subr.bf16.mxu1 %v18751_v37 }
 0x3c4   : > { %v16088_v27 = vpop.f32.mrb[2].mxu0 }
 0x3c5   : > { %v3152_v7 = vpop.f32.mrb[3].mxu0 }
 0x3c7   : > { %v16055_v9 = vpop.f32.mrb[2].mxu1 }
 0x3c8   : > { %v17713_v10 = vadd.f32 %v16055_v9, %v2625_v30  ;;  %v2896_v13 = vpop.f32.mrb[3].mxu1 }
 0x3c9   : > { %v17715_v17 = vadd.f32 %v2896_v13, %v2625_v30 }
 0x3ca   : > { %v17714_v11 = vadd.f32 %v17713_v10, %v16088_v27 }
 0x3cb   : > { %v17716_v28 = vadd.f32 %v17715_v17, %v3152_v7 }
 0x3cc   : > { %v3181_v14 = vcombine.high %v17714_v11, %v17714_v11  ;;  %v3188_v15 = vrot.slane %v17714_v11, %v18632_v25 }
 0x3cd   : > { %v3164_v18 = vcombine.high %v17716_v28, %v17716_v28  ;;  %v3171_v19 = vrot.slane %v17716_v28, %v18632_v25 }
 0x3ce   : > { %v3195_v21 = vrot.slane %v3181_v14, %v18632_v25  ;;  %v3196_v22 = vcombine.high %v3188_v15, %v3188_v15  ;;  %v15208_v23 = vmul.f32 -1.442695, %v3188_v15 }
 0x3cf   : > { %v3178_v36 = vrot.slane %v3164_v18, %v18632_v25  ;;  %v3179_v24 = vcombine.high %v3171_v19, %v3171_v19  ;;  %v15204_v29 = vmul.f32 -1.442695, %v3171_v19 }
 0x3d0   : > { %v3197_v34 = vcombine.high %v3195_v21, %v3195_v21  ;;  %18078 = vpow2.f32 %v15208_v23  ;;  %v15209_v35 = vmul.f32 -1.442695, %v3196_v22  ;;  %v15210_v38 = vmul.f32 -1.442695, %v3195_v21 }
 0x3d1   : > { %v3180_v39 = vcombine.high %v3178_v36, %v3178_v36  ;;  %18080 = vpow2.f32 %v15204_v29  ;;  %v15205_v40 = vmul.f32 -1.442695, %v3179_v24  ;;  %v15206_v42 = vmul.f32 -1.442695, %v3178_v36 }
 0x3d2   : > { %18082 = vpow2.f32 %v15209_v35  ;;  %v15211_v41 = vmul.f32 -1.442695, %v3197_v34 }
 0x3d3   : > { %18084 = vpow2.f32 %v15210_v38  ;;  %v15207_v43 = vmul.f32 -1.442695, %v3180_v39 }
 0x3d4   : > { %18086 = vpow2.f32 %v15211_v41 }
 0x3d5   : > { %18088 = vpow2.f32 %v15205_v40 }
 0x3d6   : > { %18090 = vpow2.f32 %v15206_v42 }
 0x3d7   : > { %18092 = vpow2.f32 %v15207_v43 }
 0x3da   : > { %v18079_v46 = vpop.eup %18078 }
 0x3db   : > { %v18081_v49 = vpop.eup %18080  ;;  %v3234_v50 = vadd.f32 1.0, %v18079_v46 }
 0x3dc   : > { %v18083_v52 = vpop.eup %18082  ;;  %v3230_v58 = vadd.f32 1.0, %v18081_v49 }
 0x3dd   : > { %v18085_v57 = vpop.eup %18084  ;;  %v3235_v62 = vadd.f32 1.0, %v18083_v52  ;;  %18094 = vrcp.f32 %v3234_v50 }
 0x3de   : > { %v18087_v8 = vpop.eup %18086  ;;  %v3236_v12 = vadd.f32 1.0, %v18085_v57  ;;  %18096 = vrcp.f32 %v3230_v58 }
 0x3df   : > { %v18089_v26 = vpop.eup %18088  ;;  %v3237_v27 = vadd.f32 1.0, %v18087_v8  ;;  %18098 = vrcp.f32 %v3235_v62 }
 0x3e0   : > { %v18091_v30 = vpop.eup %18090  ;;  %18100 = vrcp.f32 %v3236_v12  ;;  %v3231_v7 = vadd.f32 1.0, %v18089_v26 }
 0x3e1   : > { %v18093_v9 = vpop.eup %18092  ;;  %18102 = vrcp.f32 %v3237_v27  ;;  %v3232_v10 = vadd.f32 1.0, %v18091_v30 }
 0x3e2   : > { %v3233_v13 = vadd.f32 1.0, %v18093_v9  ;;  %18104 = vrcp.f32 %v3231_v7 }
 0x3e3   : > { %18106 = vrcp.f32 %v3232_v10 }
 0x3e4   : > { %18108 = vrcp.f32 %v3233_v13 }
 0x3e7   : > { %v18095_v17 = vpop.eup %18094 }
 0x3e8   : > { %v18097_v11 = vpop.eup %18096  ;;  %v3258_v18 = vmul.f32 %v18095_v17, %v3188_v15 }
 0x3e9   : > { %v18099_v28 = vpop.eup %18098  ;;  %v3254_v43 = vmul.f32 %v18097_v11, %v3171_v19  ;;  %v4494_v11 = vld [vmem:[%s20607_s25 + $0x10] sm:$0xff] }
 0x3ea   : > { %v18101_v14 = vpop.eup %18100  ;;  %v3259_v23 = vmul.f32 %v18099_v28, %v3196_v22  ;;  %v4495_v28 = vld [vmem:[%s20607_s25 + $0x18] sm:$0xff] }
 0x3eb   : > { %v18103_v29 = vpop.eup %18102  ;;  %v3260_v38 = vmul.f32 %v18101_v14, %v3195_v21  ;;  %v5086_v14 = vld [vmem:[%s18490_s16 + $0x10] sm:$0xff] }
 0x3ec   : > { %v18105_v35 = vpop.eup %18104  ;;  %v3261_v40 = vmul.f32 %v18103_v29, %v3197_v34  ;;  %v3297_v41 = vcombine.low %v3258_v18, %v3259_v23  ;;  %v5087_v18 = vld [vmem:[%s18490_s16 + $0x18] sm:$0xff] }
 0x3ed   : > { %v18107_v42 = vpop.eup %18106  ;;  %v3255_v46 = vmul.f32 %v18105_v35, %v3179_v24 }
 0x3ee   : > { %v18109_v49 = vpop.eup %18108  ;;  %v3298_v50 = vcombine.low %v3260_v38, %v3261_v40  ;;  %v3256_v52 = vmul.f32 %v18107_v42, %v3178_v36  ;;  %v3305_v62 = vrot.slane %v3297_v41, %v18632_v25  ;;  %v4519_v40 = vand.u32 4294901760, %v4494_v11 }
 0x3ef   : > { %v3257_v58 = vmul.f32 %v18109_v49, %v3180_v39  ;;  %v3280_v57 = vcombine.low %v3254_v43, %v3255_v46  ;;  %v5111_v41 = vand.u32 4294901760, %v5086_v14 }
 0x3f0   : > { %v3312_v8 = vrot.slane %v3298_v50, %v18632_v25  ;;  %v18885_v50 = vsub.f32 %v4494_v11, %v4519_v40 }
 0x3f1   : > { %v3281_v12 = vcombine.low %v3256_v52, %v3257_v58  ;;  %v3288_v22 = vrot.slane %v3280_v57, %v18632_v25  ;;  %v18889_v58 = vsub.f32 %v5086_v14, %v5111_v41 }
 0x3f2   : > { %v3313_v15 = vcombine.low %v3305_v62, %v3312_v8 }
 0x3f3   : > { %v3295_v21 = vrot.slane %v3281_v12, %v18632_v25  ;;  %v4618_v12 = vand.u32 4294901760, %v18885_v50 }
 0x3f4   : > { %v3326_v34 = vsel %vm2627_vm3, %v3313_v15, 0 }
 0x3f5   : > { %v18790_v26 = vand.u32 4294901760, %v3326_v34  ;;  %v3296_v19 = vcombine.low %v3288_v22, %v3295_v21  ;;  %v5210_v22 = vand.u32 4294901760, %v18889_v58 }
 0x3f7   : > { %v18793_v24 = vsub.f32 %v3326_v34, %v18790_v26  ;;  %v3324_v36 = vsel %vm2627_vm3, %v3296_v19, 0 }
 0x3f8   : > { %v18796_v39 = vand.u32 4294901760, %v3324_v36 }
 0x3f9   : > { %v18799_v27 = vand.u32 4294901760, %v18793_v24 }
 0x3fa   : > { %v18802_v30 = vsub.f32 %v3324_v36, %v18796_v39 }
 0x3fb   : > { %v3410_v9 = vsub.f32 %v18793_v24, %v18799_v27 }
 0x3fc   : > { %v18805_v7 = vand.u32 4294901760, %v18802_v30 }
 0x3fd   : > { %v18813_v17 = vand.u32 4294901760, %v3410_v9 }
 0x3fe   : > { %v3400_v10 = vsub.f32 %v18802_v30, %v18805_v7 }
 0x400   : > { %v18811_v13 = vand.u32 4294901760, %v3400_v10 }
 0x402   : > { %16097 = vmatprep.mubr.f32.mxu1 %v18811_v13  ;;  %16163 = vmatprep.mubr.f32.mxu0 %v18811_v13 }
 0x403   : > { %16098 = vmatmul.mubr.f32.vlgmr.msra.gmra.mrb[4].mxu1 %v18813_v17  ;;  %16164 = vmatmul.mubr.f32.vlgmr.msra.gmra.mrb[4].mxu0 %v18813_v17 }
 0x404   : > { %17240 = vmatpush3.bf16.msra.mxu1 %v18751_v37  ;;  %17288 = vmatpush3.bf16.msra.mxu0 %v18753_v45  ;;  %v4492_v37 = vld [vmem:[%s20607_s25] sm:$0xff]  ;;  %v4493_v45 = vld [vmem:[%s20607_s25 + $0x8] sm:$0xff] }
 0x405   : > { %16108 = vmatprep.mubr.f32.mxu1 %v18796_v39  ;;  %16174 = vmatprep.mubr.f32.mxu0 %v18796_v39 }
 0x406   : > { %17242 = vmatprep.subr.bf16.mxu1 %v18757_v59  ;;  %17290 = vmatprep.subr.bf16.mxu0 %v18759_v63 }
 0x408   : > { %17244 = vmatpush3.bf16.msra.mxu1 %v18757_v59  ;;  %17292 = vmatpush3.bf16.msra.mxu0 %v18759_v63  ;;  %v5084_v59 = vld [vmem:[%s18490_s16] sm:$0xff]  ;;  %v5085_v63 = vld [vmem:[%s18490_s16 + $0x8] sm:$0xff] }
 0x409   : > { %17246 = vmatprep.subr.bf16.mxu1 %v18761_v0  ;;  %17294 = vmatprep.subr.bf16.mxu0 %v18763_v1 }
 0x40b   : > { %16109 = vmatmul.mubr.f32.vlgmr.msra.gmra.mrb[4].mxu1 %v18790_v26  ;;  %16175 = vmatmul.mubr.f32.vlgmr.msra.gmra.mrb[4].mxu0 %v18790_v26 }
 0x40c   : > { %17248 = vmatpush3.bf16.msra.mxu1 %v18761_v0  ;;  %17296 = vmatpush3.bf16.msra.mxu0 %v18763_v1  ;;  %v4513_v0 = vand.u32 4294901760, %v4492_v37  ;;  %v4516_v1 = vand.u32 4294901760, %v4493_v45 }
 0x40d   : > { %16119 = vmatprep.mubr.f32.mxu1 %v18802_v30  ;;  %16185 = vmatprep.mubr.f32.mxu0 %v18802_v30 }
 0x40e   : > { %17250 = vmatprep.subr.bf16.mxu1 %v18765_v2  ;;  %17298 = vmatprep.subr.bf16.mxu0 %v18767_v3  ;;  %v18865_v23 = vsub.f32 %v4492_v37, %v4513_v0  ;;  %v18869_v29 = vsub.f32 %v4493_v45, %v4516_v1  ;;  %v4619_v45 = vsub.f32 %v18885_v50, %v4618_v12 }
 0x410   : > { %17252 = vmatpush3.bf16.msra.mxu1 %v18765_v2  ;;  %17300 = vmatpush3.bf16.msra.mxu0 %v18767_v3  ;;  %v5105_v2 = vand.u32 4294901760, %v5084_v59  ;;  %v5108_v3 = vand.u32 4294901760, %v5085_v63  ;;  %v4604_v42 = vand.u32 4294901760, %v18865_v23  ;;  %v4611_v43 = vand.u32 4294901760, %v18869_v29 }
 0x411   : > { %17254 = vmatprep.subr.bf16.mxu1 %v18731_v5  ;;  %17302 = vmatprep.subr.bf16.mxu0 %v18733_v31 }
 0x412   : > { %v18871_v35 = vsub.f32 %v5084_v59, %v5105_v2  ;;  %v18873_v38 = vsub.f32 %v5085_v63, %v5108_v3  ;;  %v18899_v57 = vpack.c.bf16 %v5108_v3, %v5105_v2  ;;  %v4605_v62 = vsub.f32 %v18865_v23, %v4604_v42 }
 0x413   : > { %16120 = vmatmul.mubr.f32.vlgmr.msra.gmra.mrb[4].mxu1 %v18793_v24  ;;  %16186 = vmatmul.mubr.f32.vlgmr.msra.gmra.mrb[4].mxu0 %v18793_v24  ;;  %v4612_v8 = vsub.f32 %v18869_v29, %v4611_v43 }
 0x414   : > { %17256 = vmatpush3.bf16.msra.mxu1 %v18731_v5  ;;  %17304 = vmatpush3.bf16.msra.mxu0 %v18733_v31  ;;  %v5196_v46 = vand.u32 4294901760, %v18871_v35  ;;  %v5203_v49 = vand.u32 4294901760, %v18873_v38  ;;  %v4606_v36 = vand.u32 4294901760, %v4605_v62 }
 0x415   : > { %16130 = vmatprep.mubr.f32.mxu1 %v18805_v7  ;;  %16196 = vmatprep.mubr.f32.mxu0 %v18805_v7  ;;  %v4613_v9 = vand.u32 4294901760, %v4612_v8  ;;  %v5676_v8 = vld [vmem:[%s18495_s9] sm:$0xff] }
 0x416   : > { %17258 = vmatprep.subr.bf16.mxu1 %v18743_v16  ;;  %17306 = vmatprep.subr.bf16.mxu0 %v18745_v20  ;;  %v17405_v62 = vpack.c.bf16 %v5203_v49, %v5196_v46 }
 0x417   : > { %v17333_v63 = vpack.c.bf16 %v4613_v9, %v4606_v36  ;;  %v5679_v36 = vld [vmem:[%s18495_s9 + $0x18] sm:$0xff]  ;;  %v6270_v9 = vld [vmem:[%s18500_s14 + $0x10] sm:$0xff] }
 0x418   : > { %17260 = vmatpush3.bf16.msra.mxu1 %v18743_v16  ;;  %17308 = vmatpush3.bf16.msra.mxu0 %v18745_v20 }
 0x419   : > { %17262 = vmatprep.subr.bf16.mxu1 %v18769_v4  ;;  %17310 = vmatprep.subr.bf16.mxu0 %v18771_v32 }
 0x41b   : > { %16131 = vmatmul.mubr.f32.vlgmr.msra.gmra.mrb[4].mxu1 %v18799_v27  ;;  %16197 = vmatmul.mubr.f32.vlgmr.msra.gmra.mrb[4].mxu0 %v18799_v27 }
 0x41c   : > { %17264 = vmatpush3.bf16.msra.mxu1 %v18769_v4  ;;  %17312 = vmatpush3.bf16.msra.mxu0 %v18771_v32  ;;  %v4522_v4 = vand.u32 4294901760, %v4495_v28  ;;  %v5114_v32 = vand.u32 4294901760, %v5087_v18 }
 0x41d   : > { %16141 = vmatprep.mubr.f32.mxu1 %v18796_v39  ;;  %16207 = vmatprep.mubr.f32.mxu0 %v18796_v39 }
 0x41e   : > { %17266 = vmatprep.subr.bf16.mxu1 %v18773_v33  ;;  %17314 = vmatprep.subr.bf16.mxu0 %v18775_v6  ;;  %v18887_v52 = vsub.f32 %v4495_v28, %v4522_v4  ;;  %v18923_v34 = vpack.c.bf16 %v4522_v4, %v4519_v40  ;;  %v18925_v19 = vpack.c.bf16 %v5114_v32, %v5111_v41 }
 0x41f   : > { %v17389_v40 = vpack.c.bf16 %v18873_v38, %v18871_v35 }
 0x420   : > { %17268 = vmatpush3.bf16.msra.mxu1 %v18773_v33  ;;  %17316 = vmatpush3.bf16.msra.mxu0 %v18775_v6  ;;  %v18891_v33 = vsub.f32 %v5087_v18, %v5114_v32  ;;  %v18897_v6 = vpack.c.bf16 %v4516_v1, %v4513_v0  ;;  %v4625_v15 = vand.u32 4294901760, %v18887_v52  ;;  %v4620_v1 = vand.u32 4294901760, %v4619_v45 }
 0x421   : > { %17270 = vmatprep.subr.bf16.mxu1 %v18731_v5  ;;  %17318 = vmatprep.subr.bf16.mxu0 %v18733_v31  ;;  %v17341_v18 = vpack.c.bf16 %v18869_v29, %v18865_v23  ;;  %v17345_v4 = vpack.c.bf16 %v18887_v52, %v18885_v50  ;;  %v17357_v32 = vpack.c.bf16 %v4611_v43, %v4604_v42  ;;  %v6269_v23 = vld [vmem:[%s18500_s14 + $0x8] sm:$0xff]  ;;  %v5697_v29 = vand.u32 4294901760, %v5676_v8 }
 0x422   : > { %v5217_v21 = vand.u32 4294901760, %v18891_v33  ;;  %v17393_v41 = vpack.c.bf16 %v18891_v33, %v18889_v58  ;;  %v6292_v43 = vand.u32 4294901760, %v6269_v23 }
 0x423   : > { %16142 = vmatmul.mubr.f32.vlgmr.msra.gmra.mrb[4].mxu1 %v18790_v26  ;;  %16208 = vmatmul.mubr.f32.vlgmr.msra.gmra.mrb[4].mxu0 %v18790_v26  ;;  %v19006_v50 = vsub.f32 %v5676_v8, %v5697_v29 }
 0x424   : > { %17272 = vmatpush3.bf16.msra.mxu1 %v18731_v5  ;;  %17320 = vmatpush3.bf16.msra.mxu0 %v18733_v31  ;;  %v5197_v5 = vsub.f32 %v18871_v35, %v5196_v46  ;;  %v5204_v31 = vsub.f32 %v18873_v38, %v5203_v49  ;;  %v5218_v59 = vsub.f32 %v18891_v33, %v5217_v21  ;;  %v5678_v49 = vld [vmem:[%s18495_s9 + $0x10] sm:$0xff]  ;;  %v5706_v33 = vand.u32 4294901760, %v5679_v36 }
 0x425   : > { %16152 = vmatprep.mubr.f32.mxu1 %v18796_v39  ;;  %16218 = vmatprep.mubr.f32.mxu0 %v18796_v39  ;;  %v17361_v38 = vpack.c.bf16 %v4625_v15, %v4618_v12  ;;  %v17409_v46 = vpack.c.bf16 %v5217_v21, %v5210_v22 }
 0x426   : > { %17274 = vmatprep.subr.bf16.mxu1 %v18743_v16  ;;  %17322 = vmatprep.subr.bf16.mxu0 %v18745_v20  ;;  %v5198_v10 = vand.u32 4294901760, %v5197_v5  ;;  %v5205_v37 = vand.u32 4294901760, %v5204_v31  ;;  %v5219_v11 = vand.u32 4294901760, %v5218_v59  ;;  %v5677_v5 = vld [vmem:[%s18495_s9 + $0x8] sm:$0xff]  ;;  %v6268_v31 = vld [vmem:[%s18500_s14] sm:$0xff]  ;;  %s20608_s9 = sld [smem:[#allocation15_spill]] }
 0x427   : > { %v5700_v35 = vand.u32 4294901760, %v5677_v5  ;;  %v6289_v42 = vand.u32 4294901760, %v6268_v31 }
 0x428   : > { %17276 = vmatpush3.bf16.msra.mxu1 %v18743_v16  ;;  %17324 = vmatpush3.bf16.msra.mxu0 %v18745_v20  ;;  %v4626_v16 = vsub.f32 %v18887_v52, %v4625_v15  ;;  %v5211_v20 = vsub.f32 %v18889_v58, %v5210_v22  ;;  %v17381_v0 = vpack.c.bf16 %v5205_v37, %v5198_v10  ;;  %v6271_v10 = vld [vmem:[%s18500_s14 + $0x18] sm:$0xff]  ;;  %v5703_v58 = vand.u32 4294901760, %v5678_v49 }
 0x429   : > { %17326 = vmatprep.subr.bf16.mxu1 %v18897_v6  ;;  %17374 = vmatprep.subr.bf16.mxu0 %v18899_v57  ;;  %v19008_v52 = vsub.f32 %v5677_v5, %v5700_v35  ;;  %v19011_v12 = vsub.f32 %v6268_v31, %v6289_v42  ;;  %v19013_v15 = vsub.f32 %v6269_v23, %v6292_v43  ;;  %v6295_v22 = vand.u32 4294901760, %v6270_v9 }
 0x42a   : > { %v4627_v2 = vand.u32 4294901760, %v4626_v16  ;;  %v5212_v3 = vand.u32 4294901760, %v5211_v20  ;;  %v6298_v21 = vand.u32 4294901760, %v6271_v10  ;;  %v5788_v37 = vand.u32 4294901760, %v19006_v50 }
 0x42b   : > { %16153 = vmatmul.mubr.f32.vlgmr.msra.gmra.mrb[4].mxu1 %v18790_v26  ;;  %16219 = vmatmul.mubr.f32.vlgmr.msra.gmra.mrb[4].mxu0 %v18790_v26  ;;  %v5795_v45 = vand.u32 4294901760, %v19008_v52  ;;  %v6380_v16 = vand.u32 4294901760, %v19011_v12  ;;  %v6387_v20 = vand.u32 4294901760, %v19013_v15  ;;  %v19021_v59 = vsub.f32 %v5678_v49, %v5703_v58 }
 0x42c   : > { %17328 = vmatpush3.bf16.msra.mxu1 %v18897_v6  ;;  %17376 = vmatpush3.bf16.msra.mxu0 %v18899_v57  ;;  %v17337_v28 = vpack.c.bf16 %v4627_v2, %v4620_v1  ;;  %v17385_v14 = vpack.c.bf16 %v5219_v11, %v5212_v3  ;;  %v19028_v1 = vsub.f32 %v6271_v10, %v6298_v21  ;;  %s20609_s14 = scalar_lea.vmem %s20608_s9, %s18451_s0 }
 0x42d   : > { %16229 = vmatprep.mubr.f32.mxu1 %v18811_v13  ;;  %16295 = vmatprep.mubr.f32.mxu0 %v18710_v60  ;;  %v19032_v2 = vpack.c.bf16 %v5700_v35, %v5697_v29  ;;  %v19036_v3 = vpack.c.bf16 %v6292_v43, %v6289_v42  ;;  %v5789_v11 = vsub.f32 %v19006_v50, %v5788_v37 }
 0x42e   : > { %17330 = vmatprep.subr.bf16.mxu1 %v18923_v34  ;;  %17378 = vmatprep.subr.bf16.mxu0 %v18925_v19  ;;  %v17485_v10 = vpack.c.bf16 %v19013_v15, %v19011_v12 }
 0x430   : > { %17332 = vmatpush3.bf16.msra.mxu1 %v18923_v34  ;;  %17380 = vmatpush3.bf16.msra.mxu0 %v18925_v19 }
 0x431   : > { %17334 = vmatprep.subr.bf16.mxu1 %v17333_v63  ;;  %17382 = vmatprep.subr.bf16.mxu0 %v17381_v0 }
 0x433   : > { %16230 = vmatmul.mubr.f32.vlgmr.msra.gmra.mrb[6].mxu1 %v18813_v17  ;;  %16296 = vmatmul.mubr.f32.vlgmr.msra.gmra.mrb[6].mxu0 %v18712_v61 }
 0x434   : > { %17336 = vmatpush3.bf16.msra.mxu1 %v17333_v63  ;;  %16240 = vmatprep.mubr.f32.mxu1 %v18796_v39  ;;  %v19023_v63 = vsub.f32 %v5679_v36, %v5706_v33 }
 0x435   : > { %17384 = vmatpush3.bf16.msra.mxu0 %v17381_v0  ;;  %16306 = vmatprep.mubr.f32.mxu0 %v18689_v47  ;;  %v19026_v0 = vsub.f32 %v6270_v9, %v6295_v22 }
 0x436   : > { %17338 = vmatprep.subr.bf16.mxu1 %v17337_v28  ;;  %17386 = vmatprep.subr.bf16.mxu0 %v17385_v14 }
 0x438   : > { %17340 = vmatpush3.bf16.msra.mxu1 %v17337_v28  ;;  %v5796_v28 = vsub.f32 %v19008_v52, %v5795_v45 }
 0x439   : > { %17388 = vmatpush3.bf16.msra.mxu0 %v17385_v14  ;;  %17342 = vmatprep.subr.bf16.mxu1 %v17341_v18  ;;  %v5802_v14 = vand.u32 4294901760, %v19021_v59 }
 0x43a   : > { %17390 = vmatprep.subr.bf16.mxu0 %v17389_v40 }
 0x43b   : > { %16241 = vmatmul.mubr.f32.vlgmr.msra.gmra.mrb[6].mxu1 %v18790_v26  ;;  %v5803_v31 = vsub.f32 %v19021_v59, %v5802_v14 }
 0x43c   : > { %16307 = vmatmul.mubr.f32.vlgmr.msra.gmra.mrb[6].mxu0 %v18686_v51  ;;  %17344 = vmatpush3.bf16.msra.mxu1 %v17341_v18  ;;  %v5809_v18 = vand.u32 4294901760, %v19023_v63 }
 0x43d   : > { %16251 = vmatprep.mubr.f32.mxu1 %v18802_v30  ;;  %17392 = vmatpush3.bf16.msra.mxu0 %v17389_v40  ;;  %v6394_v40 = vand.u32 4294901760, %v19026_v0  ;;  %v5804_v42 = vand.u32 4294901760, %v5803_v31 }
 0x43e   : > { %16317 = vmatprep.mubr.f32.mxu0 %v18695_v56  ;;  %17346 = vmatprep.subr.bf16.mxu1 %v17345_v4 }
 0x43f   : > { %17394 = vmatprep.subr.bf16.mxu0 %v17393_v41  ;;  %v6395_v23 = vsub.f32 %v19026_v0, %v6394_v40 }
 0x440   : > { %17348 = vmatpush3.bf16.msra.mxu1 %v17345_v4  ;;  %v6401_v4 = vand.u32 4294901760, %v19028_v1 }
 0x441   : > { %17396 = vmatpush3.bf16.msra.mxu0 %v17393_v41  ;;  %17350 = vmatprep.subr.bf16.mxu1 %v18897_v6  ;;  %v19060_v41 = vpack.c.bf16 %v5706_v33, %v5703_v58  ;;  %v17489_v58 = vpack.c.bf16 %v19028_v1, %v19026_v0  ;;  %v6860_v33 = vld [vmem:[%s18505_s1] sm:$0xff] }
 0x442   : > { %17398 = vmatprep.subr.bf16.mxu0 %v18899_v57  ;;  %v6402_v29 = vsub.f32 %v19028_v1, %v6401_v4 }
 0x443   : > { %16252 = vmatmul.mubr.f32.vlgmr.msra.gmra.mrb[6].mxu1 %v18793_v24 }
 0x444   : > { %16318 = vmatmul.mubr.f32.vlgmr.msra.gmra.mrb[6].mxu0 %v18692_v53  ;;  %17352 = vmatpush3.bf16.msra.mxu1 %v18897_v6  ;;  %v6403_v49 = vand.u32 4294901760, %v6402_v29 }
 0x445   : > { %16262 = vmatprep.mubr.f32.mxu1 %v18805_v7  ;;  %17400 = vmatpush3.bf16.msra.mxu0 %v18899_v57 }
 0x446   : > { %16328 = vmatprep.mubr.f32.mxu0 %v18701_v55  ;;  %17354 = vmatprep.subr.bf16.mxu1 %v18923_v34 }
 0x447   : > { %17402 = vmatprep.subr.bf16.mxu0 %v18925_v19 }
 0x448   : > { %17356 = vmatpush3.bf16.msra.mxu1 %v18923_v34 }
 0x449   : > { %17404 = vmatpush3.bf16.msra.mxu0 %v18925_v19  ;;  %17358 = vmatprep.subr.bf16.mxu1 %v17357_v32 }
 0x44a   : > { %17406 = vmatprep.subr.bf16.mxu0 %v17405_v62 }
 0x44b   : > { %16263 = vmatmul.mubr.f32.vlgmr.msra.gmra.mrb[6].mxu1 %v18799_v27 }
 0x44c   : > { %16329 = vmatmul.mubr.f32.vlgmr.msra.gmra.mrb[6].mxu0 %v18698_v54  ;;  %17360 = vmatpush3.bf16.msra.mxu1 %v17357_v32  ;;  %v5790_v32 = vand.u32 4294901760, %v5789_v11 }
 0x44d   : > { %16273 = vmatprep.mubr.f32.mxu1 %v18796_v39  ;;  %17408 = vmatpush3.bf16.msra.mxu0 %v17405_v62  ;;  %v5797_v62 = vand.u32 4294901760, %v5796_v28 }
 0x44e   : > { %16339 = vmatprep.mubr.f32.mxu0 %v18689_v47  ;;  %17362 = vmatprep.subr.bf16.mxu1 %v17361_v38 }
 0x44f   : > { %17410 = vmatprep.subr.bf16.mxu0 %v17409_v46  ;;  %v17429_v35 = vpack.c.bf16 %v5797_v62, %v5790_v32 }
 0x450   : > { %17364 = vmatpush3.bf16.msra.mxu1 %v17361_v38 }
 0x451   : > { %17412 = vmatpush3.bf16.msra.mxu0 %v17409_v46  ;;  %17366 = vmatprep.subr.bf16.mxu1 %v18897_v6  ;;  %v6396_v46 = vand.u32 4294901760, %v6395_v23 }
 0x452   : > { %17414 = vmatprep.subr.bf16.mxu0 %v18899_v57 }
 0x453   : > { %16274 = vmatmul.mubr.f32.vlgmr.msra.gmra.mrb[6].mxu1 %v18790_v26  ;;  %v17481_v9 = vpack.c.bf16 %v6403_v49, %v6396_v46  ;;  %v15214_v46 = vld [vmem:[%s1259_s3] ss:$0 sm:$0xff] }
 0x454   : > { %16340 = vmatmul.mubr.f32.vlgmr.msra.gmra.mrb[6].mxu0 %v18686_v51  ;;  %17368 = vmatpush3.bf16.msra.mxu1 %v18897_v6  ;;  %v6381_v6 = vsub.f32 %v19011_v12, %v6380_v16  ;;  %v6862_v12 = vld [vmem:[%s18505_s1 + $0x10] sm:$0xff]  ;;  %v15215_v49 = vld [vmem:[%s1267_s7] ss:$0 sm:$0xff] }
 0x455   : > { %16284 = vmatprep.mubr.f32.mxu1 %v18796_v39  ;;  %17416 = vmatpush3.bf16.msra.mxu0 %v18899_v57  ;;  %v6388_v57 = vsub.f32 %v19013_v15, %v6387_v20  ;;  %v6863_v15 = vld [vmem:[%s18505_s1 + $0x18] sm:$0xff] }
 0x456   : > { %16350 = vmatprep.mubr.f32.mxu0 %v18689_v47  ;;  %17370 = vmatprep.subr.bf16.mxu1 %v18923_v34  ;;  %v6382_v8 = vand.u32 4294901760, %v6381_v6 }
 0x457   : > { %17418 = vmatprep.subr.bf16.mxu0 %v18925_v19  ;;  %v6389_v5 = vand.u32 4294901760, %v6388_v57 }
 0x458   : > { %17372 = vmatpush3.bf16.msra.mxu1 %v18923_v34  ;;  %v5810_v34 = vsub.f32 %v19023_v63, %v5809_v18 }
 0x459   : > { %17420 = vmatpush3.bf16.msra.mxu0 %v18925_v19  ;;  %17422 = vmatprep.subr.bf16.mxu1 %v19032_v2  ;;  %v19070_v19 = vpack.c.bf16 %v6298_v21, %v6295_v22  ;;  %v17477_v38 = vpack.c.bf16 %v6389_v5, %v6382_v8  ;;  %v6861_v22 = vld [vmem:[%s18505_s1 + $0x8] sm:$0xff]  ;;  %v17505_v21 = vpack.c.bf16 %v6401_v4, %v6394_v40 }
 0x45a   : > { %17470 = vmatprep.subr.bf16.mxu0 %v19036_v3  ;;  %v5811_v43 = vand.u32 4294901760, %v5810_v34 }
 0x45b   : > { %16285 = vmatmul.mubr.f32.vlgmr.msra.gmra.mrb[6].mxu1 %v18790_v26 }
 0x45c   : > { %16351 = vmatmul.mubr.f32.vlgmr.msra.gmra.mrb[6].mxu0 %v18686_v51  ;;  %17424 = vmatpush3.bf16.msra.mxu1 %v19032_v2  ;;  %v17433_v36 = vpack.c.bf16 %v5811_v43, %v5804_v42 }
 0x45d   : > { %16361 = vmatprep.mubr.f32.mxu1 %v18811_v13  ;;  %17472 = vmatpush3.bf16.msra.mxu0 %v19036_v3 }
 0x45e   : > { %16427 = vmatprep.mubr.f32.mxu0 %v18811_v13  ;;  %17426 = vmatprep.subr.bf16.mxu1 %v19060_v41  ;;  %v17437_v13 = vpack.c.bf16 %v19008_v52, %v19006_v50  ;;  %v6881_v50 = vand.u32 4294901760, %v6860_v33  ;;  %v6884_v52 = vand.u32 4294901760, %v6861_v22 }
 0x45f   : > { %17474 = vmatprep.subr.bf16.mxu0 %v19070_v19 }
 0x460   : > { %17428 = vmatpush3.bf16.msra.mxu1 %v19060_v41  ;;  %v17517_v1 = vpack.c.bf16 %v6884_v52, %v6881_v50 }
 0x461   : > { %17476 = vmatpush3.bf16.msra.mxu0 %v19070_v19  ;;  %17430 = vmatprep.subr.bf16.mxu1 %v17429_v35 }
 0x462   : > { %17478 = vmatprep.subr.bf16.mxu0 %v17477_v38 }
 0x463   : > { %16362 = vmatmul.mubr.f32.vlgmr.msra.gmra.mrb[8].mxu1 %v18813_v17 }
 0x464   : > { %16428 = vmatmul.mubr.f32.vlgmr.msra.gmra.mrb[8].mxu0 %v18813_v17  ;;  %17432 = vmatpush3.bf16.msra.mxu1 %v17429_v35  ;;  %v17441_v17 = vpack.c.bf16 %v19023_v63, %v19021_v59 }
 0x465   : > { %16372 = vmatprep.mubr.f32.mxu1 %v18796_v39  ;;  %17480 = vmatpush3.bf16.msra.mxu0 %v17477_v38 }
 0x466   : > { %16438 = vmatprep.mubr.f32.mxu0 %v18796_v39  ;;  %17434 = vmatprep.subr.bf16.mxu1 %v17433_v36 }
 0x467   : > { %17482 = vmatprep.subr.bf16.mxu0 %v17481_v9 }
 0x468   : > { %17436 = vmatpush3.bf16.msra.mxu1 %v17433_v36 }
 0x469   : > { %17484 = vmatpush3.bf16.msra.mxu0 %v17481_v9  ;;  %17438 = vmatprep.subr.bf16.mxu1 %v17437_v13  ;;  %v4502_v9 = vcombine.low %v15214_v46, %v15214_v46 }
 0x46a   : > { %17486 = vmatprep.subr.bf16.mxu0 %v17485_v10 }
 0x46b   : > { %16373 = vmatmul.mubr.f32.vlgmr.msra.gmra.mrb[8].mxu1 %v18790_v26 }
 0x46c   : > { %16439 = vmatmul.mubr.f32.vlgmr.msra.gmra.mrb[8].mxu0 %v18790_v26  ;;  %17440 = vmatpush3.bf16.msra.mxu1 %v17437_v13  ;;  %v5094_v13 = vcombine.low %v15215_v49, %v15215_v49 }
 0x46d   : > { %16383 = vmatprep.mubr.f32.mxu1 %v18802_v30  ;;  %17488 = vmatpush3.bf16.msra.mxu0 %v17485_v10 }
 0x46e   : > { %16449 = vmatprep.mubr.f32.mxu0 %v18802_v30  ;;  %17442 = vmatprep.subr.bf16.mxu1 %v17441_v17  ;;  %v17453_v30 = vpack.c.bf16 %v5795_v45, %v5788_v37  ;;  %v6887_v37 = vand.u32 4294901760, %v6862_v12  ;;  %v6890_v45 = vand.u32 4294901760, %v6863_v15 }
 0x46f   : > { %17490 = vmatprep.subr.bf16.mxu0 %v17489_v58 }
 0x470   : > { %17444 = vmatpush3.bf16.msra.mxu1 %v17441_v17  ;;  %v6985_v63 = vsub.f32 %v6862_v12, %v6887_v37  ;;  %v6992_v0 = vsub.f32 %v6863_v15, %v6890_v45  ;;  %v4509_v17 = vrot.slane %v4502_v9, %v18632_v25 }
 0x471   : > { %17492 = vmatpush3.bf16.msra.mxu0 %v17489_v58  ;;  %17446 = vmatprep.subr.bf16.mxu1 %v19032_v2  ;;  %v5101_v58 = vrot.slane %v5094_v13, %v18632_v25 }
 0x472   : > { %17494 = vmatprep.subr.bf16.mxu0 %v19036_v3  ;;  %v6986_v6 = vand.u32 4294901760, %v6985_v63  ;;  %v6993_v57 = vand.u32 4294901760, %v6992_v0 }
 0x473   : > { %16384 = vmatmul.mubr.f32.vlgmr.msra.gmra.mrb[8].mxu1 %v18793_v24 }
 0x474   : > { %16450 = vmatmul.mubr.f32.vlgmr.msra.gmra.mrb[8].mxu0 %v18793_v24  ;;  %17448 = vmatpush3.bf16.msra.mxu1 %v19032_v2  ;;  %v17501_v24 = vpack.c.bf16 %v6387_v20, %v6380_v16  ;;  %v19138_v16 = vsub.f32 %v6860_v33, %v6881_v50  ;;  %v19140_v20 = vsub.f32 %v6861_v22, %v6884_v52 }
 0x475   : > { %16394 = vmatprep.mubr.f32.mxu1 %v18805_v7  ;;  %17496 = vmatpush3.bf16.msra.mxu0 %v19036_v3  ;;  %v6994_v40 = vsub.f32 %v6992_v0, %v6993_v57  ;;  %v5102_v33 = vcombine.low %v5101_v58, %v5101_v58 }
 0x476   : > { %16460 = vmatprep.mubr.f32.mxu0 %v18805_v7  ;;  %17450 = vmatprep.subr.bf16.mxu1 %v19060_v41  ;;  %v17457_v7 = vpack.c.bf16 %v5809_v18, %v5802_v14  ;;  %v6979_v59 = vand.u32 4294901760, %v19140_v20  ;;  %v6987_v18 = vsub.f32 %v6985_v63, %v6986_v6  ;;  %v17533_v62 = vpack.c.bf16 %v19140_v20, %v19138_v16 }
 0x477   : > { %17498 = vmatprep.subr.bf16.mxu0 %v19070_v19  ;;  %v6995_v32 = vand.u32 4294901760, %v6994_v40 }
 0x478   : > { %17452 = vmatpush3.bf16.msra.mxu1 %v19060_v41  ;;  %v6980_v28 = vsub.f32 %v19140_v20, %v6979_v59  ;;  %v6988_v4 = vand.u32 4294901760, %v6987_v18 }
 0x479   : > { %17500 = vmatpush3.bf16.msra.mxu0 %v19070_v19  ;;  %17454 = vmatprep.subr.bf16.mxu1 %v17453_v30 }
 0x47a   : > { %17502 = vmatprep.subr.bf16.mxu0 %v17501_v24 }
 0x47b   : > { %16395 = vmatmul.mubr.f32.vlgmr.msra.gmra.mrb[8].mxu1 %v18799_v27 }
 0x47c   : > { %16461 = vmatmul.mubr.f32.vlgmr.msra.gmra.mrb[8].mxu0 %v18799_v27  ;;  %17456 = vmatpush3.bf16.msra.mxu1 %v17453_v30  ;;  %v6972_v27 = vand.u32 4294901760, %v19138_v16 }
 0x47d   : > { %16405 = vmatprep.mubr.f32.mxu1 %v18796_v39  ;;  %17504 = vmatpush3.bf16.msra.mxu0 %v17501_v24  ;;  %v4510_v24 = vcombine.low %v4509_v17, %v4509_v17 }
 0x47e   : > { %16471 = vmatprep.mubr.f32.mxu0 %v18796_v39  ;;  %17458 = vmatprep.subr.bf16.mxu1 %v17457_v7  ;;  %v6973_v11 = vsub.f32 %v19138_v16, %v6972_v27 }
 0x47f   : > { %17506 = vmatprep.subr.bf16.mxu0 %v17505_v21 }
 0x480   : > { %17460 = vmatpush3.bf16.msra.mxu1 %v17457_v7  ;;  %v6974_v14 = vand.u32 4294901760, %v6973_v11 }
 0x481   : > { %17508 = vmatpush3.bf16.msra.mxu0 %v17505_v21  ;;  %17462 = vmatprep.subr.bf16.mxu1 %v19032_v2 }
 0x482   : > { %17510 = vmatprep.subr.bf16.mxu0 %v19036_v3 }
 0x483   : > { %16406 = vmatmul.mubr.f32.vlgmr.msra.gmra.mrb[8].mxu1 %v18790_v26 }
 0x484   : > { %16472 = vmatmul.mubr.f32.vlgmr.msra.gmra.mrb[8].mxu0 %v18790_v26  ;;  %17464 = vmatpush3.bf16.msra.mxu1 %v19032_v2  ;;  %v17521_v2 = vpack.c.bf16 %v6890_v45, %v6887_v37 }
 0x485   : > { %16416 = vmatprep.mubr.f32.mxu1 %v18796_v39  ;;  %17512 = vmatpush3.bf16.msra.mxu0 %v19036_v3  ;;  %v6981_v3 = vand.u32 4294901760, %v6980_v28 }
 0x486   : > { %16482 = vmatprep.mubr.f32.mxu0 %v18796_v39  ;;  %17466 = vmatprep.subr.bf16.mxu1 %v19060_v41 }
 0x487   : > { %17514 = vmatprep.subr.bf16.mxu0 %v19070_v19  ;;  %v17525_v39 = vpack.c.bf16 %v6981_v3, %v6974_v14 }
 0x488   : > { %17468 = vmatpush3.bf16.msra.mxu1 %v19060_v41  ;;  %v17529_v41 = vpack.c.bf16 %v6995_v32, %v6988_v4 }
 0x489   : > { %17516 = vmatpush3.bf16.msra.mxu0 %v19070_v19  ;;  %17518 = vmatprep.subr.bf16.mxu1 %v17517_v1 }
 0x48b   : > { %16417 = vmatmul.mubr.f32.vlgmr.msra.gmra.mrb[8].mxu1 %v18790_v26 }
 0x48c   : > { %16483 = vmatmul.mubr.f32.vlgmr.msra.gmra.mrb[8].mxu0 %v18790_v26  ;;  %17520 = vmatpush3.bf16.msra.mxu1 %v17517_v1  ;;  %v17537_v26 = vpack.c.bf16 %v6992_v0, %v6985_v63 }
 0x48d   : > { %16493 = vmatprep.mubr.f32.mxu1 %v18710_v60  ;;  %17522 = vmatprep.subr.bf16.mxu1 %v17521_v2  ;;  %v17549_v60 = vpack.c.bf16 %v6979_v59, %v6972_v27 }
 0x490   : > { %17524 = vmatpush3.bf16.msra.mxu1 %v17521_v2 }
 0x491   : > { %17526 = vmatprep.subr.bf16.mxu1 %v17525_v39 }
 0x493   : > { %16494 = vmatmul.mubr.f32.vlgmr.msra.gmra.mrb[10].mxu1 %v18712_v61  ;;  %v17553_v61 = vpack.c.bf16 %v6993_v57, %v6986_v6 }
 0x494   : > { %17528 = vmatpush3.bf16.msra.mxu1 %v17525_v39  ;;  %16504 = vmatprep.mubr.f32.mxu1 %v18689_v47 }
 0x495   : > { %17530 = vmatprep.subr.bf16.mxu1 %v17529_v41 }
 0x498   : > { %17532 = vmatpush3.bf16.msra.mxu1 %v17529_v41 }
 0x499   : > { %17534 = vmatprep.subr.bf16.mxu1 %v17533_v62 }
 0x49b   : > { %16505 = vmatmul.mubr.f32.vlgmr.msra.gmra.mrb[10].mxu1 %v18686_v51 }
 0x49c   : > { %17536 = vmatpush3.bf16.msra.mxu1 %v17533_v62  ;;  %16515 = vmatprep.mubr.f32.mxu1 %v18695_v56 }
 0x49d   : > { %17538 = vmatprep.subr.bf16.mxu1 %v17537_v26 }
 0x4a0   : > { %17540 = vmatpush3.bf16.msra.mxu1 %v17537_v26 }
 0x4a1   : > { %17542 = vmatprep.subr.bf16.mxu1 %v17517_v1 }
 0x4a3   : > { %16516 = vmatmul.mubr.f32.vlgmr.msra.gmra.mrb[10].mxu1 %v18692_v53  ;;  %v15213_v53 = vld [vmem:[%s20609_s14] ss:$0 sm:$0xff] }
 0x4a4   : > { %17544 = vmatpush3.bf16.msra.mxu1 %v17517_v1  ;;  %16526 = vmatprep.mubr.f32.mxu1 %v18701_v55  ;;  %v3910_v56 = vcombine.low %v15213_v53, %v15213_v53 }
 0x4a5   : > { %17546 = vmatprep.subr.bf16.mxu1 %v17521_v2 }
 0x4a8   : > { %17548 = vmatpush3.bf16.msra.mxu1 %v17521_v2 }
 0x4a9   : > { %17550 = vmatprep.subr.bf16.mxu1 %v17549_v60 }
 0x4ab   : > { %16527 = vmatmul.mubr.f32.vlgmr.msra.gmra.mrb[10].mxu1 %v18698_v54  ;;  %v3917_v54 = vrot.slane %v3910_v56, %v18632_v25 }
 0x4ac   : > { %17552 = vmatpush3.bf16.msra.mxu1 %v17549_v60  ;;  %16537 = vmatprep.mubr.f32.mxu1 %v18689_v47 }
 0x4ad   : > { %17554 = vmatprep.subr.bf16.mxu1 %v17553_v61  ;;  %v3918_v55 = vcombine.low %v3917_v54, %v3917_v54 }
 0x4b0   : > { %17556 = vmatpush3.bf16.msra.mxu1 %v17553_v61 }
 0x4b1   : > { %17558 = vmatprep.subr.bf16.mxu1 %v17517_v1 }
 0x4b3   : > { %16538 = vmatmul.mubr.f32.vlgmr.msra.gmra.mrb[10].mxu1 %v18686_v51 }
 0x4b4   : > { %17560 = vmatpush3.bf16.msra.mxu1 %v17517_v1  ;;  %16548 = vmatprep.mubr.f32.mxu1 %v18689_v47 }
 0x4b5   : > { %17562 = vmatprep.subr.bf16.mxu1 %v17521_v2 }
 0x4b8   : > { %17564 = vmatpush3.bf16.msra.mxu1 %v17521_v2 }
 0x4bb   : > { %16549 = vmatmul.mubr.f32.vlgmr.msra.gmra.mrb[10].mxu1 %v18686_v51 }
 0x4fe   : > { %v19179_v8 = vpop.f32.mrb[4].mxu1  ;;  %v16220_v5 = vpop.f32.mrb[4].mxu0 }
 0x4ff   : > { %20610 = vst [vmem:[#allocation41_spill] sm:$0xff] %v19179_v8  ;;  %v19181_v31 = vpop.f32.mrb[5].mxu1  ;;  %v4438_v34 = vpop.f32.mrb[5].mxu0  ;;  %v17719_v38 = vadd.f32 %v16220_v5, %v3918_v55  ;;  %v15217_v5 = vld [vmem:[%s1283_s21] ss:$0 sm:$0xff] }
 0x500   : > { %20611 = vst [vmem:[#allocation42_spill] sm:$0xff] %v19181_v31  ;;  %v17720_v19 = vadd.f32 %v4438_v34, %v3918_v55  ;;  %v15216_v55 = vld [vmem:[%s1275_s8] ss:$0 sm:$0xff]  ;;  %s20640_s8 = sld [smem:[#allocation28_spill]] }
 0x501   : > { %v19202_v42 = vrot.slane %v17719_v38, %v18632_v25  ;;  %v4467_v36 = vcombine.high %v17719_v38, %v17719_v38  ;;  %v5686_v34 = vcombine.low %v15216_v55, %v15216_v55 }
 0x502   : > { %v19184_v47 = vrot.slane %v17720_v19, %v18632_v25  ;;  %v4450_v23 = vcombine.high %v17720_v19, %v17720_v19  ;;  %v6278_v19 = vcombine.low %v15217_v5, %v15217_v5 }
 0x503   : > { %v19207_v43 = vcombine.high %v19202_v42, %v19202_v42  ;;  %v19217_v10 = vrot.slane %v4467_v36, %v18632_v25 }
 0x504   : > { %7514 = vxpose.xlu0.b32.start.end [1/1] (short) (narrow) %v19184_v47, 32  ;;  %v19189_v51 = vcombine.high %v19184_v47, %v19184_v47  ;;  %v19193_v29 = vrot.slane %v4450_v23, %v18632_v25  ;;  %v5693_v23 = vrot.slane %v5686_v34, %v18632_v25  ;;  %v6285_v38 = vrot.slane %v6278_v19, %v18632_v25 }
 0x505   : > { %v19224_v30 = vcombine.high %v19217_v10, %v19217_v10 }
 0x506   : > { %8176 = vxpose.xlu1.b32.start.end [1/1] (short) (narrow) %v19189_v51, 32  ;;  %v19198_v35 = vcombine.high %v19193_v29, %v19193_v29  ;;  %v5694_v46 = vcombine.low %v5693_v23, %v5693_v23  ;;  %v6286_v49 = vcombine.low %v6285_v38, %v6285_v38 }
 0x511   : > { %8836 = vxpose.xlu0.b32.start.end [1/1] (short) (narrow) %v19193_v29, 32 }
 0x513   : > { %9496 = vxpose.xlu1.b32.start.end [1/1] (short) (narrow) %v19198_v35, 32 }
 0x51e   : > { %10156 = vxpose.xlu0.b32.start.end [1/1] (short) (narrow) %v19202_v42, 32 }
 0x520   : > { %10816 = vxpose.xlu1.b32.start.end [1/1] (short) (narrow) %v19207_v43, 32 }
 0x52b   : > { %11476 = vxpose.xlu0.b32.start.end [1/1] (short) (narrow) %v19217_v10, 32 }
 0x52d   : > { %12136 = vxpose.xlu1.b32.start.end [1/1] (short) (narrow) %v19224_v30, 32 }
 0x52e   : > { %v16286_v22 = vpop.f32.mrb[6].mxu1 }
 0x52f   : > { %v16352_v50 = vpop.f32.mrb[6].mxu0  ;;  %v17721_v52 = vadd.f32 %v16286_v22, %v4510_v24  ;;  %v5030_v7 = vpop.f32.mrb[7].mxu1 }
 0x530   : > { %v17723_v12 = vadd.f32 %v16352_v50, %v5102_v33  ;;  %v17722_v15 = vadd.f32 %v5030_v7, %v4510_v24  ;;  %v5622_v21 = vpop.f32.mrb[7].mxu0 }
 0x531   : > { %v5059_v37 = vcombine.high %v17721_v52, %v17721_v52  ;;  %v19228_v45 = vrot.slane %v17721_v52, %v18632_v25  ;;  %v17724_v16 = vadd.f32 %v5622_v21, %v5102_v33 }
 0x532   : > { %v5651_v20 = vcombine.high %v17723_v12, %v17723_v12  ;;  %v5658_v27 = vrot.slane %v17723_v12, %v18632_v25  ;;  %v5042_v59 = vcombine.high %v17722_v15, %v17722_v15  ;;  %v19232_v63 = vrot.slane %v17722_v15, %v18632_v25 }
 0x533   : > { %v19235_v0 = vrot.slane %v5059_v37, %v18632_v25  ;;  %v19239_v1 = vcombine.high %v19228_v45, %v19228_v45  ;;  %v5634_v11 = vcombine.high %v17724_v16, %v17724_v16  ;;  %v5641_v28 = vrot.slane %v17724_v16, %v18632_v25 }
 0x534   : > { %v5665_v6 = vrot.slane %v5651_v20, %v18632_v25  ;;  %v5666_v57 = vcombine.high %v5658_v27, %v5658_v27  ;;  %v19244_v2 = vmul.f32 %v5658_v27, %v19228_v45  ;;  %v19247_v14 = vrot.slane %v5042_v59, %v18632_v25 }
 0x535   : > { %20613 = vst [vmem:[#allocation43_spill] sm:$0xff] %v19235_v0  ;;  %v19251_v3 = vcombine.high %v19235_v0, %v19235_v0  ;;  %v19255_v18 = vcombine.high %v19232_v63, %v19232_v63  ;;  %v5648_v40 = vrot.slane %v5634_v11, %v18632_v25  ;;  %v5649_v39 = vcombine.high %v5641_v28, %v5641_v28 }
 0x536   : > { %v5667_v4 = vcombine.high %v5665_v6, %v5665_v6  ;;  %v19259_v32 = vmul.f32 %v5666_v57, %v19239_v1  ;;  %v19262_v41 = vmul.f32 %v5665_v6, %v19235_v0  ;;  %v19266_v62 = vcombine.high %v19247_v14, %v19247_v14 }
 0x537   : > { %20616 = vst [vmem:[#allocation44_spill] sm:$0xff] %v19251_v3  ;;  %v5650_v26 = vcombine.high %v5648_v40, %v5648_v40  ;;  %v19269_v60 = vmul.f32 %v5641_v28, %v19232_v63  ;;  %v19272_v61 = vmul.f32 %v5649_v39, %v19255_v18  ;;  %v19275_v53 = vmul.f32 %v5648_v40, %v19247_v14 }
 0x538   : > { %v19278_v56 = vmul.f32 %v5667_v4, %v19251_v3 }
 0x539   : > { %v19281_v54 = vmul.f32 %v5650_v26, %v19266_v62 }
 0x55e   : > { %v16418_v36 = vpop.f32.mrb[8].mxu1 }
 0x55f   : > { %v16484_v9 = vpop.f32.mrb[8].mxu0  ;;  %v6214_v13 = vpop.f32.mrb[9].mxu1  ;;  %v17725_v34 = vadd.f32 %v16418_v36, %v5694_v46 }
 0x560   : > { %v17726_v17 = vadd.f32 %v6214_v13, %v5694_v46  ;;  %v6806_v58 = vpop.f32.mrb[9].mxu0  ;;  %v17727_v39 = vadd.f32 %v16484_v9, %v6286_v49 }
 0x561   : > { %v17728_v24 = vadd.f32 %v6806_v58, %v6286_v49  ;;  %v6243_v46 = vcombine.high %v17725_v34, %v17725_v34 }
 0x562   : > { %v6233_v33 = vrot.slane %v17726_v17, %v18632_v25  ;;  %v6226_v12 = vcombine.high %v17726_v17, %v17726_v17  ;;  %v6842_v17 = vrot.slane %v17727_v39, %v18632_v25 }
 0x563   : > { %v6825_v22 = vrot.slane %v17728_v24, %v18632_v25  ;;  %v6818_v50 = vcombine.high %v17728_v24, %v17728_v24 }
 0x564   : > { %v6241_v15 = vcombine.high %v6233_v33, %v6233_v33  ;;  %v6240_v28 = vrot.slane %v6226_v12, %v18632_v25 }
 0x565   : > { %v6833_v52 = vcombine.high %v6825_v22, %v6825_v22  ;;  %v7501_v7 = vmax.f32 %v6825_v22, %v6233_v33  ;;  %v6832_v20 = vrot.slane %v6818_v50, %v18632_v25 }
 0x566   : > { %v6242_v19 = vcombine.high %v6240_v28, %v6240_v28 }
 0x567   : > { %v7502_v21 = vsub.f32 %v6233_v33, %v7501_v7  ;;  %v7505_v37 = vsub.f32 %v6825_v22, %v7501_v7  ;;  %v8161_v16 = vadd.f32 %v7501_v7, %v6833_v52  ;;  %v6834_v4 = vcombine.high %v6832_v20, %v6832_v20 }
 0x568   : > { %v6250_v22 = vrot.slane %v17725_v34, %v18632_v25 }
 0x569   : > { %v7503_v27 = vmul.f32 1.442695, %v7502_v21  ;;  %v7506_v59 = vmul.f32 1.442695, %v7505_v37  ;;  %v8162_v11 = vmax.f32 %v8161_v16, %v6241_v15  ;;  %v6835_v21 = vcombine.high %v17727_v39, %v17727_v39 }
 0x56a   : > { %v6850_v37 = vcombine.high %v6842_v17, %v6842_v17 }
 0x56b   : > { %18110 = vpow2.f32 %v7503_v27  ;;  %v8163_v6 = vsub.f32 %v6241_v15, %v8162_v11  ;;  %v8166_v57 = vsub.f32 %v8161_v16, %v8162_v11  ;;  %v8821_v40 = vadd.f32 %v8162_v11, %v6832_v20 }
 0x56c   : > { %18112 = vpow2.f32 %v7506_v59 }
 0x56d   : > { %v8164_v26 = vmul.f32 1.442695, %v8163_v6  ;;  %v8167_v55 = vmul.f32 1.442695, %v8166_v57  ;;  %v8822_v5 = vmax.f32 %v8821_v40, %v6240_v28 }
 0x56f   : > { %18114 = vpow2.f32 %v8164_v26  ;;  %v8823_v23 = vsub.f32 %v6240_v28, %v8822_v5  ;;  %v8826_v38 = vsub.f32 %v8821_v40, %v8822_v5  ;;  %v9481_v13 = vadd.f32 %v8822_v5, %v6834_v4 }
 0x570   : > { %18116 = vpow2.f32 %v8167_v55  ;;  %v6258_v28 = vcombine.high %v6250_v22, %v6250_v22 }
 0x571   : > { %v8824_v58 = vmul.f32 1.442695, %v8823_v23  ;;  %v8827_v24 = vmul.f32 1.442695, %v8826_v38  ;;  %v9482_v33 = vmax.f32 %v9481_v13, %v6242_v19 }
 0x573   : > { %18118 = vpow2.f32 %v8824_v58  ;;  %v9483_v49 = vsub.f32 %v6242_v19, %v9482_v33  ;;  %v9486_v9 = vsub.f32 %v9481_v13, %v9482_v33  ;;  %v10141_v50 = vadd.f32 %v9482_v33, %v6842_v17  ;;  %v15218_v33 = vld [vmem:[%s1291_s19] ss:$0 sm:$0xff] }
 0x574   : > { %18120 = vpow2.f32 %v8827_v24  ;;  %v6849_v19 = vrot.slane %v6835_v21, %v18632_v25  ;;  %v6870_v21 = vcombine.low %v15218_v33, %v15218_v33 }
 0x575   : > { %v18111_v52 = vpop.eup %18110  ;;  %v9484_v36 = vmul.f32 1.442695, %v9483_v49  ;;  %v9487_v7 = vmul.f32 1.442695, %v9486_v9  ;;  %v10142_v12 = vmax.f32 %v10141_v50, %v6250_v22 }
 0x576   : > { %v18113_v15 = vpop.eup %18112  ;;  %v7510_v16 = vmul.f32 %v18111_v52, %v19269_v60  ;;  %v7512_v20 = vmul.f32 %v18111_v52, %v19232_v63  ;;  %v6257_v60 = vrot.slane %v6243_v46, %v18632_v25 }
 0x577   : > { %v7508_v27 = vmul.f32 0.0, %v18113_v15  ;;  %18122 = vpow2.f32 %v9484_v36  ;;  %v10143_v59 = vsub.f32 %v6250_v22, %v10142_v12  ;;  %v10146_v11 = vsub.f32 %v10141_v50, %v10142_v12 }
 0x578   : > { %18124 = vpow2.f32 %v9487_v7  ;;  %v10801_v6 = vadd.f32 %v10142_v12, %v6850_v37  ;;  %v6851_v37 = vcombine.high %v6849_v19, %v6849_v19 }
 0x579   : > { %v18115_v57 = vpop.eup %18114  ;;  %v19299_v40 = vadd.f32 %v7510_v16, %v7508_v27  ;;  %v7513_v4 = vadd.f32 %v7512_v20, %v7508_v27  ;;  %v10144_v26 = vmul.f32 1.442695, %v10143_v59  ;;  %v10147_v39 = vmul.f32 1.442695, %v10146_v11 }
 0x57a   : > { %v18117_v55 = vpop.eup %18116  ;;  %v8171_v63 = vmul.f32 %v18115_v57, %v19272_v61  ;;  %v8174_v5 = vmul.f32 %v18115_v57, %v19255_v18  ;;  %v10802_v34 = vmax.f32 %v10801_v6, %v6258_v28 }
 0x57b   : > { %v7561_v23 = vsel %vm7559_vm4, %v7513_v4, 0  ;;  %v8169_v38 = vmul.f32 %v18117_v55, %v19299_v40  ;;  %v8173_v13 = vmul.f32 %v18117_v55, %v7513_v4  ;;  %18126 = vpow2.f32 %v10144_v26 }
 0x57c   : > { %v19307_v17 = vand.u32 4294901760, %v7561_v23  ;;  %v10803_v58 = vsub.f32 %v6258_v28, %v10802_v34  ;;  %v10806_v24 = vsub.f32 %v10801_v6, %v10802_v34  ;;  %18128 = vpow2.f32 %v10147_v39 }
 0x57d   : > { %v18119_v22 = vpop.eup %18118  ;;  %v19312_v61 = vadd.f32 %v8171_v63, %v8169_v38  ;;  %v8175_v18 = vadd.f32 %v8174_v5, %v8173_v13  ;;  %v11461_v49 = vadd.f32 %v10802_v34, %v6849_v19  ;;  %v6877_v55 = vrot.slane %v6870_v21, %v18632_v25 }
 0x57e   : > { %v18121_v9 = vpop.eup %18120  ;;  %v8831_v50 = vmul.f32 %v18119_v22, %v19275_v53  ;;  %v8834_v52 = vmul.f32 %v18119_v22, %v19247_v14  ;;  %v10804_v46 = vmul.f32 1.442695, %v10803_v58  ;;  %v10807_v36 = vmul.f32 1.442695, %v10806_v24  ;;  %16551 = vmatprep.subr.mxu0 %v19307_v17 }
 0x57f   : > { %v8221_v7 = vsel %vm7559_vm4, %v8175_v18, 0  ;;  %v8829_v12 = vmul.f32 %v18121_v9, %v19312_v61  ;;  %v8833_v15 = vmul.f32 %v18121_v9, %v8175_v18  ;;  %16552 = vmatpush3.msra.mxu0 %v19307_v17  ;;  %v11462_v20 = vmax.f32 %v11461_v49, %v6257_v60 }
 0x580   : > { %v19320_v16 = vand.u32 4294901760, %v8221_v7  ;;  %18130 = vpow2.f32 %v10804_v46  ;;  %v19327_v59 = vsub.f32 %v7561_v23, %v19307_v17  ;;  %v19336_v63 = vcombine.high %v6257_v60, %v6257_v60 }
 0x581   : > { %v18123_v53 = vpop.eup %18122  ;;  %v19322_v27 = vadd.f32 %v8831_v50, %v8829_v12  ;;  %v19324_v14 = vadd.f32 %v8834_v52, %v8833_v15  ;;  %18132 = vpow2.f32 %v10807_v36  ;;  %v11463_v57 = vsub.f32 %v6257_v60, %v11462_v20 }
 0x582   : > { %v18125_v11 = vpop.eup %18124  ;;  %v9491_v28 = vmul.f32 %v18123_v53, %v19281_v54  ;;  %v9494_v6 = vmul.f32 %v18123_v53, %v19266_v62  ;;  %v11466_v4 = vsub.f32 %v11461_v49, %v11462_v20  ;;  %16599 = vmatprep.subr.mxu1 %v19320_v16  ;;  %v12121_v54 = vadd.f32 %v11462_v20, %v6851_v37 }
 0x583   : > { %v9489_v26 = vmul.f32 %v18125_v11, %v19322_v27  ;;  %v9493_v39 = vmul.f32 %v18125_v11, %v19324_v14  ;;  %16600 = vmatpush3.msra.mxu1 %v19320_v16  ;;  %v11464_v5 = vmul.f32 1.442695, %v11463_v57  ;;  %v19343_v38 = vand.u32 4294901760, %v19327_v59 }
 0x584   : > { %v11467_v34 = vmul.f32 1.442695, %v11466_v4  ;;  %v7530_v19 = vpop.trf.xlu0  ;;  %v12122_v60 = vmax.f32 %v12121_v54, %v19336_v63  ;;  %v19352_v22 = vsub.f32 %v8221_v7, %v19320_v16 }
 0x585   : > { %v19338_v62 = vadd.f32 %v9491_v28, %v9489_v26  ;;  %v19340_v23 = vadd.f32 %v9494_v6, %v9493_v39  ;;  %v7548_v13 = vsel %vm7546_vm5, %v7530_v19, 0  ;;  %v19346_v58 = vpop.eup %18126  ;;  %18134 = vpow2.f32 %v11464_v5 }
 0x586   : > { %v19349_v24 = vand.u32 4294901760, %v7548_v13  ;;  %v8192_v33 = vpop.trf.xlu1  ;;  %v18129_v18 = vpop.eup %18128  ;;  %18136 = vpow2.f32 %v11467_v34  ;;  %v7673_v49 = vsub.f32 %v19327_v59, %v19343_v38  ;;  %v10151_v50 = vmul.f32 %v19346_v58, %v19244_v2  ;;  %15240 = vst.msk [vmem:[%s18520_s29 + $0x6] sm:$0x3] %vm8159_vm6, %v12122_v60 }
 0x587   : > { %v8209_v9 = vsel %vm7546_vm5, %v8192_v33, 0  ;;  %v19360_v52 = vmul.f32 %v18129_v18, %v19340_v23  ;;  %v12126_v46 = vsub.f32 %v12121_v54, %v12122_v60  ;;  %v19369_v15 = vand.u32 4294901760, %v19352_v22 }
 0x588   : > { %v19364_v36 = vand.u32 4294901760, %v8209_v9  ;;  %v7531_v7 = vpop.trf.xlu0  ;;  %v19366_v12 = vand.u32 4294901760, %v7673_v49  ;;  %v10149_v37 = vmul.f32 %v18129_v18, %v19338_v62  ;;  %v19376_v53 = vsub.f32 %v7548_v13, %v19349_v24 }
 0x589   : > { %v7551_v21 = vsel %vm7546_vm5, %v7531_v7, 0  ;;  %v12127_v2 = vmul.f32 1.442695, %v12126_v46  ;;  %v6878_v6 = vcombine.low %v6877_v55, %v6877_v55  ;;  %v8333_v4 = vsub.f32 %v19352_v22, %v19369_v15 }
 0x58a   : > { %v19373_v20 = vpop.eup %18130  ;;  %v19378_v11 = vand.u32 4294901760, %v7551_v21  ;;  %v8193_v28 = vpop.trf.xlu1  ;;  %16559 = vmatprep.subr.mxu0 %v19366_v12  ;;  %v19386_v39 = vadd.f32 %v10151_v50, %v10149_v37  ;;  %v19396_v19 = vsub.f32 %v8209_v9, %v19364_v36  ;;  %v12123_v7 = vsub.f32 %v19336_v63, %v12122_v60 }
 0x58b   : > { %20618 = vst [vmem:[#allocation45_spill] sm:$0xff] %v19373_v20  ;;  %v19380_v57 = vpop.eup %18132  ;;  %v8212_v26 = vsel %vm7546_vm5, %v8193_v28, 0  ;;  %v10811_v5 = vmul.f32 %v19373_v20, %v19259_v32  ;;  %18138 = vpow2.f32 %v12127_v2  ;;  %v19398_v13 = vand.u32 4294901760, %v8333_v4 }
 0x58c   : > { %20619 = vst [vmem:[#allocation46_spill] sm:$0xff] %v19380_v57  ;;  %v19391_v34 = vsub.f32 %v7551_v21, %v19378_v11  ;;  %v19393_v54 = vand.u32 4294901760, %v8212_v26  ;;  %v7532_v55 = vpop.trf.xlu0  ;;  %v10809_v18 = vmul.f32 %v19380_v57, %v19386_v39  ;;  %v12124_v63 = vmul.f32 1.442695, %v12123_v7 }
 0x58d   : > { %v7554_v33 = vsel %vm7546_vm5, %v7532_v55, 0  ;;  %16607 = vmatprep.subr.mxu1 %v19398_v13 }
 0x58e   : > { %v20518_v49 = vand.u32 4294901760, %v19391_v34  ;;  %v19405_v32 = vsub.f32 %v8212_v26, %v19393_v54  ;;  %v19407_v50 = vand.u32 4294901760, %v7554_v33  ;;  %v16550_v46 = vpop.f32.mrb[10].mxu1  ;;  %v8194_v21 = vpop.trf.xlu1  ;;  %v19412_v2 = vadd.f32 %v10811_v5, %v10809_v18 }
 0x58f   : > { %v17729_v37 = vadd.f32 %v16550_v46, %v6878_v6  ;;  %v7398_v28 = vpop.f32.mrb[11].mxu1  ;;  %v19414_v4 = vpop.eup %18134  ;;  %v8215_v18 = vsel %vm7546_vm5, %v8194_v21, 0  ;;  %18140 = vpow2.f32 %v12124_v63 }
 0x590   : > { %20620 = vst [vmem:[#allocation47_spill] sm:$0xff] %v19414_v4  ;;  %v7642_v26 = vsub.f32 %v19391_v34, %v20518_v49  ;;  %v20521_v55 = vand.u32 4294901760, %v19405_v32  ;;  %v19421_v31 = vsub.f32 %v7554_v33, %v19407_v50  ;;  %v19423_v60 = vpop.eup %18136  ;;  %v11471_v5 = vmul.f32 %v19414_v4, %v19262_v41  ;;  %v7533_v41 = vpop.trf.xlu0 }
 0x591   : > { %20621 = vst [vmem:[#allocation48_spill] sm:$0xff] %v19423_v60  ;;  %v7427_v9 = vcombine.high %v17729_v37, %v17729_v37  ;;  %v7434_v46 = vrot.slane %v17729_v37, %v18632_v25  ;;  %v11469_v33 = vmul.f32 %v19423_v60, %v19412_v2  ;;  %v19441_v21 = vand.u32 4294901760, %v8215_v18 }
 0x592   : > { %v7643_v48 = vand.u32 4294901760, %v7642_v26  ;;  %v19433_v49 = vsub.f32 %v19405_v32, %v20521_v55  ;;  %v17730_v26 = vadd.f32 %v7398_v28, %v6878_v6  ;;  %v20623_v28 = vand.u32 4294901760, %v19376_v53 }
 0x593   : > { %v7441_v7 = vrot.slane %v7427_v9, %v18632_v25  ;;  %v7442_v44 = vcombine.high %v7434_v46, %v7434_v46  ;;  %v15223_v37 = vmul.f32 -1.442695, %v7434_v46  ;;  %v19439_v3 = vadd.f32 %v11471_v5, %v11469_v33 }
 0x594   : > { %v8303_v60 = vand.u32 4294901760, %v19433_v49  ;;  %v19447_v9 = vsub.f32 %v8215_v18, %v19441_v21  ;;  %v7410_v46 = vcombine.high %v17730_v26, %v17730_v26  ;;  %v7417_v63 = vrot.slane %v17730_v26, %v18632_v25 }
 0x595   : > { %v7443_v8 = vcombine.high %v7441_v7, %v7441_v7  ;;  %18142 = vpow2.f32 %v15223_v37  ;;  %v15224_v4 = vmul.f32 -1.442695, %v7442_v44  ;;  %v15225_v55 = vmul.f32 -1.442695, %v7441_v7  ;;  %v19443_v0 = vpop.eup %18138  ;;  %v8195_v7 = vpop.trf.xlu1 }
 0x596   : > { %20622 = vst [vmem:[#allocation49_spill] sm:$0xff] %v19443_v0  ;;  %v12129_v6 = vmul.f32 %v19443_v0, %v19439_v3  ;;  %v7632_v44 = vsub.f32 %v19376_v53, %v20623_v28  ;;  %v7424_v49 = vrot.slane %v7410_v46, %v18632_v25  ;;  %v7425_v18 = vcombine.high %v7417_v63, %v7417_v63 }
 0x597   : > { %18144 = vpow2.f32 %v15224_v4  ;;  %v15226_v5 = vmul.f32 -1.442695, %v7443_v8  ;;  %v15219_v37 = vmul.f32 -1.442695, %v7417_v63  ;;  %v7557_v4 = vsel %vm7546_vm5, %v7533_v41, 0 }
 0x598   : > { %18146 = vpow2.f32 %v15225_v55  ;;  %v7633_v26 = vand.u32 4294901760, %v7632_v44  ;;  %v7426_v8 = vcombine.high %v7424_v49, %v7424_v49  ;;  %v15220_v57 = vmul.f32 -1.442695, %v7425_v18 }
 0x599   : > { %18148 = vpow2.f32 %v15226_v5  ;;  %v15221_v20 = vmul.f32 -1.442695, %v7424_v49  ;;  %v19458_v0 = vand.u32 4294901760, %v7557_v4  ;;  %v8218_v55 = vsel %vm7546_vm5, %v8195_v7, 0  ;;  %v19472_v49 = vpop.eup %18140 }
 0x59a   : > { %18150 = vpow2.f32 %v15219_v37  ;;  %16553 = vmatprep.mubr.f32.mxu0 %v7633_v26  ;;  %v20624_v28 = vand.u32 4294901760, %v19396_v19  ;;  %v20625_v33 = vand.u32 4294901760, %v19421_v31  ;;  %v15222_v5 = vmul.f32 -1.442695, %v7426_v8 }
 0x59b   : > { %18152 = vpow2.f32 %v15220_v57  ;;  %v19468_v41 = vsub.f32 %v7557_v4, %v19458_v0  ;;  %v19470_v44 = vand.u32 4294901760, %v8218_v55  ;;  %16554 = vmatmul.mubr.f32.vlgmr.msra.gmra.mrb[10].mxu0 %v7643_v48  ;;  %v20626_v37 = vand.u32 4294901760, %v19447_v9 }
 0x59c   : > { %v8292_v46 = vsub.f32 %v19396_v19, %v20624_v28  ;;  %v7652_v63 = vsub.f32 %v19421_v31, %v20625_v33  ;;  %18154 = vpow2.f32 %v15221_v20  ;;  %16560 = vmatpush3.msra.mxu0 %v19366_v12  ;;  %v12131_v57 = vmul.f32 %v19472_v49, %v19278_v56 }
 0x59d   : > { %v8312_v26 = vsub.f32 %v19447_v9, %v20626_v37  ;;  %18156 = vpow2.f32 %v15222_v5  ;;  %v7661_v33 = vand.u32 4294901760, %v19468_v41  ;;  %v19482_v4 = vsub.f32 %v8218_v55, %v19470_v44  ;;  %16567 = vmatprep.subr.mxu0 %v19327_v59 }
 0x59e   : > { %v8293_v18 = vand.u32 4294901760, %v8292_v46  ;;  %v7653_v7 = vand.u32 4294901760, %v7652_v63  ;;  %v12132_v8 = vadd.f32 %v12131_v57, %v12129_v6 }
 0x59f   : > { %v18143_v48 = vpop.eup %18142  ;;  %v8313_v12 = vand.u32 4294901760, %v8312_v26  ;;  %v8321_v28 = vand.u32 4294901760, %v19482_v4  ;;  %v7662_v56 = vsub.f32 %v19468_v41, %v7661_v33 }
 0x5a0   : > { %16601 = vmatprep.mubr.f32.mxu1 %v8293_v18  ;;  %16556 = vmatprep.mubr.f32.mxu0 %v7653_v7  ;;  %v7480_v20 = vadd.f32 1.0, %v18143_v48  ;;  %15238 = vst.msk [vmem:[%s18520_s29 + $0x2] sm:$0x3] %vm8159_vm6, %v12132_v8 }
 0x5a1   : > { %16602 = vmatmul.mubr.f32.vlgmr.msra.gmra.mrb[12].mxu1 %v8303_v60  ;;  %v18145_v46 = vpop.eup %18144  ;;  %v7663_v5 = vand.u32 4294901760, %v7662_v56  ;;  %v8322_v60 = vsub.f32 %v19482_v4, %v8321_v28 }
 0x5a2   : > { %16608 = vmatpush3.msra.mxu1 %v19398_v13  ;;  %16604 = vmatprep.mubr.f32.mxu1 %v8313_v12  ;;  %v18147_v55 = vpop.eup %18146  ;;  %v7481_v63 = vadd.f32 1.0, %v18145_v46  ;;  %18158 = vrcp.f32 %v7480_v20 }
 0x5a3   : > { %16615 = vmatprep.subr.mxu1 %v19352_v22  ;;  %v18149_v6 = vpop.eup %18148  ;;  %v7482_v18 = vadd.f32 1.0, %v18147_v55  ;;  %16557 = vmatmul.mubr.f32.gmra.mrb[12].mxu0 %v7663_v5  ;;  %v8323_v13 = vand.u32 4294901760, %v8322_v60  ;;  %v10795_v55 = vmul.f32 %v19386_v39, %v19202_v42  ;;  %v12115_v39 = vmul.f32 %v19439_v3, %v19217_v10 }
 0x5a4   : > { %v7483_v7 = vadd.f32 1.0, %v18149_v6  ;;  %18160 = vrcp.f32 %v7481_v63  ;;  %v18151_v37 = vpop.eup %18150  ;;  %16561 = vmatprep.mubr.f32.mxu0 %v19349_v24  ;;  %v8852_v63 = vpop.trf.xlu0 }
 0x5a5   : > { %18162 = vrcp.f32 %v7482_v18  ;;  %v18153_v26 = vpop.eup %18152  ;;  %v7476_v57 = vadd.f32 1.0, %v18151_v37  ;;  %16605 = vmatmul.mubr.f32.gmra.mrb[14].mxu1 %v8323_v13  ;;  %v9512_v18 = vpop.trf.xlu1 }
 0x5a6   : > { %18164 = vrcp.f32 %v7483_v7  ;;  %v18155_v48 = vpop.eup %18154  ;;  %v7477_v12 = vadd.f32 1.0, %v18153_v26  ;;  %16609 = vmatprep.mubr.f32.mxu1 %v19364_v36  ;;  %v12775_v7 = vmul.f32 %v12132_v8, %v19224_v30  ;;  %v8815_v26 = vmul.f32 %v19312_v61, %v19189_v51 }
 0x5a7   : > { %v18157_v20 = vpop.eup %18156  ;;  %v7478_v56 = vadd.f32 1.0, %v18155_v48  ;;  %18166 = vrcp.f32 %v7476_v57  ;;  %16562 = vmatmul.mubr.f32.vlgmr.msra.gmra.mrb[10].mxu0 %v19378_v11  ;;  %v9475_v8 = vmul.f32 %v19322_v27, %v19193_v29  ;;  %v10135_v51 = vmul.f32 %v19338_v62, %v19198_v35 }
 0x5a8   : > { %v7479_v46 = vadd.f32 1.0, %v18157_v20  ;;  %18168 = vrcp.f32 %v7477_v12  ;;  %16568 = vmatpush3.msra.mxu0 %v19327_v59  ;;  %16564 = vmatprep.mubr.f32.mxu0 %v19407_v50  ;;  %v11455_v59 = vmul.f32 %v19412_v2, %v19207_v43  ;;  %v8155_v2 = vmul.f32 %v19299_v40, %v19184_v47  ;;  %v8853_v10 = vpop.trf.xlu0 }
 0x5a9   : > { %18170 = vrcp.f32 %v7478_v56  ;;  %16575 = vmatprep.subr.mxu0 %v19307_v17  ;;  %16610 = vmatmul.mubr.f32.vlgmr.msra.gmra.mrb[12].mxu1 %v19393_v54  ;;  %v9513_v47 = vpop.trf.xlu1  ;;  %v8881_v29 = vsel %vm7559_vm4, %v19324_v14, 0  ;;  %v20627_v20 = vand.u32 4294901760, %v19376_v53  ;;  %v10154_v62 = vmul.f32 %v19346_v58, %v19228_v45 }
 0x5aa   : > { %18172 = vrcp.f32 %v7479_v46  ;;  %16616 = vmatpush3.msra.mxu1 %v19352_v22  ;;  %16612 = vmatprep.mubr.f32.mxu1 %v19441_v21  ;;  %v20628_v56 = vand.u32 4294901760, %v19396_v19  ;;  %v9541_v46 = vsel %vm7559_vm4, %v19340_v23, 0  ;;  %v20629_v14 = vand.u32 4294901760, %v19391_v34 }
 0x5ab   : > { %16623 = vmatprep.subr.mxu1 %v19320_v16  ;;  %16565 = vmatmul.mubr.f32.gmra.mrb[12].mxu0 %v19458_v0  ;;  %v20631_v58 = vand.u32 4294901760, %v19421_v31  ;;  %v9529_v23 = vsel %vm7546_vm5, %v9512_v18, 0 }
 0x5ac   : > { %v18159_v5 = vpop.eup %18158  ;;  %16569 = vmatprep.mubr.f32.mxu0 %v19376_v53  ;;  %v8854_v35 = vpop.trf.xlu0  ;;  %v8869_v53 = vsel %vm7546_vm5, %v8852_v63, 0  ;;  %v19579_v63 = vand.u32 4294901760, %v9541_v46 }
 0x5ad   : > { %v19507_v6 = vmul.f32 %v18159_v5, %v10795_v55  ;;  %16613 = vmatmul.mubr.f32.gmra.mrb[14].mxu1 %v19470_v44  ;;  %v19561_v55 = vand.u32 4294901760, %v8881_v29  ;;  %v9514_v5 = vpop.trf.xlu1 }
 0x5ae   : > { %v18161_v42 = vpop.eup %18160  ;;  %16617 = vmatprep.mubr.f32.mxu1 %v19396_v19  ;;  %v8872_v19 = vsel %vm7546_vm5, %v8853_v10, 0 }
 0x5af   : > { %v18163_v60 = vpop.eup %18162  ;;  %v19516_v22 = vmul.f32 %v18161_v42, %v11455_v59  ;;  %16570 = vmatmul.mubr.f32.vlgmr.msra.gmra.mrb[10].mxu0 %v19391_v34  ;;  %v19567_v59 = vadd.f32 %v10154_v62, %v19360_v52  ;;  %v20630_v42 = vld [vmem:[#allocation45_spill] sm:$0xff]  ;;  %v20632_v34 = vand.u32 4294901760, %v19405_v32  ;;  %v20633_v52 = vld [vmem:[#allocation46_spill] sm:$0xff]  ;;  %v19593_v18 = vsub.f32 %v8881_v29, %v19561_v55 }
 0x5b0   : > { %v18165_v37 = vpop.eup %18164  ;;  %v19520_v43 = vmul.f32 %v18163_v60, %v12115_v39  ;;  %16576 = vmatpush3.msra.mxu0 %v19307_v17  ;;  %16572 = vmatprep.mubr.f32.mxu0 %v19421_v31  ;;  %v10814_v45 = vmul.f32 %v20630_v42, %v19239_v1  ;;  %v19583_v1 = vand.u32 4294901760, %v8869_v53  ;;  %v20634_v31 = vand.u32 4294901760, %v19447_v9  ;;  %v20636_v42 = vld [vmem:[#allocation43_spill] sm:$0xff] }
 0x5b1   : > { %v19525_v13 = vmul.f32 %v18165_v37, %v12775_v7  ;;  %v18167_v3 = vpop.eup %18166  ;;  %16583 = vmatprep.subr.mxu0 %v19343_v38  ;;  %16618 = vmatmul.mubr.f32.vlgmr.msra.gmra.mrb[12].mxu1 %v19405_v32  ;;  %v10813_v39 = vmul.f32 %v20633_v52, %v19567_v59  ;;  %v8855_v32 = vpop.trf.xlu0  ;;  %v19597_v7 = vand.u32 4294901760, %v9529_v23  ;;  %v19607_v37 = vsub.f32 %v9541_v46, %v19579_v63 }
 0x5b2   : > { %v18169_v30 = vpop.eup %18168  ;;  %v19534_v57 = vmul.f32 %v18167_v3, %v8155_v2  ;;  %16624 = vmatpush3.msra.mxu1 %v19320_v16  ;;  %16620 = vmatprep.mubr.f32.mxu1 %v19447_v9  ;;  %v9532_v9 = vsel %vm7546_vm5, %v9513_v47, 0  ;;  %v19610_v2 = vsub.f32 %v8869_v53, %v19583_v1  ;;  %v8878_v3 = vsel %vm7546_vm5, %v8855_v32, 0  ;;  %v20635_v53 = vld [vmem:[#allocation48_spill] sm:$0xff] }
 0x5b3   : > { %v18171_v40 = vpop.eup %18170  ;;  %v19538_v48 = vmul.f32 %v18169_v30, %v8815_v26  ;;  %16631 = vmatprep.subr.mxu1 %v19369_v15  ;;  %16573 = vmatmul.mubr.f32.gmra.mrb[12].mxu0 %v19468_v41  ;;  %v19595_v60 = vadd.f32 %v10814_v45, %v10813_v39  ;;  %v9535_v41 = vsel %vm7546_vm5, %v9514_v5, 0  ;;  %v19616_v26 = vand.u32 4294901760, %v9532_v9  ;;  %v20637_v45 = vld [vmem:[#allocation47_spill] sm:$0xff] }
 0x5b4   : > { %v18173_v61 = vpop.eup %18172  ;;  %v19544_v12 = vmul.f32 %v18171_v40, %v9475_v8  ;;  %16577 = vmatprep.mubr.f32.mxu0 %v20627_v20  ;;  %v19630_v8 = vand.u32 4294901760, %v9535_v41  ;;  %v19635_v40 = vand.u32 4294901760, %v8878_v3 }
 0x5b5   : > { %v19550_v27 = vmul.f32 %v18173_v61, %v10135_v51  ;;  %16621 = vmatmul.mubr.f32.gmra.mrb[14].mxu1 %v19482_v4  ;;  %v19620_v4 = vand.u32 4294901760, %v19593_v18  ;;  %v19638_v51 = vand.u32 4294901760, %v19607_v37  ;;  %v8951_v61 = vand.u32 4294901760, %v19610_v2 }
 0x5b6   : > { %16625 = vmatprep.mubr.f32.mxu1 %v20628_v56  ;;  %v19662_v46 = vsub.f32 %v8878_v3, %v19635_v40  ;;  %v11473_v5 = vmul.f32 %v20635_v53, %v19595_v60 }
 0x5b7   : > { %16578 = vmatmul.mubr.f32.vlgmr.msra.gmra.mrb[10].mxu0 %v20629_v14  ;;  %v9653_v14 = vsub.f32 %v19607_v37, %v19638_v51 }
 0x5b8   : > { %16584 = vmatpush3.msra.mxu0 %v19343_v38  ;;  %16580 = vmatprep.mubr.f32.mxu0 %v20631_v58  ;;  %v8875_v38 = vsel %vm7546_vm5, %v8854_v35, 0  ;;  %v8993_v35 = vsub.f32 %v19593_v18, %v19620_v4  ;;  %v11474_v58 = vmul.f32 %v20637_v45, %v20636_v42  ;;  %v8981_v32 = vand.u32 4294901760, %v19662_v46 }
 0x5b9   : > { %16591 = vmatprep.subr.mxu0 %v19307_v17  ;;  %16626 = vmatmul.mubr.f32.vlgmr.msra.gmra.mrb[12].mxu1 %v20632_v34  ;;  %v19613_v10 = vand.u32 4294901760, %v8875_v38 }
 0x5ba   : > { %16632 = vmatpush3.msra.mxu1 %v19369_v15  ;;  %16628 = vmatprep.mubr.f32.mxu1 %v20634_v31  ;;  %v19600_v15 = vand.u32 4294901760, %v8872_v19  ;;  %v8994_v52 = vand.u32 4294901760, %v8993_v35  ;;  %v19681_v39 = vadd.f32 %v11474_v58, %v11473_v5  ;;  %v8982_v5 = vsub.f32 %v19662_v46, %v8981_v32 }
 0x5bb   : > { %16639 = vmatprep.subr.mxu1 %v19320_v16  ;;  %16581 = vmatmul.mubr.f32.gmra.mrb[12].mxu0 %v7661_v33  ;;  %v9515_v33 = vpop.trf.xlu1  ;;  %v19642_v29 = vsub.f32 %v8875_v38, %v19613_v10 }
 0x5bc   : > { %16585 = vmatprep.mubr.f32.mxu0 %v19349_v24  ;;  %v19626_v30 = vsub.f32 %v8872_v19, %v19600_v15  ;;  %v9538_v47 = vsel %vm7546_vm5, %v9515_v33, 0  ;;  %v20639_v33 = vld [vmem:[#allocation44_spill] sm:$0xff] }
 0x5bd   : > { %16629 = vmatmul.mubr.f32.gmra.mrb[14].mxu1 %v8321_v28  ;;  %v19623_v28 = vsub.f32 %v9529_v23, %v19597_v7  ;;  %v19651_v20 = vand.u32 4294901760, %v9538_v47  ;;  %v8971_v23 = vand.u32 4294901760, %v19642_v29  ;;  %v12134_v3 = vmul.f32 %v19472_v49, %v20639_v33 }
 0x5be   : > { %16633 = vmatprep.mubr.f32.mxu1 %v19364_v36  ;;  %v8961_v56 = vand.u32 4294901760, %v19626_v30 }
 0x5bf   : > { %16586 = vmatmul.mubr.f32.vlgmr.msra.gmra.mrb[10].mxu0 %v19378_v11  ;;  %v9611_v62 = vand.u32 4294901760, %v19623_v28  ;;  %v19678_v19 = vsub.f32 %v9538_v47, %v19651_v20  ;;  %v8972_v47 = vsub.f32 %v19642_v29, %v8971_v23 }
 0x5c0   : > { %16592 = vmatpush3.msra.mxu0 %v19307_v17  ;;  %16588 = vmatprep.mubr.f32.mxu0 %v19407_v50  ;;  %v19647_v17 = vsub.f32 %v9532_v9, %v19616_v26  ;;  %v8962_v31 = vsub.f32 %v19626_v30, %v8961_v56  ;;  %v20638_v9 = vld [vmem:[#allocation49_spill] sm:$0xff] }
 0x5c1   : > { %16647 = vmatprep.subr.mxu0 %v19561_v55  ;;  %16634 = vmatmul.mubr.f32.vlgmr.msra.gmra.mrb[12].mxu1 %v19393_v54  ;;  %v9612_v38 = vsub.f32 %v19623_v28, %v9611_v62  ;;  %v9641_v35 = vand.u32 4294901760, %v19678_v19 }
 0x5c2   : > { %16640 = vmatpush3.msra.mxu1 %v19320_v16  ;;  %16636 = vmatprep.mubr.f32.mxu1 %v19441_v21  ;;  %v19658_v16 = vsub.f32 %v9535_v41, %v19630_v8  ;;  %v9621_v34 = vand.u32 4294901760, %v19647_v17  ;;  %v12133_v41 = vmul.f32 %v20638_v9, %v19681_v39  ;;  %v8963_v53 = vand.u32 4294901760, %v8962_v31  ;;  %v10832_v31 = vpop.trf.xlu1 }
 0x5c3   : > { %16695 = vmatprep.subr.mxu1 %v19579_v63  ;;  %16589 = vmatmul.mubr.f32.gmra.mrb[12].mxu0 %v19458_v0  ;;  %v9642_v45 = vsub.f32 %v19678_v19, %v9641_v35  ;;  %v10861_v9 = vsel %vm7559_vm4, %v19595_v60, 0 }
 0x5c4   : > { %16593 = vmatprep.mubr.f32.mxu0 %v19349_v24  ;;  %v8952_v24 = vsub.f32 %v19610_v2, %v8951_v61  ;;  %v19708_v49 = vadd.f32 %v12134_v3, %v12133_v41  ;;  %v19769_v60 = vand.u32 4294901760, %v10861_v9 }
 0x5c5   : > { %16637 = vmatmul.mubr.f32.gmra.mrb[14].mxu1 %v19470_v44 }
 0x5c6   : > { %16641 = vmatprep.mubr.f32.mxu1 %v19364_v36  ;;  %v9631_v36 = vand.u32 4294901760, %v19658_v16  ;;  %15239 = vst.msk [vmem:[%s18520_s29 + $0x4] sm:$0x3] %vm8159_vm6, %v19708_v49 }
 0x5c7   : > { %16594 = vmatmul.mubr.f32.vlgmr.msra.gmra.mrb[10].mxu0 %v19378_v11  ;;  %v9654_v11 = vand.u32 4294901760, %v9653_v14  ;;  %v9613_v14 = vand.u32 4294901760, %v9612_v38  ;;  %v10201_v38 = vsel %vm7559_vm4, %v19567_v59, 0  ;;  %v10849_v59 = vsel %vm7546_vm5, %v10832_v31, 0 }
 0x5c8   : > { %16648 = vmatpush3.msra.mxu0 %v19561_v55  ;;  %16596 = vmatprep.mubr.f32.mxu0 %v19407_v50  ;;  %v8953_v50 = vand.u32 4294901760, %v8952_v24  ;;  %v9643_v24 = vand.u32 4294901760, %v9642_v45  ;;  %v19760_v33 = vand.u32 4294901760, %v10201_v38 }
 0x5c9   : > { %16655 = vmatprep.subr.mxu0 %v8994_v52  ;;  %16642 = vmatmul.mubr.f32.vlgmr.msra.gmra.mrb[12].mxu1 %v19393_v54  ;;  %v9622_v54 = vsub.f32 %v19647_v17, %v9621_v34 }
 0x5ca   : > { %16696 = vmatpush3.msra.mxu1 %v19579_v63  ;;  %16644 = vmatprep.mubr.f32.mxu1 %v19441_v21  ;;  %v9632_v21 = vsub.f32 %v19658_v16, %v9631_v36 }
 0x5cb   : > { %16703 = vmatprep.subr.mxu1 %v9654_v11  ;;  %16597 = vmatmul.mubr.f32.gmra.mrb[12].mxu0 %v19458_v0  ;;  %v8973_v0 = vand.u32 4294901760, %v8972_v47  ;;  %v9623_v42 = vand.u32 4294901760, %v9622_v54 }
 0x5cc   : > { %16649 = vmatprep.mubr.f32.mxu0 %v8953_v50  ;;  %v9633_v58 = vand.u32 4294901760, %v9632_v21 }
 0x5cd   : > { %16645 = vmatmul.mubr.f32.gmra.mrb[14].mxu1 %v19470_v44  ;;  %v8983_v44 = vand.u32 4294901760, %v8982_v5 }
 0x5ce   : > { %16697 = vmatprep.mubr.f32.mxu1 %v9613_v14 }
 0x5cf   : > { %16650 = vmatmul.mubr.f32.vlgmr.msra.gmra.mrb[14].mxu0 %v8963_v53 }
 0x5d0   : > { %16656 = vmatpush3.msra.mxu0 %v8994_v52  ;;  %16652 = vmatprep.mubr.f32.mxu0 %v8973_v0  ;;  %v10172_v52 = vpop.trf.xlu0 }
 0x5d1   : > { %16663 = vmatprep.subr.mxu0 %v19593_v18  ;;  %16698 = vmatmul.mubr.f32.vlgmr.msra.gmra.mrb[16].mxu1 %v9623_v42  ;;  %v10189_v41 = vsel %vm7546_vm5, %v10172_v52, 0 }
 0x5d2   : > { %16704 = vmatpush3.msra.mxu1 %v9654_v11  ;;  %16700 = vmatprep.mubr.f32.mxu1 %v9633_v58 }
 0x5d3   : > { %16711 = vmatprep.subr.mxu1 %v19607_v37  ;;  %16653 = vmatmul.mubr.f32.gmra.mrb[16].mxu0 %v8983_v44 }
 0x5d4   : > { %16657 = vmatprep.mubr.f32.mxu0 %v19583_v1 }
 0x5d5   : > { %16701 = vmatmul.mubr.f32.gmra.mrb[18].mxu1 %v9643_v24 }
 0x5d6   : > { %16705 = vmatprep.mubr.f32.mxu1 %v19597_v7 }
 0x5d7   : > { %16658 = vmatmul.mubr.f32.vlgmr.msra.gmra.mrb[14].mxu0 %v19600_v15 }
 0x5d8   : > { %16664 = vmatpush3.msra.mxu0 %v19593_v18  ;;  %16660 = vmatprep.mubr.f32.mxu0 %v19613_v10  ;;  %v10173_v18 = vpop.trf.xlu0 }
 0x5d9   : > { %16671 = vmatprep.subr.mxu0 %v19561_v55  ;;  %16706 = vmatmul.mubr.f32.vlgmr.msra.gmra.mrb[16].mxu1 %v19616_v26 }
 0x5da   : > { %16712 = vmatpush3.msra.mxu1 %v19607_v37  ;;  %16708 = vmatprep.mubr.f32.mxu1 %v19630_v8  ;;  %v10833_v37 = vpop.trf.xlu1 }
 0x5db   : > { %16719 = vmatprep.subr.mxu1 %v19579_v63  ;;  %16661 = vmatmul.mubr.f32.gmra.mrb[16].mxu0 %v19635_v40 }
 0x5dc   : > { %16665 = vmatprep.mubr.f32.mxu0 %v19610_v2  ;;  %v10174_v11 = vpop.trf.xlu0 }
 0x5dd   : > { %16709 = vmatmul.mubr.f32.gmra.mrb[18].mxu1 %v19651_v20 }
 0x5de   : > { %16713 = vmatprep.mubr.f32.mxu1 %v19623_v28  ;;  %v10834_v2 = vpop.trf.xlu1  ;;  %v19771_v28 = vand.u32 4294901760, %v10189_v41 }
 0x5df   : > { %16666 = vmatmul.mubr.f32.vlgmr.msra.gmra.mrb[14].mxu0 %v19626_v30  ;;  %v10195_v30 = vsel %vm7546_vm5, %v10174_v11, 0 }
 0x5e0   : > { %16672 = vmatpush3.msra.mxu0 %v19561_v55  ;;  %16668 = vmatprep.mubr.f32.mxu0 %v19642_v29  ;;  %v19782_v29 = vsub.f32 %v10201_v38, %v19760_v33 }
 0x5e1   : > { %16679 = vmatprep.subr.mxu0 %v19620_v4  ;;  %16714 = vmatmul.mubr.f32.vlgmr.msra.gmra.mrb[16].mxu1 %v19647_v17  ;;  %v19784_v17 = vand.u32 4294901760, %v10849_v59 }
 0x5e2   : > { %16720 = vmatpush3.msra.mxu1 %v19579_v63  ;;  %16716 = vmatprep.mubr.f32.mxu1 %v19658_v16  ;;  %v10835_v16 = vpop.trf.xlu1 }
 0x5e3   : > { %16727 = vmatprep.subr.mxu1 %v19638_v51  ;;  %16669 = vmatmul.mubr.f32.gmra.mrb[16].mxu0 %v19662_v46  ;;  %v19794_v46 = vsub.f32 %v10861_v9, %v19769_v60  ;;  %v19810_v3 = vsub.f32 %v10849_v59, %v19784_v17  ;;  %v10858_v47 = vsel %vm7546_vm5, %v10835_v16, 0 }
 0x5e4   : > { %16673 = vmatprep.mubr.f32.mxu0 %v8951_v61  ;;  %v10175_v61 = vpop.trf.xlu0  ;;  %v19838_v5 = vand.u32 4294901760, %v10858_v47 }
 0x5e5   : > { %16717 = vmatmul.mubr.f32.gmra.mrb[18].mxu1 %v19678_v19  ;;  %v19807_v19 = vand.u32 4294901760, %v19782_v29  ;;  %v19825_v14 = vand.u32 4294901760, %v19794_v46  ;;  %v10931_v42 = vand.u32 4294901760, %v19810_v3 }
 0x5e6   : > { %16721 = vmatprep.mubr.f32.mxu1 %v9611_v62  ;;  %v19861_v31 = vsub.f32 %v10858_v47, %v19838_v5  ;;  %v11521_v47 = vsel %vm7559_vm4, %v19681_v39, 0 }
 0x5e7   : > { %16674 = vmatmul.mubr.f32.vlgmr.msra.gmra.mrb[14].mxu0 %v8961_v56  ;;  %v10855_v56 = vsel %vm7546_vm5, %v10834_v2, 0  ;;  %v10313_v0 = vsub.f32 %v19782_v29, %v19807_v19  ;;  %v10973_v44 = vsub.f32 %v19794_v46, %v19825_v14 }
 0x5e8   : > { %16680 = vmatpush3.msra.mxu0 %v19620_v4  ;;  %16676 = vmatprep.mubr.f32.mxu0 %v8971_v23  ;;  %v10192_v4 = vsel %vm7546_vm5, %v10173_v18, 0  ;;  %v19797_v23 = vsub.f32 %v10189_v41, %v19771_v28  ;;  %v19814_v50 = vand.u32 4294901760, %v10855_v56  ;;  %v10961_v2 = vand.u32 4294901760, %v19861_v31  ;;  %v11492_v16 = vpop.trf.xlu0 }
 0x5e9   : > { %16687 = vmatprep.subr.mxu0 %v19561_v55  ;;  %16722 = vmatmul.mubr.f32.vlgmr.msra.gmra.mrb[16].mxu1 %v9621_v34  ;;  %v19788_v62 = vand.u32 4294901760, %v10192_v4  ;;  %v19800_v34 = vand.u32 4294901760, %v10195_v30  ;;  %v10314_v18 = vand.u32 4294901760, %v10313_v0 }
 0x5ea   : > { %16728 = vmatpush3.msra.mxu1 %v19638_v51  ;;  %16724 = vmatprep.mubr.f32.mxu1 %v9631_v36  ;;  %v10852_v51 = vsel %vm7546_vm5, %v10833_v37, 0  ;;  %v10198_v36 = vsel %vm7546_vm5, %v10175_v61, 0  ;;  %v19844_v45 = vsub.f32 %v10855_v56, %v19814_v50 }
 0x5eb   : > { %16735 = vmatprep.subr.mxu1 %v19579_v63  ;;  %16677 = vmatmul.mubr.f32.gmra.mrb[16].mxu0 %v8981_v32  ;;  %v19803_v32 = vand.u32 4294901760, %v10852_v51  ;;  %v19818_v54 = vsub.f32 %v10192_v4, %v19788_v62  ;;  %v19829_v21 = vsub.f32 %v10195_v30, %v19800_v34 }
 0x5ec   : > { %16681 = vmatprep.mubr.f32.mxu0 %v19583_v1  ;;  %v10951_v37 = vand.u32 4294901760, %v19844_v45 }
 0x5ed   : > { %16725 = vmatmul.mubr.f32.gmra.mrb[18].mxu1 %v9641_v35  ;;  %v19822_v35 = vand.u32 4294901760, %v10198_v36  ;;  %v19834_v53 = vsub.f32 %v10852_v51, %v19803_v32  ;;  %v10291_v24 = vand.u32 4294901760, %v19829_v21 }
 0x5ee   : > { %16729 = vmatprep.mubr.f32.mxu1 %v19597_v7 }
 0x5ef   : > { %16682 = vmatmul.mubr.f32.vlgmr.msra.gmra.mrb[14].mxu0 %v19600_v15  ;;  %v19849_v58 = vsub.f32 %v10198_v36, %v19822_v35  ;;  %v12152_v36 = vpop.trf.xlu1 }
 0x5f0   : > { %16688 = vmatpush3.msra.mxu0 %v19561_v55  ;;  %16684 = vmatprep.mubr.f32.mxu0 %v19613_v10  ;;  %v10271_v55 = vand.u32 4294901760, %v19797_v23  ;;  %v12169_v39 = vsel %vm7546_vm5, %v12152_v36, 0 }
 0x5f1   : > { %16743 = vmatprep.subr.mxu0 %v19760_v33  ;;  %16730 = vmatmul.mubr.f32.vlgmr.msra.gmra.mrb[16].mxu1 %v19616_v26  ;;  %v10301_v11 = vand.u32 4294901760, %v19849_v58 }
 0x5f2   : > { %16736 = vmatpush3.msra.mxu1 %v19579_v63  ;;  %16732 = vmatprep.mubr.f32.mxu1 %v19630_v8  ;;  %v10281_v63 = vand.u32 4294901760, %v19818_v54  ;;  %v10272_v52 = vsub.f32 %v19797_v23, %v10271_v55 }
 0x5f3   : > { %16791 = vmatprep.subr.mxu1 %v19769_v60  ;;  %16685 = vmatmul.mubr.f32.gmra.mrb[16].mxu0 %v19635_v40  ;;  %v10302_v4 = vsub.f32 %v19849_v58, %v10301_v11 }
 0x5f4   : > { %16689 = vmatprep.mubr.f32.mxu0 %v19583_v1  ;;  %v10941_v1 = vand.u32 4294901760, %v19834_v53  ;;  %v10282_v38 = vsub.f32 %v19818_v54, %v10281_v63  ;;  %v10273_v9 = vand.u32 4294901760, %v10272_v52  ;;  %v11509_v52 = vsel %vm7546_vm5, %v11492_v16, 0 }
 0x5f5   : > { %16733 = vmatmul.mubr.f32.gmra.mrb[18].mxu1 %v19651_v20  ;;  %v10303_v56 = vand.u32 4294901760, %v10302_v4 }
 0x5f6   : > { %16737 = vmatprep.mubr.f32.mxu1 %v19597_v7  ;;  %v10932_v7 = vsub.f32 %v19810_v3, %v10931_v42  ;;  %v10942_v41 = vsub.f32 %v19834_v53, %v10941_v1  ;;  %v10283_v59 = vand.u32 4294901760, %v10282_v38 }
 0x5f7   : > { %16690 = vmatmul.mubr.f32.vlgmr.msra.gmra.mrb[14].mxu0 %v19600_v15  ;;  %v10974_v15 = vand.u32 4294901760, %v10973_v44  ;;  %v12181_v44 = vsel %vm7559_vm4, %v19708_v49, 0 }
 0x5f8   : > { %16744 = vmatpush3.msra.mxu0 %v19760_v33  ;;  %16692 = vmatprep.mubr.f32.mxu0 %v19613_v10  ;;  %v10292_v10 = vsub.f32 %v19829_v21, %v10291_v24  ;;  %v10943_v61 = vand.u32 4294901760, %v10942_v41  ;;  %v19941_v49 = vand.u32 4294901760, %v12181_v44 }
 0x5f9   : > { %16751 = vmatprep.subr.mxu0 %v10314_v18  ;;  %16738 = vmatmul.mubr.f32.vlgmr.msra.gmra.mrb[16].mxu1 %v19616_v26  ;;  %v10933_v26 = vand.u32 4294901760, %v10932_v7 }
 0x5fa   : > { %16792 = vmatpush3.msra.mxu1 %v19769_v60  ;;  %16740 = vmatprep.mubr.f32.mxu1 %v19630_v8  ;;  %v10952_v8 = vsub.f32 %v19844_v45, %v10951_v37  ;;  %v10293_v30 = vand.u32 4294901760, %v10292_v10 }
 0x5fb   : > { %16799 = vmatprep.subr.mxu1 %v10974_v15  ;;  %16693 = vmatmul.mubr.f32.gmra.mrb[16].mxu0 %v19635_v40  ;;  %v10962_v40 = vsub.f32 %v19861_v31, %v10961_v2 }
 0x5fc   : > { %16745 = vmatprep.mubr.f32.mxu0 %v10273_v9  ;;  %v10953_v51 = vand.u32 4294901760, %v10952_v8 }
 0x5fd   : > { %16741 = vmatmul.mubr.f32.gmra.mrb[18].mxu1 %v19651_v20  ;;  %v10963_v20 = vand.u32 4294901760, %v10962_v40 }
 0x5fe   : > { %16793 = vmatprep.mubr.f32.mxu1 %v10933_v26 }
 0x5ff   : > { %16746 = vmatmul.mubr.f32.vlgmr.msra.gmra.mrb[18].mxu0 %v10283_v59 }
 0x600   : > { %16752 = vmatpush3.msra.mxu0 %v10314_v18  ;;  %16748 = vmatprep.mubr.f32.mxu0 %v10293_v30  ;;  %v19932_v18 = vand.u32 4294901760, %v11521_v47 }
 0x601   : > { %16759 = vmatprep.subr.mxu0 %v19782_v29  ;;  %16794 = vmatmul.mubr.f32.vlgmr.msra.gmra.mrb[20].mxu1 %v10943_v61 }
 0x602   : > { %16800 = vmatpush3.msra.mxu1 %v10974_v15  ;;  %16796 = vmatprep.mubr.f32.mxu1 %v10953_v51 }
 0x603   : > { %16807 = vmatprep.subr.mxu1 %v19794_v46  ;;  %16749 = vmatmul.mubr.f32.gmra.mrb[20].mxu0 %v10303_v56 }
 0x604   : > { %16753 = vmatprep.mubr.f32.mxu0 %v19771_v28 }
 0x605   : > { %16797 = vmatmul.mubr.f32.gmra.mrb[22].mxu1 %v10963_v20 }
 0x606   : > { %16801 = vmatprep.mubr.f32.mxu1 %v19784_v17 }
 0x607   : > { %16754 = vmatmul.mubr.f32.vlgmr.msra.gmra.mrb[18].mxu0 %v19788_v62 }
 0x608   : > { %16760 = vmatpush3.msra.mxu0 %v19782_v29  ;;  %16756 = vmatprep.mubr.f32.mxu0 %v19800_v34  ;;  %v11493_v29 = vpop.trf.xlu0 }
 0x609   : > { %16767 = vmatprep.subr.mxu0 %v19760_v33  ;;  %16802 = vmatmul.mubr.f32.vlgmr.msra.gmra.mrb[20].mxu1 %v19803_v32 }
 0x60a   : > { %16808 = vmatpush3.msra.mxu1 %v19794_v46  ;;  %16804 = vmatprep.mubr.f32.mxu1 %v19814_v50  ;;  %v12153_v46 = vpop.trf.xlu1 }
 0x60b   : > { %16815 = vmatprep.subr.mxu1 %v19769_v60  ;;  %16757 = vmatmul.mubr.f32.gmra.mrb[20].mxu0 %v19822_v35 }
 0x60c   : > { %16761 = vmatprep.mubr.f32.mxu0 %v19797_v23  ;;  %v11494_v0 = vpop.trf.xlu0 }
 0x60d   : > { %16805 = vmatmul.mubr.f32.gmra.mrb[22].mxu1 %v19838_v5 }
 0x60e   : > { %16809 = vmatprep.mubr.f32.mxu1 %v19810_v3  ;;  %v12154_v23 = vpop.trf.xlu1  ;;  %v19943_v3 = vand.u32 4294901760, %v11509_v52 }
 0x60f   : > { %16762 = vmatmul.mubr.f32.vlgmr.msra.gmra.mrb[18].mxu0 %v19818_v54  ;;  %v11515_v54 = vsel %vm7546_vm5, %v11494_v0, 0 }
 0x610   : > { %16768 = vmatpush3.msra.mxu0 %v19760_v33  ;;  %16764 = vmatprep.mubr.f32.mxu0 %v19829_v21  ;;  %v19954_v21 = vsub.f32 %v11521_v47, %v19932_v18 }
 0x611   : > { %16775 = vmatprep.subr.mxu0 %v19807_v19  ;;  %16810 = vmatmul.mubr.f32.vlgmr.msra.gmra.mrb[20].mxu1 %v19834_v53  ;;  %v19956_v53 = vand.u32 4294901760, %v12169_v39 }
 0x612   : > { %16816 = vmatpush3.msra.mxu1 %v19769_v60  ;;  %16812 = vmatprep.mubr.f32.mxu1 %v19844_v45  ;;  %v12175_v45 = vsel %vm7546_vm5, %v12154_v23, 0 }
 0x613   : > { %16823 = vmatprep.subr.mxu1 %v19825_v14  ;;  %16765 = vmatmul.mubr.f32.gmra.mrb[20].mxu0 %v19849_v58  ;;  %v19966_v58 = vsub.f32 %v12181_v44, %v19941_v49  ;;  %v19982_v38 = vsub.f32 %v12169_v39, %v19956_v53 }
 0x614   : > { %16769 = vmatprep.mubr.f32.mxu0 %v10271_v55  ;;  %v11495_v55 = vpop.trf.xlu0 }
 0x615   : > { %16813 = vmatmul.mubr.f32.gmra.mrb[22].mxu1 %v19861_v31  ;;  %v19979_v31 = vand.u32 4294901760, %v19954_v21  ;;  %v19997_v41 = vand.u32 4294901760, %v19966_v58  ;;  %v12251_v4 = vand.u32 4294901760, %v19982_v38 }
 0x616   : > { %16817 = vmatprep.mubr.f32.mxu1 %v10931_v42 }
 0x617   : > { %16770 = vmatmul.mubr.f32.vlgmr.msra.gmra.mrb[18].mxu0 %v10281_v63  ;;  %v12155_v63 = vpop.trf.xlu1  ;;  %v11633_v59 = vsub.f32 %v19954_v21, %v19979_v31  ;;  %v12293_v40 = vsub.f32 %v19966_v58, %v19997_v41 }
 0x618   : > { %16776 = vmatpush3.msra.mxu0 %v19807_v19  ;;  %16772 = vmatprep.mubr.f32.mxu0 %v10291_v24  ;;  %v11512_v19 = vsel %vm7546_vm5, %v11493_v29, 0  ;;  %v19969_v24 = vsub.f32 %v11509_v52, %v19943_v3  ;;  %v12178_v15 = vsel %vm7546_vm5, %v12155_v63, 0 }
 0x619   : > { %16783 = vmatprep.subr.mxu0 %v19760_v33  ;;  %16818 = vmatmul.mubr.f32.vlgmr.msra.gmra.mrb[20].mxu1 %v10941_v1  ;;  %v19960_v42 = vand.u32 4294901760, %v11512_v19  ;;  %v19972_v1 = vand.u32 4294901760, %v11515_v54  ;;  %v20010_v8 = vand.u32 4294901760, %v12178_v15  ;;  %v11634_v16 = vand.u32 4294901760, %v11633_v59 }
 0x61a   : > { %16824 = vmatpush3.msra.mxu1 %v19825_v14  ;;  %16820 = vmatprep.mubr.f32.mxu1 %v10951_v37  ;;  %v12172_v14 = vsel %vm7546_vm5, %v12153_v46, 0  ;;  %v11518_v37 = vsel %vm7546_vm5, %v11495_v55, 0 }
 0x61b   : > { %16831 = vmatprep.subr.mxu1 %v19769_v60  ;;  %16773 = vmatmul.mubr.f32.gmra.mrb[20].mxu0 %v10301_v11  ;;  %v19975_v7 = vand.u32 4294901760, %v12172_v14  ;;  %v19986_v11 = vand.u32 4294901760, %v12175_v45  ;;  %v19990_v9 = vsub.f32 %v11512_v19, %v19960_v42  ;;  %v19994_v10 = vand.u32 4294901760, %v11518_v37 }
 0x61c   : > { %16777 = vmatprep.mubr.f32.mxu0 %v19771_v28  ;;  %v20033_v20 = vsub.f32 %v12178_v15, %v20010_v8 }
 0x61d   : > { %16821 = vmatmul.mubr.f32.gmra.mrb[22].mxu1 %v10961_v2  ;;  %v20001_v2 = vsub.f32 %v11515_v54, %v19972_v1  ;;  %v20006_v26 = vsub.f32 %v12172_v14, %v19975_v7  ;;  %v20016_v30 = vsub.f32 %v12175_v45, %v19986_v11  ;;  %v20021_v61 = vsub.f32 %v11518_v37, %v19994_v10 }
 0x61e   : > { %16825 = vmatprep.mubr.f32.mxu1 %v19784_v17  ;;  %v12281_v44 = vand.u32 4294901760, %v20033_v20 }
 0x61f   : > { %16778 = vmatmul.mubr.f32.vlgmr.msra.gmra.mrb[18].mxu0 %v19788_v62  ;;  %v11611_v51 = vand.u32 4294901760, %v20001_v2  ;;  %v12271_v36 = vand.u32 4294901760, %v20016_v30  ;;  %v11621_v46 = vand.u32 4294901760, %v20021_v61 }
 0x620   : > { %16784 = vmatpush3.msra.mxu0 %v19760_v33  ;;  %16780 = vmatprep.mubr.f32.mxu0 %v19800_v34  ;;  %v11591_v33 = vand.u32 4294901760, %v19969_v24  ;;  %v12282_v54 = vsub.f32 %v20033_v20, %v12281_v44 }
 0x621   : > { %16839 = vmatprep.subr.mxu0 %v19932_v18  ;;  %16826 = vmatmul.mubr.f32.vlgmr.msra.gmra.mrb[20].mxu1 %v19803_v32  ;;  %v11622_v23 = vsub.f32 %v20021_v61, %v11621_v46 }
 0x622   : > { %16832 = vmatpush3.msra.mxu1 %v19769_v60  ;;  %16828 = vmatprep.mubr.f32.mxu1 %v19814_v50  ;;  %v11601_v60 = vand.u32 4294901760, %v19990_v9  ;;  %v11592_v56 = vsub.f32 %v19969_v24, %v11591_v33 }
 0x623   : > { %16887 = vmatprep.subr.mxu1 %v19941_v49  ;;  %16781 = vmatmul.mubr.f32.gmra.mrb[20].mxu0 %v19822_v35  ;;  %v11623_v55 = vand.u32 4294901760, %v11622_v23 }
 0x624   : > { %16785 = vmatprep.mubr.f32.mxu0 %v19771_v28  ;;  %v12261_v28 = vand.u32 4294901760, %v20006_v26  ;;  %v11602_v29 = vsub.f32 %v19990_v9, %v11601_v60  ;;  %v11593_v47 = vand.u32 4294901760, %v11592_v56 }
 0x625   : > { %16829 = vmatmul.mubr.f32.gmra.mrb[22].mxu1 %v19838_v5 }
 0x626   : > { %16833 = vmatprep.mubr.f32.mxu1 %v19784_v17  ;;  %v12252_v17 = vsub.f32 %v19982_v38, %v12251_v4  ;;  %v12262_v0 = vsub.f32 %v20006_v26, %v12261_v28  ;;  %v11603_v52 = vand.u32 4294901760, %v11602_v29 }
 0x627   : > { %16786 = vmatmul.mubr.f32.vlgmr.msra.gmra.mrb[18].mxu0 %v19788_v62  ;;  %v12294_v62 = vand.u32 4294901760, %v12293_v40 }
 0x628   : > { %16840 = vmatpush3.msra.mxu0 %v19932_v18  ;;  %16788 = vmatprep.mubr.f32.mxu0 %v19800_v34  ;;  %v11612_v34 = vsub.f32 %v20001_v2, %v11611_v51  ;;  %v12263_v19 = vand.u32 4294901760, %v12262_v0 }
 0x629   : > { %16847 = vmatprep.subr.mxu0 %v11634_v16  ;;  %16834 = vmatmul.mubr.f32.vlgmr.msra.gmra.mrb[20].mxu1 %v19803_v32  ;;  %v12253_v32 = vand.u32 4294901760, %v12252_v17 }
 0x62a   : > { %16888 = vmatpush3.msra.mxu1 %v19941_v49  ;;  %16836 = vmatprep.mubr.f32.mxu1 %v19814_v50  ;;  %v12272_v50 = vsub.f32 %v20016_v30, %v12271_v36  ;;  %v11613_v39 = vand.u32 4294901760, %v11612_v34 }
 0x62b   : > { %16895 = vmatprep.subr.mxu1 %v12294_v62  ;;  %16789 = vmatmul.mubr.f32.gmra.mrb[20].mxu0 %v19822_v35 }
 0x62c   : > { %16841 = vmatprep.mubr.f32.mxu0 %v11593_v47  ;;  %v12273_v35 = vand.u32 4294901760, %v12272_v50 }
 0x62d   : > { %16837 = vmatmul.mubr.f32.gmra.mrb[22].mxu1 %v19838_v5  ;;  %v12283_v5 = vand.u32 4294901760, %v12282_v54 }
 0x62e   : > { %16889 = vmatprep.mubr.f32.mxu1 %v12253_v32 }
 0x62f   : > { %16842 = vmatmul.mubr.f32.vlgmr.msra.gmra.mrb[22].mxu0 %v11603_v52 }
 0x630   : > { %16848 = vmatpush3.msra.mxu0 %v11634_v16  ;;  %16844 = vmatprep.mubr.f32.mxu0 %v11613_v39 }
 0x631   : > { %16855 = vmatprep.subr.mxu0 %v19954_v21  ;;  %16890 = vmatmul.mubr.f32.vlgmr.msra.gmra.mrb[24].mxu1 %v12263_v19 }
 0x632   : > { %16896 = vmatpush3.msra.mxu1 %v12294_v62  ;;  %16892 = vmatprep.mubr.f32.mxu1 %v12273_v35 }
 0x633   : > { %16903 = vmatprep.subr.mxu1 %v19966_v58  ;;  %16845 = vmatmul.mubr.f32.gmra.mrb[24].mxu0 %v11623_v55 }
 0x634   : > { %16849 = vmatprep.mubr.f32.mxu0 %v19943_v3 }
 0x635   : > { %16893 = vmatmul.mubr.f32.gmra.mrb[26].mxu1 %v12283_v5 }
 0x636   : > { %16897 = vmatprep.mubr.f32.mxu1 %v19956_v53 }
 0x637   : > { %16850 = vmatmul.mubr.f32.vlgmr.msra.gmra.mrb[22].mxu0 %v19960_v42 }
 0x638   : > { %16856 = vmatpush3.msra.mxu0 %v19954_v21  ;;  %16852 = vmatprep.mubr.f32.mxu0 %v19972_v1 }
 0x639   : > { %16863 = vmatprep.subr.mxu0 %v19932_v18  ;;  %16898 = vmatmul.mubr.f32.vlgmr.msra.gmra.mrb[24].mxu1 %v19975_v7 }
 0x63a   : > { %16904 = vmatpush3.msra.mxu1 %v19966_v58  ;;  %16900 = vmatprep.mubr.f32.mxu1 %v19986_v11 }
 0x63b   : > { %16911 = vmatprep.subr.mxu1 %v19941_v49  ;;  %16853 = vmatmul.mubr.f32.gmra.mrb[24].mxu0 %v19994_v10 }
 0x63c   : > { %16857 = vmatprep.mubr.f32.mxu0 %v19969_v24 }
 0x63d   : > { %16901 = vmatmul.mubr.f32.gmra.mrb[26].mxu1 %v20010_v8 }
 0x63e   : > { %16905 = vmatprep.mubr.f32.mxu1 %v19982_v38 }
 0x63f   : > { %16858 = vmatmul.mubr.f32.vlgmr.msra.gmra.mrb[22].mxu0 %v19990_v9 }
 0x640   : > { %16864 = vmatpush3.msra.mxu0 %v19932_v18  ;;  %16860 = vmatprep.mubr.f32.mxu0 %v20001_v2 }
 0x641   : > { %16871 = vmatprep.subr.mxu0 %v19979_v31  ;;  %16906 = vmatmul.mubr.f32.vlgmr.msra.gmra.mrb[24].mxu1 %v20006_v26 }
 0x642   : > { %16912 = vmatpush3.msra.mxu1 %v19941_v49  ;;  %16908 = vmatprep.mubr.f32.mxu1 %v20016_v30 }
 0x643   : > { %16919 = vmatprep.subr.mxu1 %v19997_v41  ;;  %16861 = vmatmul.mubr.f32.gmra.mrb[24].mxu0 %v20021_v61 }
 0x644   : > { %16865 = vmatprep.mubr.f32.mxu0 %v11591_v33 }
 0x645   : > { %16909 = vmatmul.mubr.f32.gmra.mrb[26].mxu1 %v20033_v20 }
 0x646   : > { %16913 = vmatprep.mubr.f32.mxu1 %v12251_v4 }
 0x647   : > { %16866 = vmatmul.mubr.f32.vlgmr.msra.gmra.mrb[22].mxu0 %v11601_v60 }
 0x648   : > { %16872 = vmatpush3.msra.mxu0 %v19979_v31  ;;  %16868 = vmatprep.mubr.f32.mxu0 %v11611_v51 }
 0x649   : > { %16879 = vmatprep.subr.mxu0 %v19932_v18  ;;  %16914 = vmatmul.mubr.f32.vlgmr.msra.gmra.mrb[24].mxu1 %v12261_v28 }
 0x64a   : > { %16920 = vmatpush3.msra.mxu1 %v19997_v41  ;;  %16916 = vmatprep.mubr.f32.mxu1 %v12271_v36 }
 0x64b   : > { %16927 = vmatprep.subr.mxu1 %v19941_v49  ;;  %16869 = vmatmul.mubr.f32.gmra.mrb[24].mxu0 %v11621_v46 }
 0x64c   : > { %16873 = vmatprep.mubr.f32.mxu0 %v19943_v3 }
 0x64d   : > { %16917 = vmatmul.mubr.f32.gmra.mrb[26].mxu1 %v12281_v44 }
 0x64e   : > { %16921 = vmatprep.mubr.f32.mxu1 %v19956_v53 }
 0x64f   : > { %16874 = vmatmul.mubr.f32.vlgmr.msra.gmra.mrb[22].mxu0 %v19960_v42 }
 0x650   : > { %16880 = vmatpush3.msra.mxu0 %v19932_v18  ;;  %16876 = vmatprep.mubr.f32.mxu0 %v19972_v1 }
 0x651   : > { %16922 = vmatmul.mubr.f32.vlgmr.msra.gmra.mrb[24].mxu1 %v19975_v7 }
 0x652   : > { %16928 = vmatpush3.msra.mxu1 %v19941_v49  ;;  %16924 = vmatprep.mubr.f32.mxu1 %v19986_v11 }
 0x653   : > { %16877 = vmatmul.mubr.f32.gmra.mrb[24].mxu0 %v19994_v10 }
 0x654   : > { %16881 = vmatprep.mubr.f32.mxu0 %v19943_v3 }
 0x655   : > { %16925 = vmatmul.mubr.f32.gmra.mrb[26].mxu1 %v20010_v8 }
 0x656   : > { %16929 = vmatprep.mubr.f32.mxu1 %v19956_v53 }
 0x657   : > { %16882 = vmatmul.mubr.f32.vlgmr.msra.gmra.mrb[22].mxu0 %v19960_v42 }
 0x658   : > { %16884 = vmatprep.mubr.f32.mxu0 %v19972_v1 }
 0x659   : > { %16930 = vmatmul.mubr.f32.vlgmr.msra.gmra.mrb[24].mxu1 %v19975_v7 }
 0x65a   : > { %16932 = vmatprep.mubr.f32.mxu1 %v19986_v11 }
 0x65b   : > { %16885 = vmatmul.mubr.f32.gmra.mrb[24].mxu0 %v19994_v10 }
 0x65d   : > { %16933 = vmatmul.mubr.f32.gmra.mrb[26].mxu1 %v20010_v8 }
 0x69a   : > { %v16595_v18 = vpop.f32.mrb[10].mxu0 }
 0x69b   : > { %v8139_v49 = vand.u32 2147483647, %v16595_v18  ;;  %v8116_v21 = vpop.f32.mrb[11].mxu0 }
 0x69c   : > { %v8138_v3 = vand.u32 2147483647, %v8116_v21  ;;  %v16643_v14 = vpop.f32.mrb[12].mxu1 }
 0x69d   : > { %v8143_v45 = vsel %vm2627_vm3, %v8139_v49, -inf  ;;  %v8799_v53 = vand.u32 2147483647, %v16643_v14  ;;  %v8776_v63 = vpop.f32.mrb[13].mxu1 }
 0x69e   : > { %v8142_v42 = vsel %vm2627_vm3, %v8138_v3, -inf  ;;  %v8798_v58 = vand.u32 2147483647, %v8776_v63  ;;  %v16598_v24 = vpop.f32.mrb[12].mxu0 }
 0x69f   : > { %v8146_v1 = vmax.f32 %v8142_v42, %v8143_v45  ;;  %v8803_v37 = vsel %vm2627_vm3, %v8799_v53, -inf  ;;  %v8141_v7 = vand.u32 2147483647, %v16598_v24  ;;  %v8128_v31 = vpop.f32.mrb[13].mxu0 }
 0x6a0   : > { %v8802_v38 = vsel %vm2627_vm3, %v8798_v58, -inf  ;;  %v8140_v11 = vand.u32 2147483647, %v8128_v31  ;;  %v16646_v15 = vpop.f32.mrb[14].mxu1  ;;  %v12782_v31 = vld [vmem:[%s20640_s8 + $0x8] sm:$0xff] }
 0x6a1   : > { %v8806_v9 = vmax.f32 %v8802_v38, %v8803_v37  ;;  %v8145_v10 = vsel %vm2627_vm3, %v8141_v7, -inf  ;;  %v8801_v41 = vand.u32 2147483647, %v16646_v15  ;;  %v8788_v33 = vpop.f32.mrb[15].mxu1  ;;  %v12781_v7 = vld [vmem:[%s20640_s8] sm:$0xff]  ;;  %v12783_v38 = vld [vmem:[%s20640_s8 + $0x10] sm:$0xff] }
 0x6a2   : > { %v8144_v2 = vsel %vm2627_vm3, %v8140_v11, -inf  ;;  %v8800_v26 = vand.u32 2147483647, %v8788_v33 }
 0x6a3   : > { %v8147_v8 = vmax.f32 %v8144_v2, %v8145_v10  ;;  %v8805_v59 = vsel %vm2627_vm3, %v8801_v41, -inf  ;;  %v12843_v10 = vand.u32 4294901760, %v12782_v31  ;;  %v12784_v41 = vld [vmem:[%s20640_s8 + $0x18] sm:$0xff]  ;;  %v12846_v2 = vand.u32 4294901760, %v12783_v38 }
 0x6a4   : > { %v8804_v4 = vsel %vm2627_vm3, %v8800_v26, -inf  ;;  %v12849_v26 = vand.u32 4294901760, %v12784_v41 }
 0x6a5   : > { %v8148_v30 = vmax.f32 %v8146_v1, %v8147_v8  ;;  %v8807_v60 = vmax.f32 %v8804_v4, %v8805_v59 }
 0x6a7   : > { %v8149_v61 = vrot.slane %v8148_v30, 4  ;;  %v8808_v40 = vmax.f32 %v8806_v9, %v8807_v60  ;;  %v12840_v9 = vand.u32 4294901760, %v12781_v7  ;;  %v20155_v60 = vpack.c.bf16 %v12849_v26, %v12846_v2 }
 0x6a9   : > { %v8150_v51 = vmax.f32 %v8148_v30, %v8149_v61  ;;  %v8809_v56 = vrot.slane %v8808_v40, 4  ;;  %v20151_v4 = vpack.c.bf16 %v12843_v10, %v12840_v9  ;;  %v20153_v30 = vsub.f32 %v12781_v7, %v12840_v9 }
 0x6aa   : > { %v20157_v61 = vsub.f32 %v12782_v31, %v12843_v10 }
 0x6ab   : > { %v8151_v28 = vrot.slane %v8150_v51, 2  ;;  %v8810_v20 = vmax.f32 %v8808_v40, %v8809_v56  ;;  %17566 = vmatprep.subr.bf16.mxu0 %v20151_v4  ;;  %v12931_v56 = vand.u32 4294901760, %v20153_v30  ;;  %17614 = vmatprep.subr.bf16.mxu1 %v20151_v4 }
 0x6ac   : > { %17568 = vmatpush3.bf16.msra.mxu0 %v20151_v4  ;;  %17616 = vmatpush3.bf16.msra.mxu1 %v20151_v4 }
 0x6ad   : > { %v8152_v16 = vmax.f32 %v8150_v51, %v8151_v28  ;;  %v8811_v36 = vrot.slane %v8810_v20, 2  ;;  %v12938_v28 = vand.u32 4294901760, %v20157_v61  ;;  %17570 = vmatprep.subr.bf16.mxu0 %v20155_v60  ;;  %17618 = vmatprep.subr.bf16.mxu1 %v20155_v60 }
 0x6af   : > { %v8153_v17 = vrot.slane %v8152_v16, 1  ;;  %v8812_v29 = vmax.f32 %v8810_v20, %v8811_v36  ;;  %v12932_v36 = vsub.f32 %v20153_v30, %v12931_v56 }
 0x6b0   : > { %17572 = vmatpush3.bf16.msra.mxu0 %v20155_v60  ;;  %17620 = vmatpush3.bf16.msra.mxu1 %v20155_v60 }
 0x6b1   : > { %v8154_v46 = vmax.f32 %v8152_v16, %v8153_v17  ;;  %v8813_v62 = vrot.slane %v8812_v29, 1  ;;  %v12939_v17 = vsub.f32 %v20157_v61, %v12938_v28 }
 0x6b3   : > { %18174 = vrcp.f32 %v8154_v46  ;;  %v8814_v47 = vmax.f32 %v8812_v29, %v8813_v62  ;;  %v12933_v62 = vand.u32 4294901760, %v12932_v36 }
 0x6b5   : > { %18176 = vrcp.f32 %v8814_v47  ;;  %v12940_v47 = vand.u32 4294901760, %v12939_v17 }
 0x6bd   : > { %v18175_v34 = vpop.eup %18174 }
 0x6be   : > { %v8158_v0 = vmul.f32 %v18175_v34, %v19534_v57 }
 0x6bf   : > { %v18177_v44 = vpop.eup %18176 }
 0x6c0   : > { %8160 = vst.msk [vmem:[#allocation2] sm:$0x3] %vm8159_vm6, %v8158_v0  ;;  %v8818_v32 = vmul.f32 %v18177_v44, %v19538_v48  ;;  %v20175_v44 = vpack.c.bf16 %v12940_v47, %v12933_v62  ;;  %v20214_v62 = vpack.c.bf16 %v12938_v28, %v12931_v56 }
 0x6c2   : > { %8820 = vst.msk [vmem:[#allocation2 + $0x2] sm:$0x3] %vm8159_vm6, %v8818_v32  ;;  %17574 = vmatprep.subr.bf16.mxu0 %v20175_v44  ;;  %17622 = vmatprep.subr.bf16.mxu1 %v20175_v44 }
 0x6ca   : > { %v16691_v50 = vpop.f32.mrb[14].mxu0 }
 0x6cb   : > { %v9459_v52 = vand.u32 2147483647, %v16691_v50  ;;  %v9436_v23 = vpop.f32.mrb[15].mxu0 }
 0x6cc   : > { %v9458_v39 = vand.u32 2147483647, %v9436_v23  ;;  %v16739_v19 = vpop.f32.mrb[16].mxu1 }
 0x6cd   : > { %v9463_v54 = vsel %vm2627_vm3, %v9459_v52, -inf  ;;  %v10119_v35 = vand.u32 2147483647, %v16739_v19  ;;  %v10096_v55 = vpop.f32.mrb[17].mxu1  ;;  %v12944_v19 = vsub.f32 %v12783_v38, %v12846_v2 }
 0x6ce   : > { %v9462_v5 = vsel %vm2627_vm3, %v9458_v39, -inf  ;;  %v10118_v57 = vand.u32 2147483647, %v10096_v55  ;;  %v16694_v18 = vpop.f32.mrb[16].mxu0 }
 0x6cf   : > { %v9466_v49 = vmax.f32 %v9462_v5, %v9463_v54  ;;  %v10123_v48 = vsel %vm2627_vm3, %v10119_v35, -inf  ;;  %v9461_v21 = vand.u32 2147483647, %v16694_v18  ;;  %v9448_v3 = vpop.f32.mrb[17].mxu0  ;;  %v12951_v54 = vsub.f32 %v12784_v41, %v12849_v26 }
 0x6d0   : > { %v10122_v14 = vsel %vm2627_vm3, %v10118_v57, -inf  ;;  %v9460_v45 = vand.u32 2147483647, %v9448_v3  ;;  %v16742_v53 = vpop.f32.mrb[18].mxu1  ;;  %v12945_v5 = vand.u32 4294901760, %v12944_v19  ;;  %v20184_v3 = vpack.c.bf16 %v20157_v61, %v20153_v30 }
 0x6d1   : > { %v10126_v63 = vmax.f32 %v10122_v14, %v10123_v48  ;;  %v9465_v42 = vsel %vm2627_vm3, %v9461_v21, -inf  ;;  %v10121_v58 = vand.u32 2147483647, %v16742_v53  ;;  %v10108_v24 = vpop.f32.mrb[19].mxu1  ;;  %v12952_v57 = vand.u32 4294901760, %v12951_v54 }
 0x6d2   : > { %v9464_v1 = vsel %vm2627_vm3, %v9460_v45, -inf  ;;  %v10120_v37 = vand.u32 2147483647, %v10108_v24  ;;  %v12946_v48 = vsub.f32 %v12944_v19, %v12945_v5 }
 0x6d3   : > { %v9467_v11 = vmax.f32 %v9464_v1, %v9465_v42  ;;  %v10125_v15 = vsel %vm2627_vm3, %v10121_v58, -inf  ;;  %v12953_v21 = vsub.f32 %v12951_v54, %v12952_v57  ;;  %v20193_v42 = vld [vmem:[#allocation2] sm:$0x3]  ;;  %v20225_v61 = vpack.c.bf16 %v12952_v57, %v12945_v5 }
 0x6d4   : > { %v10124_v33 = vsel %vm2627_vm3, %v10120_v37, -inf  ;;  %v12947_v14 = vand.u32 4294901760, %v12946_v48 }
 0x6d5   : > { %v9468_v8 = vmax.f32 %v9466_v49, %v9467_v11  ;;  %v10127_v59 = vmax.f32 %v10124_v33, %v10125_v15  ;;  %v12954_v45 = vand.u32 4294901760, %v12953_v21 }
 0x6d7   : > { %v9469_v40 = vrot.slane %v9468_v8, 4  ;;  %v10128_v51 = vmax.f32 %v10126_v63, %v10127_v59  ;;  %v20187_v53 = vpack.c.bf16 %v12954_v45, %v12947_v14  ;;  %v20191_v63 = vld [vmem:[#allocation2 + $0x2] sm:$0x3] }
 0x6d9   : > { %v9470_v20 = vmax.f32 %v9468_v8, %v9469_v40  ;;  %v10129_v16 = vrot.slane %v10128_v51, 4 }
 0x6db   : > { %v9471_v29 = vrot.slane %v9470_v20, 2  ;;  %v10130_v46 = vmax.f32 %v10128_v51, %v10129_v16 }
 0x6dd   : > { %v9472_v34 = vmax.f32 %v9470_v20, %v9471_v29  ;;  %v10131_v0 = vrot.slane %v10130_v46, 2 }
 0x6df   : > { %v9473_v32 = vrot.slane %v9472_v34, 1  ;;  %v10132_v50 = vmax.f32 %v10130_v46, %v10131_v0 }
 0x6e1   : > { %v9474_v52 = vmax.f32 %v9472_v34, %v9473_v32  ;;  %v10133_v23 = vrot.slane %v10132_v50, 1 }
 0x6e3   : > { %18178 = vrcp.f32 %v9474_v52  ;;  %v10134_v39 = vmax.f32 %v10132_v50, %v10133_v23 }
 0x6e5   : > { %18180 = vrcp.f32 %v10134_v39 }
 0x6ed   : > { %v18179_v35 = vpop.eup %18178 }
 0x6ee   : > { %v9478_v55 = vmul.f32 %v18179_v35, %v19544_v12  ;;  %v20189_v12 = vpack.c.bf16 %v12951_v54, %v12944_v19 }
 0x6ef   : > { %v18181_v18 = vpop.eup %18180 }
 0x6f0   : > { %9480 = vst.msk [vmem:[#allocation2 + $0x4] sm:$0x3] %vm8159_vm6, %v9478_v55  ;;  %v10138_v49 = vmul.f32 %v18181_v18, %v19550_v27  ;;  %v12801_v27 = vcombine.low %v20193_v42, %v20191_v63 }
 0x6f2   : > { %10140 = vst.msk [vmem:[#allocation2 + $0x6] sm:$0x3] %vm8159_vm6, %v10138_v49  ;;  %v12809_v15 = vrot.slane %v12801_v27, %v18632_v25 }
 0x6f7   : > { %v20197_v58 = vld [vmem:[#allocation2 + $0x4] sm:$0x3] }
 0x6f9   : > { %v20199_v24 = vld [vmem:[#allocation2 + $0x6] sm:$0x3] }
 0x6fa   : > { %v16787_v1 = vpop.f32.mrb[18].mxu0  ;;  %v12802_v37 = vcombine.low %v20197_v58, %v20199_v24 }
 0x6fb   : > { %v10779_v7 = vand.u32 2147483647, %v16787_v1  ;;  %v10756_v31 = vpop.f32.mrb[19].mxu0 }
 0x6fc   : > { %v10778_v38 = vand.u32 2147483647, %v10756_v31  ;;  %v16835_v11 = vpop.f32.mrb[20].mxu1  ;;  %v12816_v9 = vrot.slane %v12802_v37, %v18632_v25 }
 0x6fd   : > { %v10783_v10 = vsel %vm2627_vm3, %v10779_v7, -inf  ;;  %v11439_v41 = vand.u32 2147483647, %v16835_v11  ;;  %v11416_v33 = vpop.f32.mrb[21].mxu1 }
 0x6fe   : > { %v10782_v2 = vsel %vm2627_vm3, %v10778_v38, -inf  ;;  %v11438_v26 = vand.u32 2147483647, %v11416_v33  ;;  %v16790_v8 = vpop.f32.mrb[20].mxu0  ;;  %v12817_v59 = vcombine.low %v12809_v15, %v12816_v9 }
 0x6ff   : > { %v10786_v40 = vmax.f32 %v10782_v2, %v10783_v10  ;;  %v11443_v51 = vsel %vm2627_vm3, %v11439_v41, -inf  ;;  %v10781_v20 = vand.u32 2147483647, %v16790_v8  ;;  %v10768_v16 = vpop.f32.mrb[21].mxu0 }
 0x700   : > { %v11442_v36 = vsel %vm2627_vm3, %v11438_v26, -inf  ;;  %v10780_v17 = vand.u32 2147483647, %v10768_v16  ;;  %v16838_v29 = vpop.f32.mrb[22].mxu1  ;;  %v12835_v46 = vsel %vm2627_vm3, %v12817_v59, 0 }
 0x701   : > { %v11446_v47 = vmax.f32 %v11442_v36, %v11443_v51  ;;  %v10785_v34 = vsel %vm2627_vm3, %v10781_v20, -inf  ;;  %v11441_v0 = vand.u32 2147483647, %v16838_v29  ;;  %v11428_v32 = vpop.f32.mrb[23].mxu1  ;;  %v20217_v50 = vand.u32 4294901760, %v12835_v46 }
 0x702   : > { %v10784_v52 = vsel %vm2627_vm3, %v10780_v17, -inf  ;;  %v11440_v23 = vand.u32 2147483647, %v11428_v32 }
 0x703   : > { %v10787_v39 = vmax.f32 %v10784_v52, %v10785_v34  ;;  %v11445_v19 = vsel %vm2627_vm3, %v11441_v0, -inf  ;;  %v20222_v54 = vsub.f32 %v12835_v46, %v20217_v50 }
 0x704   : > { %v11444_v30 = vsel %vm2627_vm3, %v11440_v23, -inf }
 0x705   : > { %v10788_v56 = vmax.f32 %v10786_v40, %v10787_v39  ;;  %v11447_v28 = vmax.f32 %v11444_v30, %v11445_v19  ;;  %v12910_v35 = vand.u32 4294901760, %v20222_v54 }
 0x707   : > { %v10789_v55 = vrot.slane %v10788_v56, 4  ;;  %v11448_v18 = vmax.f32 %v11446_v47, %v11447_v28  ;;  %v12911_v49 = vsub.f32 %v20222_v54, %v12910_v35 }
 0x709   : > { %v10790_v48 = vmax.f32 %v10788_v56, %v10789_v55  ;;  %v11449_v21 = vrot.slane %v11448_v18, 4  ;;  %v12912_v14 = vand.u32 4294901760, %v12911_v49 }
 0x70b   : > { %v10791_v45 = vrot.slane %v10790_v48, 2  ;;  %v11450_v27 = vmax.f32 %v11448_v18, %v11449_v21  ;;  %16943 = vmatprep.mubr.f32.mxu0 %v12912_v14 }
 0x70d   : > { %v10792_v1 = vmax.f32 %v10790_v48, %v10791_v45  ;;  %v11451_v37 = vrot.slane %v11450_v27, 2 }
 0x70f   : > { %v10793_v5 = vrot.slane %v10792_v1, 1  ;;  %v11452_v57 = vmax.f32 %v11450_v27, %v11451_v37 }
 0x711   : > { %v10794_v7 = vmax.f32 %v10792_v1, %v10793_v5  ;;  %v11453_v31 = vrot.slane %v11452_v57, 1 }
 0x713   : > { %18182 = vrcp.f32 %v10794_v7  ;;  %v11454_v38 = vmax.f32 %v11452_v57, %v11453_v31 }
 0x715   : > { %18184 = vrcp.f32 %v11454_v38 }
 0x71d   : > { %v18183_v11 = vpop.eup %18182 }
 0x71e   : > { %v10798_v15 = vmul.f32 %v18183_v11, %v19507_v6 }
 0x71f   : > { %v18185_v9 = vpop.eup %18184 }
 0x720   : > { %10800 = vst.msk [vmem:[#allocation2 + $0x8] sm:$0x3] %vm8159_vm6, %v10798_v15  ;;  %v11458_v10 = vmul.f32 %v18185_v9, %v19516_v22 }
 0x722   : > { %11460 = vst.msk [vmem:[#allocation2 + $0xa] sm:$0x3] %vm8159_vm6, %v11458_v10 }
 0x72a   : > { %v16883_v41 = vpop.f32.mrb[22].mxu0 }
 0x72b   : > { %v12099_v33 = vand.u32 2147483647, %v16883_v41  ;;  %v12076_v2 = vpop.f32.mrb[23].mxu0  ;;  %v12790_v41 = vld [vmem:[#allocation2 + $0xa] sm:$0x3] }
 0x72c   : > { %v12098_v26 = vand.u32 2147483647, %v12076_v2  ;;  %v16931_v8 = vpop.f32.mrb[24].mxu1 }
 0x72d   : > { %v12103_v59 = vsel %vm2627_vm3, %v12099_v33, -inf  ;;  %v12759_v40 = vand.u32 2147483647, %v16931_v8  ;;  %v12736_v51 = vpop.f32.mrb[25].mxu1  ;;  %v12789_v33 = vld [vmem:[#allocation2 + $0x8] sm:$0x3] }
 0x72e   : > { %v12102_v20 = vsel %vm2627_vm3, %v12098_v26, -inf  ;;  %v12758_v16 = vand.u32 2147483647, %v12736_v51  ;;  %v16886_v6 = vpop.f32.mrb[24].mxu0  ;;  %v12818_v2 = vcombine.low %v12789_v33, %v12790_v41 }
 0x72f   : > { %v12106_v36 = vmax.f32 %v12102_v20, %v12103_v59  ;;  %v12763_v17 = vsel %vm2627_vm3, %v12759_v40, -inf  ;;  %v12101_v29 = vand.u32 2147483647, %v16886_v6  ;;  %v12088_v22 = vpop.f32.mrb[25].mxu0 }
 0x730   : > { %v12762_v46 = vsel %vm2627_vm3, %v12758_v16, -inf  ;;  %v12100_v47 = vand.u32 2147483647, %v12088_v22  ;;  %v16934_v34 = vpop.f32.mrb[26].mxu1  ;;  %v12826_v40 = vrot.slane %v12818_v2, %v18632_v25 }
 0x731   : > { %v12766_v0 = vmax.f32 %v12762_v46, %v12763_v17  ;;  %v12105_v32 = vsel %vm2627_vm3, %v12101_v29, -inf  ;;  %v12761_v52 = vand.u32 2147483647, %v16934_v34  ;;  %v12748_v23 = vpop.f32.mrb[27].mxu1 }
 0x732   : > { %v12104_v39 = vsel %vm2627_vm3, %v12100_v47, -inf  ;;  %v12760_v19 = vand.u32 2147483647, %v12748_v23 }
 0x733   : > { %v12107_v30 = vmax.f32 %v12104_v39, %v12105_v32  ;;  %v12765_v56 = vsel %vm2627_vm3, %v12761_v52, -inf }
 0x734   : > { %v12764_v28 = vsel %vm2627_vm3, %v12760_v19, -inf }
 0x735   : > { %v12108_v55 = vmax.f32 %v12106_v36, %v12107_v30  ;;  %v12767_v18 = vmax.f32 %v12764_v28, %v12765_v56 }
 0x737   : > { %v12109_v49 = vrot.slane %v12108_v55, 4  ;;  %v12768_v48 = vmax.f32 %v12766_v0, %v12767_v18 }
 0x739   : > { %v12110_v21 = vmax.f32 %v12108_v55, %v12109_v49  ;;  %v12769_v14 = vrot.slane %v12768_v48, 4 }
 0x73b   : > { %v12111_v45 = vrot.slane %v12110_v21, 2  ;;  %v12770_v27 = vmax.f32 %v12768_v48, %v12769_v14 }
 0x73d   : > { %v12112_v1 = vmax.f32 %v12110_v21, %v12111_v45  ;;  %v12771_v37 = vrot.slane %v12770_v27, 2 }
 0x73f   : > { %v12113_v5 = vrot.slane %v12112_v1, 1  ;;  %v12772_v57 = vmax.f32 %v12770_v27, %v12771_v37 }
 0x741   : > { %v12114_v7 = vmax.f32 %v12112_v1, %v12113_v5  ;;  %v12773_v31 = vrot.slane %v12772_v57, 1 }
 0x743   : > { %18186 = vrcp.f32 %v12114_v7  ;;  %v12774_v38 = vmax.f32 %v12772_v57, %v12773_v31 }
 0x745   : > { %18188 = vrcp.f32 %v12774_v38 }
 0x74d   : > { %v18187_v11 = vpop.eup %18186 }
 0x74e   : > { %v12118_v15 = vmul.f32 %v18187_v11, %v19520_v43 }
 0x74f   : > { %v18189_v9 = vpop.eup %18188 }
 0x750   : > { %12120 = vst.msk [vmem:[#allocation2 + $0xc] sm:$0x3] %vm8159_vm6, %v12118_v15  ;;  %v12778_v10 = vmul.f32 %v18189_v9, %v19525_v13 }
 0x752   : > { %12780 = vst.msk [vmem:[#allocation2 + $0xe] sm:$0x3] %vm8159_vm6, %v12778_v10  ;;  %14817 = vst.msk [vmem:[%s18520_s29] sm:$0x3] %vm8159_vm6, %v12778_v10  ;;  %s20641_s29 = sld [smem:[#allocation9_spill]] }
 0x757   : > { %v12791_v26 = vld [vmem:[#allocation2 + $0xc] sm:$0x3] }
 0x758   : > { %s20642_s19 = scalar_lea.vmem %s20641_s29, %s18451_s0 }
 0x759   : > { %v12792_v8 = vld [vmem:[#allocation2 + $0xe] sm:$0x3] }
 0x75a   : > { %v12819_v59 = vcombine.low %v12791_v26, %v12792_v8 }
 0x75c   : > { %v12833_v51 = vrot.slane %v12819_v59, %v18632_v25 }
 0x75e   : > { %v12834_v43 = vcombine.low %v12826_v40, %v12833_v51 }
 0x760   : > { %v12837_v20 = vsel %vm2627_vm3, %v12834_v43, 0 }
 0x761   : > { %v12918_v16 = vand.u32 4294901760, %v12837_v20 }
 0x763   : > { %v12919_v6 = vsub.f32 %v12837_v20, %v12918_v16 }
 0x765   : > { %v12920_v13 = vand.u32 4294901760, %v12919_v6 }
 0x767   : > { %v12921_v36 = vsub.f32 %v12919_v6, %v12920_v13 }
 0x769   : > { %v12922_v17 = vand.u32 4294901760, %v12921_v36 }
 0x76b   : > { %16944 = vmatmul.mubr.f32.vlgmr.msra.gmra.mrb[26].mxu0 %v12922_v17 }
 0x76c   : > { %17576 = vmatpush3.bf16.msra.mxu0 %v20175_v44  ;;  %16954 = vmatprep.mubr.f32.mxu0 %v20217_v50 }
 0x76d   : > { %17578 = vmatprep.subr.bf16.mxu0 %v20187_v53 }
 0x770   : > { %17580 = vmatpush3.bf16.msra.mxu0 %v20187_v53 }
 0x771   : > { %17582 = vmatprep.subr.bf16.mxu0 %v20184_v3 }
 0x773   : > { %16955 = vmatmul.mubr.f32.vlgmr.msra.gmra.mrb[26].mxu0 %v12918_v16 }
 0x774   : > { %17584 = vmatpush3.bf16.msra.mxu0 %v20184_v3  ;;  %16965 = vmatprep.mubr.f32.mxu0 %v20222_v54 }
 0x775   : > { %17586 = vmatprep.subr.bf16.mxu0 %v20189_v12 }
 0x778   : > { %17588 = vmatpush3.bf16.msra.mxu0 %v20189_v12 }
 0x779   : > { %17590 = vmatprep.subr.bf16.mxu0 %v20151_v4 }
 0x77b   : > { %16966 = vmatmul.mubr.f32.vlgmr.msra.gmra.mrb[26].mxu0 %v12919_v6 }
 0x77c   : > { %17592 = vmatpush3.bf16.msra.mxu0 %v20151_v4  ;;  %16976 = vmatprep.mubr.f32.mxu0 %v12910_v35 }
 0x77d   : > { %17594 = vmatprep.subr.bf16.mxu0 %v20155_v60 }
 0x780   : > { %17596 = vmatpush3.bf16.msra.mxu0 %v20155_v60 }
 0x781   : > { %17598 = vmatprep.subr.bf16.mxu0 %v20214_v62 }
 0x783   : > { %16977 = vmatmul.mubr.f32.vlgmr.msra.gmra.mrb[26].mxu0 %v12920_v13 }
 0x784   : > { %17600 = vmatpush3.bf16.msra.mxu0 %v20214_v62  ;;  %16987 = vmatprep.mubr.f32.mxu0 %v20217_v50 }
 0x785   : > { %17602 = vmatprep.subr.bf16.mxu0 %v20225_v61 }
 0x788   : > { %17604 = vmatpush3.bf16.msra.mxu0 %v20225_v61 }
 0x789   : > { %17606 = vmatprep.subr.bf16.mxu0 %v20151_v4 }
 0x78b   : > { %16988 = vmatmul.mubr.f32.vlgmr.msra.gmra.mrb[26].mxu0 %v12918_v16 }
 0x78c   : > { %17608 = vmatpush3.bf16.msra.mxu0 %v20151_v4  ;;  %16998 = vmatprep.mubr.f32.mxu0 %v20217_v50 }
 0x78d   : > { %17610 = vmatprep.subr.bf16.mxu0 %v20155_v60 }
 0x790   : > { %17612 = vmatpush3.bf16.msra.mxu0 %v20155_v60 }
 0x793   : > { %16999 = vmatmul.mubr.f32.vlgmr.msra.gmra.mrb[26].mxu0 %v12918_v16  ;;  %v14166_v16 = vld [vmem:[%s18514_s27 + $0x18] sm:$0xff] }
 0x794   : > { %v14239_v13 = vand.u32 4294901760, %v14166_v16 }
 0x866   : > { %v17000_v54 = vpop.f32.mrb[26].mxu0 }
 0x867   : > { %v13386_v35 = vcombine.high %v17000_v54, %v17000_v54  ;;  %v13393_v29 = vrot.slane %v17000_v54, %v18632_v25  ;;  %v13357_v22 = vpop.f32.mrb[27].mxu0 }
 0x868   : > { %v13369_v46 = vcombine.high %v13357_v22, %v13357_v22  ;;  %v13376_v47 = vrot.slane %v13357_v22, %v18632_v25 }
 0x869   : > { %v13400_v34 = vrot.slane %v13386_v35, %v18632_v25  ;;  %v13401_v0 = vcombine.high %v13393_v29, %v13393_v29  ;;  %v20280_v32 = vsub.f32 %v12789_v33, %v13393_v29  ;;  %v14341_v29 = vsub.f32 %v14166_v16, %v14239_v13 }
 0x86a   : > { %v13383_v50 = vrot.slane %v13369_v46, %v18632_v25  ;;  %v13384_v52 = vcombine.high %v13376_v47, %v13376_v47  ;;  %v20284_v23 = vsub.f32 %v20193_v42, %v13376_v47 }
 0x86b   : > { %v13402_v39 = vcombine.high %v13400_v34, %v13400_v34  ;;  %v20286_v19 = vsub.f32 %v12790_v41, %v13401_v0  ;;  %v20288_v30 = vsub.f32 %v12791_v26, %v13400_v34  ;;  %v13423_v49 = vmul.f32 %v20280_v32, %v20280_v32 }
 0x86c   : > { %v13385_v56 = vcombine.high %v13383_v50, %v13383_v50  ;;  %v20291_v28 = vsub.f32 %v20191_v63, %v13384_v52  ;;  %v20294_v55 = vsub.f32 %v20197_v58, %v13383_v50  ;;  %v13419_v21 = vmul.f32 %v20284_v23, %v20284_v23 }
 0x86d   : > { %v20296_v18 = vsub.f32 %v12792_v8, %v13402_v39  ;;  %v13424_v42 = vmul.f32 %v20286_v19, %v20286_v19  ;;  %v13425_v58 = vmul.f32 %v20288_v30, %v20288_v30  ;;  %v14342_v34 = vand.u32 4294901760, %v14341_v29 }
 0x86e   : > { %v20303_v48 = vsub.f32 %v20199_v24, %v13385_v56  ;;  %v13420_v63 = vmul.f32 %v20291_v28, %v20291_v28  ;;  %v13421_v27 = vmul.f32 %v20294_v55, %v20294_v55 }
 0x86f   : > { %v13426_v14 = vmul.f32 %v20296_v18, %v20296_v18  ;;  %v13452_v45 = vcombine.low %v13423_v49, %v13424_v42  ;;  %v14343_v39 = vsub.f32 %v14341_v29, %v14342_v34 }
 0x870   : > { %v13422_v24 = vmul.f32 %v20303_v48, %v20303_v48  ;;  %v13435_v1 = vcombine.low %v13419_v21, %v13420_v63 }
 0x871   : > { %v13453_v37 = vcombine.low %v13425_v58, %v13426_v14  ;;  %v13460_v57 = vrot.slane %v13452_v45, %v18632_v25  ;;  %v14344_v21 = vand.u32 4294901760, %v14343_v39 }
 0x872   : > { %v13436_v5 = vcombine.low %v13421_v27, %v13422_v24  ;;  %v13443_v31 = vrot.slane %v13435_v1, %v18632_v25  ;;  %v15202_v27 = vld [vmem:[%s20642_s19] ss:$0 sm:$0xff] }
 0x873   : > { %v13467_v7 = vrot.slane %v13453_v37, %v18632_v25  ;;  %v2051_v24 = vcombine.low %v15202_v27, %v15202_v27 }
 0x874   : > { %v13450_v38 = vrot.slane %v13436_v5, %v18632_v25  ;;  %v20643_v5 = vld [vmem:[#allocation39_spill] sm:$0xff] }
 0x875   : > { %v13468_v11 = vcombine.low %v13460_v57, %v13467_v7  ;;  %v2058_v1 = vrot.slane %v2051_v24, %v18632_v25 }
 0x876   : > { %v13451_v15 = vcombine.low %v13443_v31, %v13450_v38  ;;  %v20644_v31 = vld [vmem:[#allocation40_spill] sm:$0xff] }
 0x877   : > { %v13471_v9 = vsel %vm2627_vm3, %v13468_v11, 0  ;;  %v2059_v37 = vcombine.low %v2058_v1, %v2058_v1 }
 0x878   : > { %v13552_v10 = vand.u32 4294901760, %v13471_v9  ;;  %v13469_v41 = vsel %vm2627_vm3, %v13451_v15, 0 }
 0x879   : > { %v13542_v33 = vand.u32 4294901760, %v13469_v41  ;;  %v17711_v57 = vadd.f32 %v20643_v5, %v2059_v37  ;;  %v17712_v38 = vadd.f32 %v20644_v31, %v2059_v37 }
 0x87a   : > { %v13553_v2 = vsub.f32 %v13471_v9, %v13552_v10 }
 0x87b   : > { %v13543_v26 = vsub.f32 %v13469_v41, %v13542_v33  ;;  %v2582_v7 = vcombine.high %v17711_v57, %v17711_v57  ;;  %v20374_v11 = vrot.slane %v17711_v57, %v18632_v25  ;;  %v20380_v9 = vrot.slane %v17712_v38, %v18632_v25 }
 0x87c   : > { %v13554_v8 = vand.u32 4294901760, %v13553_v2 }
 0x87d   : > { %v13544_v59 = vand.u32 4294901760, %v13543_v26  ;;  %v20377_v15 = vrot.slane %v2582_v7, %v18632_v25 }
 0x87e   : > { %v13555_v40 = vsub.f32 %v13553_v2, %v13554_v8 }
 0x87f   : > { %v13545_v51 = vsub.f32 %v13543_v26, %v13544_v59  ;;  %v20388_v41 = vcombine.high %v20377_v15, %v20377_v15 }
 0x880   : > { %v13556_v20 = vand.u32 4294901760, %v13555_v40  ;;  %v2565_v40 = vcombine.high %v17712_v38, %v17712_v38 }
 0x881   : > { %v13546_v43 = vand.u32 4294901760, %v13545_v51 }
 0x882   : > { %v20396_v51 = vrot.slane %v2565_v40, %v18632_v25 }
 0x883   : > { %17009 = vmatprep.mubr.f32.mxu1 %v13546_v43  ;;  %v20400_v43 = vcombine.high %v20380_v9, %v20380_v9 }
 0x884   : > { %17010 = vmatmul.mubr.f32.vlgmr.msra.gmra.mrb[28].mxu1 %v13556_v20  ;;  %v20404_v20 = vcombine.high %v20396_v51, %v20396_v51 }
 0x885   : > { %17624 = vmatpush3.bf16.msra.mxu1 %v20175_v44  ;;  %17020 = vmatprep.mubr.f32.mxu1 %v13542_v33  ;;  %v14163_v44 = vld [vmem:[%s18514_s27] sm:$0xff] }
 0x886   : > { %17626 = vmatprep.subr.bf16.mxu1 %v20187_v53 }
 0x889   : > { %17628 = vmatpush3.bf16.msra.mxu1 %v20187_v53  ;;  %v14165_v53 = vld [vmem:[%s18514_s27 + $0x10] sm:$0xff] }
 0x88a   : > { %17630 = vmatprep.subr.bf16.mxu1 %v20184_v3  ;;  %v14236_v6 = vand.u32 4294901760, %v14165_v53 }
 0x88c   : > { %17021 = vmatmul.mubr.f32.vlgmr.msra.gmra.mrb[28].mxu1 %v13552_v10  ;;  %v20348_v36 = vpack.c.bf16 %v14239_v13, %v14236_v6  ;;  %v14334_v35 = vsub.f32 %v14165_v53, %v14236_v6  ;;  %v15232_v6 = vmul.f32 -1.442695, %v20404_v20 }
 0x88d   : > { %17632 = vmatpush3.bf16.msra.mxu1 %v20184_v3  ;;  %17031 = vmatprep.mubr.f32.mxu1 %v13543_v26  ;;  %v14164_v3 = vld [vmem:[%s18514_s27 + $0x8] sm:$0xff]  ;;  %s20645_s27 = sld [smem:[#allocation13_spill]] }
 0x88e   : > { %17634 = vmatprep.subr.bf16.mxu1 %v20189_v12  ;;  %v14335_v47 = vand.u32 4294901760, %v14334_v35  ;;  %v20361_v58 = vpack.c.bf16 %v14341_v29, %v14334_v35 }
 0x890   : > { %v14336_v52 = vsub.f32 %v14334_v35, %v14335_v47  ;;  %v20365_v45 = vpack.c.bf16 %v14342_v34, %v14335_v47 }
 0x891   : > { %17636 = vmatpush3.bf16.msra.mxu1 %v20189_v12  ;;  %v14230_v12 = vand.u32 4294901760, %v14163_v44 }
 0x892   : > { %17638 = vmatprep.subr.bf16.mxu1 %v20151_v4  ;;  %v14337_v42 = vand.u32 4294901760, %v14336_v52 }
 0x893   : > { %s20646_s1 = scalar_lea.vmem %s20645_s27, %s18451_s0 }
 0x894   : > { %17032 = vmatmul.mubr.f32.vlgmr.msra.gmra.mrb[28].mxu1 %v13553_v2  ;;  %v20359_v63 = vpack.c.bf16 %v14344_v21, %v14337_v42  ;;  %v15229_v2 = vmul.f32 -1.442695, %v20380_v9 }
 0x895   : > { %17640 = vmatpush3.bf16.msra.mxu1 %v20151_v4  ;;  %17042 = vmatprep.mubr.f32.mxu1 %v13544_v59  ;;  %v15236_v59 = vmul.f32 -1.442695, %v20388_v41 }
 0x896   : > { %17642 = vmatprep.subr.bf16.mxu1 %v20155_v60 }
 0x899   : > { %17644 = vmatpush3.bf16.msra.mxu1 %v20155_v60 }
 0x89a   : > { %17646 = vmatprep.subr.bf16.mxu1 %v20214_v62 }
 0x89c   : > { %17043 = vmatmul.mubr.f32.vlgmr.msra.gmra.mrb[28].mxu1 %v13554_v8  ;;  %v15235_v8 = vmul.f32 -1.442695, %v20377_v15 }
 0x89d   : > { %17648 = vmatpush3.bf16.msra.mxu1 %v20214_v62  ;;  %17053 = vmatprep.mubr.f32.mxu1 %v13542_v33  ;;  %v14233_v62 = vand.u32 4294901760, %v14164_v3 }
 0x89e   : > { %17650 = vmatprep.subr.bf16.mxu1 %v20225_v61 }
 0x8a1   : > { %17652 = vmatpush3.bf16.msra.mxu1 %v20225_v61  ;;  %v20346_v61 = vpack.c.bf16 %v14233_v62, %v14230_v12 }
 0x8a2   : > { %17654 = vmatprep.subr.bf16.mxu1 %v20151_v4 }
 0x8a3   : > { %17662 = vmatprep.subr.bf16.mxu0 %v20346_v61 }
 0x8a4   : > { %17054 = vmatmul.mubr.f32.vlgmr.msra.gmra.mrb[28].mxu1 %v13552_v10  ;;  %17664 = vmatpush3.bf16.msra.mxu0 %v20346_v61 }
 0x8a5   : > { %17656 = vmatpush3.bf16.msra.mxu1 %v20151_v4  ;;  %17064 = vmatprep.mubr.f32.mxu1 %v13542_v33  ;;  %v14320_v4 = vsub.f32 %v14163_v44, %v14230_v12  ;;  %v15233_v33 = vmul.f32 -1.442695, %v20374_v11  ;;  %v15230_v44 = vmul.f32 -1.442695, %v20400_v43  ;;  %v15231_v12 = vmul.f32 -1.442695, %v20396_v51 }
 0x8a6   : > { %17658 = vmatprep.subr.bf16.mxu1 %v20155_v60  ;;  %17666 = vmatprep.subr.bf16.mxu0 %v20348_v36 }
 0x8a7   : > { %v14321_v17 = vand.u32 4294901760, %v14320_v4  ;;  %18190 = vpow2.f32 %v15233_v33 }
 0x8a8   : > { %17668 = vmatpush3.bf16.msra.mxu0 %v20348_v36  ;;  %18192 = vpow2.f32 %v15229_v2 }
 0x8a9   : > { %17660 = vmatpush3.bf16.msra.mxu1 %v20155_v60  ;;  %v14327_v60 = vsub.f32 %v14164_v3, %v14233_v62  ;;  %v14322_v22 = vsub.f32 %v14320_v4, %v14321_v17  ;;  %v15212_v62 = vld [vmem:[%s20646_s1] ss:$0 sm:$0xff] }
 0x8ab   : > { %v14328_v54 = vand.u32 4294901760, %v14327_v60  ;;  %v14323_v0 = vand.u32 4294901760, %v14322_v22  ;;  %v20354_v56 = vpack.c.bf16 %v14327_v60, %v14320_v4 }
 0x8ac   : > { %17065 = vmatmul.mubr.f32.vlgmr.msra.gmra.mrb[28].mxu1 %v13552_v10  ;;  %v20384_v10 = vcombine.high %v20374_v11, %v20374_v11 }
 0x8ad   : > { %v14329_v46 = vsub.f32 %v14327_v60, %v14328_v54  ;;  %v20363_v14 = vpack.c.bf16 %v14328_v54, %v14321_v17  ;;  %v3314_v54 = vcombine.low %v15212_v62, %v15212_v62 }
 0x8ae   : > { %v15234_v26 = vmul.f32 -1.442695, %v20384_v10 }
 0x8af   : > { %v14330_v50 = vand.u32 4294901760, %v14329_v46  ;;  %v3321_v47 = vrot.slane %v3314_v54, %v18632_v25  ;;  %v15227_v54 = vld [vmem:[%s1294_s24] ss:$0 sm:$0xff] }
 0x8b0   : > { %18194 = vpow2.f32 %v15234_v26  ;;  %v20647_v26 = vld [vmem:[#allocation41_spill] sm:$0xff] }
 0x8b1   : > { %v20356_v49 = vpack.c.bf16 %v14330_v50, %v14323_v0  ;;  %18196 = vpow2.f32 %v15235_v8  ;;  %v18191_v3 = vpop.eup %18190  ;;  %v3322_v27 = vcombine.low %v3321_v47, %v3321_v47 }
 0x8b2   : > { %18198 = vpow2.f32 %v15236_v59  ;;  %v18193_v53 = vpop.eup %18192  ;;  %v14127_v4 = vadd.f32 1.0, %v18191_v3  ;;  %v20649_v3 = vld [vmem:[#allocation42_spill] sm:$0xff] }
 0x8b3   : > { %17670 = vmatprep.subr.bf16.mxu0 %v20356_v49  ;;  %18200 = vpow2.f32 %v15230_v44  ;;  %v14123_v17 = vadd.f32 1.0, %v18193_v53  ;;  %v17717_v8 = vadd.f32 %v20647_v26, %v3322_v27  ;;  %v17718_v53 = vadd.f32 %v20649_v3, %v3322_v27 }
 0x8b4   : > { %18202 = vpow2.f32 %v15231_v12 }
 0x8b5   : > { %18204 = vpow2.f32 %v15232_v6  ;;  %v3875_v6 = vcombine.high %v17717_v8, %v17717_v8 }
 0x8b6   : > { %18206 = vrcp.f32 %v14127_v4 }
 0x8b7   : > { %18208 = vrcp.f32 %v14123_v17  ;;  %v3858_v17 = vcombine.high %v17718_v53, %v17718_v53 }
 0x8ba   : > { %v18195_v16 = vpop.eup %18194 }
 0x8bb   : > { %v18197_v13 = vpop.eup %18196  ;;  %v14128_v35 = vadd.f32 1.0, %v18195_v16 }
 0x8bc   : > { %v18199_v60 = vpop.eup %18198  ;;  %v14129_v29 = vadd.f32 1.0, %v18197_v13 }
 0x8bd   : > { %v14130_v22 = vadd.f32 1.0, %v18199_v60  ;;  %18210 = vrcp.f32 %v14128_v35  ;;  %v18201_v37 = vpop.eup %18200  ;;  %v3882_v60 = vrot.slane %v17717_v8, %v18632_v25 }
 0x8be   : > { %18212 = vrcp.f32 %v14129_v29  ;;  %v18203_v31 = vpop.eup %18202  ;;  %v14124_v2 = vadd.f32 1.0, %v18201_v37 }
 0x8bf   : > { %18214 = vrcp.f32 %v14130_v22  ;;  %v18205_v33 = vpop.eup %18204  ;;  %v14125_v44 = vadd.f32 1.0, %v18203_v31  ;;  %v3865_v22 = vrot.slane %v17718_v53, %v18632_v25 }
 0x8c0   : > { %v18207_v59 = vpop.eup %18206  ;;  %v14126_v62 = vadd.f32 1.0, %v18205_v33 }
 0x8c1   : > { %v18209_v40 = vpop.eup %18208  ;;  %v14151_v29 = vmul.f32 %v18207_v59, %v20374_v11 }
 0x8c7   : > { %v18211_v12 = vpop.eup %18210 }
 0x8c8   : > { %v18213_v16 = vpop.eup %18212 }
 0x8c9   : > { %v18215_v13 = vpop.eup %18214 }
 0x8ca   : > { %v14154_v11 = vmul.f32 %v18215_v13, %v20388_v41 }
 0x97f   : > { %v17066_v46 = vpop.f32.mrb[28].mxu1 }
 0x980   : > { %v17731_v34 = vadd.f32 1e-05, %v17066_v46  ;;  %v13991_v0 = vpop.f32.mrb[29].mxu1 }
 0x981   : > { %v17732_v50 = vadd.f32 1e-05, %v13991_v0  ;;  %v14147_v0 = vmul.f32 %v18209_v40, %v20380_v9 }
 0x982   : > { %v14020_v52 = vcombine.high %v17731_v34, %v17731_v34  ;;  %v14027_v39 = vrot.slane %v17731_v34, %v18632_v25  ;;  %v14152_v34 = vmul.f32 %v18211_v12, %v20384_v10  ;;  %v3872_v10 = vrot.slane %v3858_v17, %v18632_v25 }
 0x983   : > { %v14003_v42 = vcombine.high %v17732_v50, %v17732_v50  ;;  %v14010_v21 = vrot.slane %v17732_v50, %v18632_v25  ;;  %v3889_v50 = vrot.slane %v3875_v6, %v18632_v25 }
 0x984   : > { %v14034_v24 = vrot.slane %v14020_v52, %v18632_v25  ;;  %v14035_v1 = vcombine.high %v14027_v39, %v14027_v39  ;;  %18216 = vrsqrt.f32 %v14027_v39  ;;  %v15228_v52 = vld [vmem:[%s1297_s22] ss:$0 sm:$0xff] }
 0x985   : > { %v14017_v5 = vrot.slane %v14003_v42, %v18632_v25  ;;  %v14018_v57 = vcombine.high %v14010_v21, %v14010_v21  ;;  %18218 = vrsqrt.f32 %v14010_v21  ;;  %v14153_v21 = vmul.f32 %v18213_v16, %v20377_v15 }
 0x986   : > { %v14036_v7 = vcombine.high %v14034_v24, %v14034_v24  ;;  %18220 = vrsqrt.f32 %v14035_v1  ;;  %v3890_v1 = vcombine.high %v3882_v60, %v3882_v60  ;;  %v3891_v15 = vcombine.high %v3889_v50, %v3889_v50 }
 0x987   : > { %18222 = vrsqrt.f32 %v14034_v24  ;;  %v14019_v38 = vcombine.high %v14017_v5, %v14017_v5 }
 0x988   : > { %18224 = vrsqrt.f32 %v14036_v7 }
 0x989   : > { %18226 = vrsqrt.f32 %v14018_v57  ;;  %v3873_v57 = vcombine.high %v3865_v22, %v3865_v22 }
 0x98a   : > { %18228 = vrsqrt.f32 %v14017_v5 }
 0x98b   : > { %18230 = vrsqrt.f32 %v14019_v38 }
 0x98c   : > { %18232 = vrcp.f32 %v14124_v2 }
 0x98d   : > { %18234 = vrcp.f32 %v14125_v44 }
 0x98e   : > { %v18217_v4 = vpop.eup %18216  ;;  %18236 = vrcp.f32 %v14126_v62 }
 0x98f   : > { %v18219_v35 = vpop.eup %18218  ;;  %v14057_v46 = vmul.f32 %v18217_v4, %v20280_v32 }
 0x990   : > { %v18221_v47 = vpop.eup %18220  ;;  %v14053_v39 = vmul.f32 %v18219_v35, %v20284_v23 }
 0x991   : > { %v18223_v42 = vpop.eup %18222  ;;  %v14058_v27 = vmul.f32 %v18221_v47, %v20286_v19  ;;  %v14072_v24 = vmul.f32 %v15227_v54, %v14057_v46 }
 0x992   : > { %v18225_v32 = vpop.eup %18224  ;;  %v14059_v9 = vmul.f32 %v18223_v42, %v20288_v30  ;;  %v14068_v37 = vmul.f32 %v15227_v54, %v14053_v39  ;;  %v3874_v42 = vcombine.high %v3872_v10, %v3872_v10 }
 0x993   : > { %v18227_v5 = vpop.eup %18226  ;;  %v14060_v7 = vmul.f32 %v18225_v32, %v20296_v18  ;;  %v14073_v23 = vmul.f32 %v15227_v54, %v14058_v27  ;;  %v14087_v31 = vadd.f32 %v15228_v52, %v14072_v24 }
 0x994   : > { %v18229_v38 = vpop.eup %18228  ;;  %v14074_v33 = vmul.f32 %v15227_v54, %v14059_v9  ;;  %v14054_v41 = vmul.f32 %v18227_v5, %v20291_v28  ;;  %v14083_v19 = vadd.f32 %v15228_v52, %v14068_v37 }
 0x995   : > { %v18231_v2 = vpop.eup %18230  ;;  %v14075_v26 = vmul.f32 %v15227_v54, %v14060_v7  ;;  %v14088_v8 = vadd.f32 %v15228_v52, %v14073_v23  ;;  %v14095_v59 = vadd.f32 %v14087_v31, %v3882_v60  ;;  %v14055_v40 = vmul.f32 %v18229_v38, %v20294_v55 }
 0x996   : > { %v18233_v30 = vpop.eup %18232  ;;  %v14089_v44 = vadd.f32 %v15228_v52, %v14074_v33  ;;  %v14056_v3 = vmul.f32 %v18231_v2, %v20303_v48  ;;  %v14069_v53 = vmul.f32 %v15227_v54, %v14054_v41  ;;  %v14091_v18 = vadd.f32 %v14083_v19, %v3865_v22 }
 0x997   : > { %v14090_v12 = vadd.f32 %v15228_v52, %v14075_v26  ;;  %v14096_v62 = vadd.f32 %v14088_v8, %v3890_v1  ;;  %v14070_v16 = vmul.f32 %v15227_v54, %v14055_v40  ;;  %v14159_v6 = vmul.f32 %v14151_v29, %v14095_v59  ;;  %v18235_v13 = vpop.eup %18234 }
 0x998   : > { %v14071_v4 = vmul.f32 %v15227_v54, %v14056_v3  ;;  %v14084_v28 = vadd.f32 %v15228_v52, %v14069_v53  ;;  %v14155_v17 = vmul.f32 %v14147_v0, %v14091_v18  ;;  %v14097_v35 = vadd.f32 %v14089_v44, %v3889_v50  ;;  %v18237_v46 = vpop.eup %18236  ;;  %v18238_v18 = vld [vmem:[%s20591_s13 + $0x8] sm:$0x3] }
 0x999   : > { %v14148_v60 = vmul.f32 %v18233_v30, %v20400_v43  ;;  %v14085_v47 = vadd.f32 %v15228_v52, %v14070_v16  ;;  %v14098_v55 = vadd.f32 %v14090_v12, %v3891_v15  ;;  %v14160_v39 = vmul.f32 %v14152_v34, %v14096_v62 }
 0x99a   : > { %v14086_v27 = vadd.f32 %v15228_v52, %v14071_v4  ;;  %v14092_v48 = vadd.f32 %v14084_v28, %v3873_v57  ;;  %v14161_v24 = vmul.f32 %v14153_v21, %v14097_v35  ;;  %v14149_v22 = vmul.f32 %v18235_v13, %v20396_v51  ;;  %v18240_v28 = vld [vmem:[%s20591_s13 + $0xa] sm:$0x3]  ;;  %v18241_v35 = vld [vmem:[%s20591_s13 + $0xc] sm:$0x3] }
 0x99b   : > { %v14093_v32 = vadd.f32 %v14085_v47, %v3872_v10  ;;  %v14162_v1 = vmul.f32 %v14154_v11, %v14098_v55  ;;  %v14198_v29 = vcombine.low %v14159_v6, %v14160_v39  ;;  %v14150_v54 = vmul.f32 %v18237_v46, %v20404_v20  ;;  %v18239_v6 = vld [vmem:[%s20591_s13] sm:$0x3]  ;;  %v18243_v55 = vld [vmem:[%s20591_s13 + $0x4] sm:$0x3] }
 0x99c   : > { %v14094_v9 = vadd.f32 %v14086_v27, %v3874_v42  ;;  %v14156_v0 = vmul.f32 %v14148_v60, %v14092_v48  ;;  %v18244_v42 = vld [vmem:[%s20591_s13 + $0xe] sm:$0x3]  ;;  %v18245_v48 = vld [vmem:[%s20591_s13 + $0x6] sm:$0x3] }
 0x99d   : > { %v14157_v50 = vmul.f32 %v14149_v22, %v14093_v32  ;;  %v14199_v37 = vcombine.low %v14161_v24, %v14162_v1  ;;  %v14206_v7 = vrot.slane %v14198_v29, %v18632_v25 }
 0x99e   : > { %v14158_v5 = vmul.f32 %v14150_v54, %v14094_v9  ;;  %v14181_v43 = vcombine.low %v14155_v17, %v14156_v0 }
 0x99f   : > { %v14213_v34 = vrot.slane %v14199_v37, %v18632_v25 }
 0x9a0   : > { %v14182_v52 = vcombine.low %v14157_v50, %v14158_v5  ;;  %v14189_v21 = vrot.slane %v14181_v43, %v18632_v25 }
 0x9a1   : > { %v14214_v57 = vcombine.low %v14206_v7, %v14213_v34 }
 0x9a2   : > { %v14196_v51 = vrot.slane %v14182_v52, %v18632_v25 }
 0x9a3   : > { %v14227_v11 = vsel %vm2627_vm3, %v14214_v57, 0 }
 0x9a4   : > { %v14197_v10 = vcombine.low %v14189_v21, %v14196_v51  ;;  %v14308_v20 = vand.u32 4294901760, %v14227_v11 }
 0x9a6   : > { %v14225_v23 = vsel %vm2627_vm3, %v14197_v10, 0  ;;  %v14309_v31 = vsub.f32 %v14227_v11, %v14308_v20 }
 0x9a7   : > { %v14298_v38 = vand.u32 4294901760, %v14225_v23 }
 0x9a8   : > { %v14310_v15 = vand.u32 4294901760, %v14309_v31 }
 0x9a9   : > { %v14299_v33 = vsub.f32 %v14225_v23, %v14298_v38 }
 0x9aa   : > { %v14311_v19 = vsub.f32 %v14309_v31, %v14310_v15 }
 0x9ab   : > { %v14300_v41 = vand.u32 4294901760, %v14299_v33 }
 0x9ac   : > { %v14312_v8 = vand.u32 4294901760, %v14311_v19 }
 0x9ad   : > { %v14301_v2 = vsub.f32 %v14299_v33, %v14300_v41 }
 0x9af   : > { %v14302_v26 = vand.u32 4294901760, %v14301_v2 }
 0x9b1   : > { %17075 = vmatprep.mubr.f32.mxu0 %v14302_v26 }
 0x9b2   : > { %17076 = vmatmul.mubr.f32.vlgmr.msra.gmra.mrb[28].mxu0 %v14312_v8 }
 0x9b3   : > { %17672 = vmatpush3.bf16.msra.mxu0 %v20356_v49  ;;  %17086 = vmatprep.mubr.f32.mxu0 %v14298_v38 }
 0x9b4   : > { %17674 = vmatprep.subr.bf16.mxu0 %v20359_v63 }
 0x9b7   : > { %17676 = vmatpush3.bf16.msra.mxu0 %v20359_v63 }
 0x9b8   : > { %17678 = vmatprep.subr.bf16.mxu0 %v20354_v56 }
 0x9ba   : > { %17087 = vmatmul.mubr.f32.vlgmr.msra.gmra.mrb[28].mxu0 %v14308_v20 }
 0x9bb   : > { %17680 = vmatpush3.bf16.msra.mxu0 %v20354_v56  ;;  %17097 = vmatprep.mubr.f32.mxu0 %v14299_v33  ;;  %v15237_v56 = vld [vmem:[%s1305_s30] ss:$0 sm:$0xff] }
 0x9bc   : > { %17682 = vmatprep.subr.bf16.mxu0 %v20361_v58  ;;  %v14215_v49 = vcombine.low %v15237_v56, %v15237_v56 }
 0x9be   : > { %v14222_v63 = vrot.slane %v14215_v49, %v18632_v25 }
 0x9bf   : > { %17684 = vmatpush3.bf16.msra.mxu0 %v20361_v58 }
 0x9c0   : > { %17686 = vmatprep.subr.bf16.mxu0 %v20346_v61  ;;  %v14223_v58 = vcombine.low %v14222_v63, %v14222_v63 }
 0x9c2   : > { %17098 = vmatmul.mubr.f32.vlgmr.msra.gmra.mrb[28].mxu0 %v14309_v31 }
 0x9c3   : > { %17688 = vmatpush3.bf16.msra.mxu0 %v20346_v61  ;;  %17108 = vmatprep.mubr.f32.mxu0 %v14300_v41 }
 0x9c4   : > { %17690 = vmatprep.subr.bf16.mxu0 %v20348_v36 }
 0x9c7   : > { %17692 = vmatpush3.bf16.msra.mxu0 %v20348_v36 }
 0x9c8   : > { %17694 = vmatprep.subr.bf16.mxu0 %v20363_v14 }
 0x9ca   : > { %17109 = vmatmul.mubr.f32.vlgmr.msra.gmra.mrb[28].mxu0 %v14310_v15 }
 0x9cb   : > { %17696 = vmatpush3.bf16.msra.mxu0 %v20363_v14  ;;  %17119 = vmatprep.mubr.f32.mxu0 %v14298_v38 }
 0x9cc   : > { %17698 = vmatprep.subr.bf16.mxu0 %v20365_v45 }
 0x9cf   : > { %17700 = vmatpush3.bf16.msra.mxu0 %v20365_v45 }
 0x9d0   : > { %17702 = vmatprep.subr.bf16.mxu0 %v20346_v61 }
 0x9d2   : > { %17120 = vmatmul.mubr.f32.vlgmr.msra.gmra.mrb[28].mxu0 %v14308_v20 }
 0x9d3   : > { %17704 = vmatpush3.bf16.msra.mxu0 %v20346_v61  ;;  %17130 = vmatprep.mubr.f32.mxu0 %v14298_v38 }
 0x9d4   : > { %17706 = vmatprep.subr.bf16.mxu0 %v20348_v36 }
 0x9d7   : > { %17708 = vmatpush3.bf16.msra.mxu0 %v20348_v36 }
 0x9da   : > { %17131 = vmatmul.mubr.f32.vlgmr.msra.gmra.mrb[28].mxu0 %v14308_v20 }
 0xaad   : > { %v17132_v14 = vpop.f32.mrb[28].mxu0 }
 0xaae   : > { %v17733_v45 = vadd.f32 %v17132_v14, %v14223_v58  ;;  %v14747_v59 = vpop.f32.mrb[29].mxu0 }
 0xaaf   : > { %v17734_v40 = vadd.f32 %v14747_v59, %v14223_v58 }
 0xab0   : > { %v14776_v61 = vcombine.high %v17733_v45, %v17733_v45  ;;  %v14783_v30 = vrot.slane %v17733_v45, %v18632_v25 }
 0xab1   : > { %v14759_v36 = vcombine.high %v17734_v40, %v17734_v40  ;;  %v14766_v44 = vrot.slane %v17734_v40, %v18632_v25 }
 0xab2   : > { %v14790_v3 = vrot.slane %v14776_v61, %v18632_v25  ;;  %v14791_v53 = vcombine.high %v14783_v30, %v14783_v30  ;;  %v14805_v12 = vadd.f32 %v18238_v18, %v14783_v30 }
 0xab3   : > { %v14773_v62 = vrot.slane %v14759_v36, %v18632_v25  ;;  %v14774_v16 = vcombine.high %v14766_v44, %v14766_v44  ;;  %v14801_v13 = vadd.f32 %v18239_v6, %v14766_v44  ;;  %v18242_v25 = vld [vmem:[%s20591_s13 + $0x2] sm:$0x3] }
 0xab4   : > { %v14792_v4 = vcombine.high %v14790_v3, %v14790_v3  ;;  %v14806_v17 = vadd.f32 %v18240_v28, %v14791_v53  ;;  %v14807_v46 = vadd.f32 %v18241_v35, %v14790_v3  ;;  %14813 = vst.msk [vmem:[%s20591_s13 + $0x8] sm:$0x3] %vm1340_vm1, %v14805_v12 }
 0xab5   : > { %v14775_v60 = vcombine.high %v14773_v62, %v14773_v62  ;;  %v14802_v47 = vadd.f32 %v18242_v25, %v14774_v16  ;;  %v14803_v39 = vadd.f32 %v18243_v55, %v14773_v62  ;;  %14809 = vst.msk [vmem:[%s20591_s13] sm:$0x3] %vm1340_vm1, %v14801_v13 }
 0xab6   : > { %v14808_v27 = vadd.f32 %v18244_v42, %v14792_v4  ;;  %14814 = vst.msk [vmem:[%s20591_s13 + $0xa] sm:$0x3] %vm1340_vm1, %v14806_v17  ;;  %14815 = vst.msk [vmem:[%s20591_s13 + $0xc] sm:$0x3] %vm1340_vm1, %v14807_v46 }
 0xab7   : > { %v14804_v24 = vadd.f32 %v18245_v48, %v14775_v60  ;;  %14810 = vst.msk [vmem:[%s20591_s13 + $0x2] sm:$0x3] %vm1340_vm1, %v14802_v47  ;;  %14811 = vst.msk [vmem:[%s20591_s13 + $0x4] sm:$0x3] %vm1340_vm1, %v14803_v39 }
 0xab8   : > { %14816 = vst.msk [vmem:[%s20591_s13 + $0xe] sm:$0x3] %vm1340_vm1, %v14808_v27 }
 0xab9   : > { %14812 = vst.msk [vmem:[%s20591_s13 + $0x6] sm:$0x3] %vm1340_vm1, %v14804_v24 }
 0xaba PF: > { %s20651_s24 = sld [smem:[#allocation31_spill]] }
 0xac0   : > { %s70_s7 = sadd.s32 1, %s20651_s24  }
 0xac1   : > { %p67_p5 = scmp.ge.s32.totalorder %s70_s7, 4  }
 0xac3   :  { %69 = sbr.rel (!%p67_p5) target bundleno = 64 (0x40), region = 288 }

</bundles_post_ra>
